<compile_context>
chip_gen: v7x
topology: tpu7x:2x2x1
jax: 0.10.0
libtpu: 0.0.40
codegen_flags: <defaults>
</compile_context>

<pallas_src>
import jax
import jax.numpy as jnp
import numpy as np
from jax.experimental import pallas as pl
from jax.experimental.pallas import tpu as pltpu
from jax.scipy.linalg import block_diag


# ----------------------------- Pallas kernels ------------------------------

def embed_uproj_kernel(x_ref, emb_ref, ucat_ref, bcat_ref, out_ref):
    """embedded = x @ emb ; uproj = embedded @ U_cat + (b_all + b_U).

    Both results are stored as one lane-dense slab: [uproj (16H) | embedded (H)].
    """
    e = jnp.dot(x_ref[...], emb_ref[...], preferred_element_type=jnp.float32)
    up = (jnp.dot(e, ucat_ref[...], preferred_element_type=jnp.float32)
          + bcat_ref[...])
    out_ref[...] = jnp.concatenate([up, e], axis=-1)


def fused_recurrence_head_kernel(up_ref, ts_ref, emb_ref, wall_ref, wd_ref,
                                 bd_ref, whf_ref, whb_ref, wout_ref,
                                 logits_ref, out_scr):
    """All 4 TimeLSTMs (rnn1|rnn2|rnn1b|rnn2b) fused on the lane axis; the
    full time recurrence runs as an unrolled fori_loop (h/c as loop carries),
    followed by the online-softmax attention head — a single invocation."""
    SEQ, B, G = up_ref.shape
    NH = G // 4                                    # 4*H (h/c lanes, 4 LSTMs)
    H = emb_ref.shape[-1]

    bd = jnp.broadcast_to(bd_ref[...], (B, NH))    # hoisted bias broadcast

    # ---- time recurrence ----------------------------------------------------
    def lstm_step(s, carry):
        h, c = carry
        # time-decayed cell adjustment (block-diagonal W_d -> all 4 LSTMs)
        c_s1 = jnp.tanh(jnp.dot(c, wd_ref[...],
                                preferred_element_type=jnp.float32) + bd)
        ts_vec = jnp.concatenate(
            [jnp.broadcast_to(ts_ref[s], (B, NH // 2)),             # fwd lanes
             jnp.broadcast_to(ts_ref[SEQ - 1 - s], (B, NH // 2))],  # bwd lanes
            axis=-1)
        c_adj = (c - c_s1) + c_s1 * ts_vec

        # pre-merged U term: fwd lanes already from time s, bwd from SEQ-1-s
        z = jnp.dot(h, wall_ref[...],
                    preferred_element_type=jnp.float32) + up_ref[s]
        g = jax.nn.sigmoid(z)
        f_g   = g[:, 0 * NH:1 * NH]
        i_g   = g[:, 1 * NH:2 * NH]
        o_g   = g[:, 2 * NH:3 * NH]
        c_tmp = g[:, 3 * NH:4 * NH]        # sigmoid candidate, matching source

        c_new = f_g * c_adj + i_g * c_tmp
        h_new = o_g * jnp.tanh(c_new)
        out_scr[s] = h_new                 # lane-dense (B, 4H) store
        return h_new, c_new

    h0 = jnp.zeros((B, NH), jnp.float32)
    jax.lax.fori_loop(0, SEQ, lstm_step, (h0, h0), unroll=True)

    # ---- attention head: online softmax over seq + ctx accumulation --------
    def head_step(t, carry):
        m, l, acc = carry
        hf = out_scr[t][:, :NH // 2]               # [rnn1 | rnn2 ] at time t
        hb = out_scr[SEQ - 1 - t][:, NH // 2:]     # [rnn1b| rnn2b] at time t
        hd = (jnp.dot(hf, whf_ref[...], preferred_element_type=jnp.float32)
              + jnp.dot(hb, whb_ref[...], preferred_element_type=jnp.float32))
        beta_t = jnp.tanh(hd[:, :H])               # (B, H)  Beta
        e_t = hd[:, H:]                            # (B, 1)  alpha logit
        m_new = jnp.maximum(m, e_t)
        scale = jnp.exp(m - m_new)
        p = jnp.exp(e_t - m_new)
        l_new = l * scale + p
        acc_new = acc * scale + p * beta_t * emb_ref[t]
        return m_new, l_new, acc_new

    m0 = jnp.full((B, 1), -jnp.inf, jnp.float32)
    l0 = jnp.zeros((B, 1), jnp.float32)
    a0 = jnp.zeros((B, H), jnp.float32)
    _, l, acc = jax.lax.fori_loop(0, SEQ, head_step, (m0, l0, a0), unroll=True)

    ctx = acc * pl.reciprocal(l, approx=False)
    logits_ref[...] = jnp.dot(ctx, wout_ref[...],
                              preferred_element_type=jnp.float32)


# ------------------------------- wrappers -----------------------------------

def embed_and_uproj(x_flat, emb_w, u_cat, b_cat):
    M, V = x_flat.shape
    H = emb_w.shape[1]
    G = u_cat.shape[1]
    bm = min(512, M)                       # ragged M handled by pl.cdiv grid
    return pl.pallas_call(
        embed_uproj_kernel,
        out_shape=jax.ShapeDtypeStruct((M, G + H), jnp.float32),
        grid=(pl.cdiv(M, bm),),
        in_specs=[pl.BlockSpec((bm, V), lambda i: (i, 0)),
                  pl.BlockSpec((V, H), lambda i: (0, 0)),
                  pl.BlockSpec((H, G), lambda i: (0, 0)),
                  pl.BlockSpec((1, G), lambda i: (0, 0))],
        out_specs=pl.BlockSpec((bm, G + H), lambda i: (i, 0)),
        compiler_params=pltpu.CompilerParams(
            dimension_semantics=("parallel",)),
    )(x_flat, emb_w, u_cat, b_cat)


def fused_recurrence_head(up_merged, ts, embedded, wall_blk, wd_blk, bd_cat,
                          wh_f, wh_b, wout):
    SEQ, B, G = up_merged.shape
    NH = G // 4
    H = embedded.shape[-1]
    C = wout.shape[-1]

    def full(shape):
        return pl.BlockSpec(shape, lambda i, _n=len(shape): (0,) * _n)

    return pl.pallas_call(
        fused_recurrence_head_kernel,
        out_shape=jax.ShapeDtypeStruct((B, C), jnp.float32),
        grid=(1,),
        in_specs=[full((SEQ, B, G)), full((SEQ, B, 1)), full((SEQ, B, H)),
                  full((NH, G)), full((NH, NH)), full((1, NH)),
                  full((NH // 2, H + 1)), full((NH // 2, H + 1)),
                  full((H, C))],
        out_specs=full((B, C)),
        scratch_shapes=[pltpu.VMEM((SEQ, B, NH), jnp.float32)],
        compiler_params=pltpu.CompilerParams(
            dimension_semantics=("arbitrary",)),
    )(up_merged, ts, embedded, wall_blk, wd_blk, bd_cat, wh_f, wh_b, wout)


# --------------------- fused-weight preparation (one-time) -------------------

def prepare_params(params, H):
    """Reorganize the per-LSTM weights into the fused, gate-major layouts."""
    lstms = [params["rnn1"], params["rnn2"], params["rnn1b"], params["rnn2b"]]
    w_all_l, b_all_l, u_all_l, b_u_l, w_d_l, b_d_l = zip(*lstms)

    # gate-major, lstm-minor columns: [f1 f2 f1b f2b | i... | o... | c...]
    def gate_major(mats):
        return jnp.concatenate(
            [jnp.concatenate([m[..., g * H:(g + 1) * H] for m in mats], axis=-1)
             for g in range(4)], axis=-1)

    u_cat = gate_major(u_all_l)                                   # (H, 16H)
    b_cat = gate_major(b_all_l) + gate_major(b_u_l)               # (1, 16H)
    wall_blk = jnp.concatenate(
        [block_diag(*[w[:, g * H:(g + 1) * H] for w in w_all_l])
         for g in range(4)], axis=-1)                             # (4H, 16H)
    wd_blk = block_diag(*w_d_l)                                   # (4H, 4H)
    bd_cat = jnp.concatenate(b_d_l, axis=-1)                      # (1, 4H)

    # fused head weights: per stream, (2H) -> [Beta pre-tanh (H) | E (1)]
    wa, wb = params["wa"], params["wb"]                           # (2H,1),(2H,H)
    zHH = jnp.zeros((H, H), jnp.float32)
    zH1 = jnp.zeros((H, 1), jnp.float32)
    wh_f = jnp.concatenate([jnp.concatenate([zHH, wa[:H]], axis=1),   # rnn1
                            jnp.concatenate([wb[:H], zH1], axis=1)],  # rnn2
                           axis=0)                                    # (2H, H+1)
    wh_b = jnp.concatenate([jnp.concatenate([zHH, wa[H:]], axis=1),   # rnn1b
                            jnp.concatenate([wb[H:], zH1], axis=1)],  # rnn2b
                           axis=0)

    # vocab padded to a multiple of 128 (lane-aligned contraction dim)
    V = params["emb"].shape[0]
    V_pad = ((V + 127) // 128) * 128
    emb_pad = jnp.pad(params["emb"], ((0, V_pad - V), (0, 0)))

    return {"emb": emb_pad, "u_cat": u_cat, "b_cat": b_cat,
            "wall_blk": wall_blk, "wd_blk": wd_blk, "bd_cat": bd_cat,
            "wh_f": wh_f, "wh_b": wh_b, "wout": params["wout"]}


# --------------------------------- forward -----------------------------------

def retain_forward(inputs, timestamps, prep):
    """inputs: (b, seq, 1400) multi-hot, timestamps: (b, seq) -> logits (b, C)."""
    B, SEQ, V = inputs.shape
    H = prep["wout"].shape[0]
    G = prep["u_cat"].shape[1]            # 16H
    NH = G // 4
    V_pad = prep["emb"].shape[0]

    # pad batch to a multiple of 8 sublanes (padded rows are fully independent)
    B_pad = max(8, ((B + 7) // 8) * 8)
    if B_pad != B:
        inputs = jnp.pad(inputs, ((0, B_pad - B), (0, 0), (0, 0)))
        timestamps = jnp.pad(timestamps, ((0, B_pad - B), (0, 0)),
                             constant_values=1.0)

    # seq-major token matrix, vocab zero-padded to the lane-aligned width
    x_flat = jnp.transpose(inputs, (1, 0, 2)).reshape(SEQ * B_pad, V)
    if V_pad != V:
        x_flat = jnp.pad(x_flat, ((0, 0), (0, V_pad - V)))

    eup = embed_and_uproj(x_flat, prep["emb"], prep["u_cat"], prep["b_cat"])
    uproj = eup[:, :G].reshape(SEQ, B_pad, G)
    embedded = eup[:, G:].reshape(SEQ, B_pad, H)

    # pre-merge fwd/bwd U-projection lanes once (off the recurrence hot loop):
    # per gate block of 4H lanes, the first 2H (rnn1|rnn2) come from time s,
    # the last 2H (rnn1b|rnn2b) from time SEQ-1-s.
    up4 = uproj.reshape(SEQ, B_pad, 4, NH)
    up_merged = jnp.concatenate(
        [up4[:, :, :, :NH // 2], up4[::-1, :, :, NH // 2:]],
        axis=-1).reshape(SEQ, B_pad, G)

    ts = jnp.transpose(timestamps, (1, 0))[:, :, None]            # (SEQ, B, 1)

    logits = fused_recurrence_head(up_merged, ts, embedded, prep["wall_blk"],
                                   prep["wd_blk"], prep["bd_cat"],
                                   prep["wh_f"], prep["wh_b"], prep["wout"])
    return logits[:B]


# --------------------------- parameter creation -----------------------------

def init_linear(key, fan_in, fan_out, bias=True):
    kw, kb = jax.random.split(key)
    bound = 1.0 / float(np.sqrt(fan_in))
    w = jax.random.uniform(kw, (fan_in, fan_out), jnp.float32, -bound, bound)
    if bias:
        b = jax.random.uniform(kb, (1, fan_out), jnp.float32, -bound, bound)
        return w, b
    return w


def init_time_lstm(key, H):
    k1, k2, k3 = jax.random.split(key, 3)
    w_all, b_all = init_linear(k1, H, 4 * H)
    u_all, b_u = init_linear(k2, H, 4 * H)
    w_d, b_d = init_linear(k3, H, H)
    return (w_all, b_all, u_all, b_u, w_d, b_d)


def init_retain(key, vocab, H, C):
    keys = jax.random.split(key, 8)
    return {
        "emb": 0.1 * jax.random.normal(keys[0], (vocab, H), jnp.float32),
        "rnn1": init_time_lstm(keys[1], H),
        "rnn2": init_time_lstm(keys[2], H),
        "rnn1b": init_time_lstm(keys[3], H),
        "rnn2b": init_time_lstm(keys[4], H),
        "wa": init_linear(keys[5], 2 * H, 1, bias=False),        # (2H, 1)
        "wb": init_linear(keys[6], 2 * H, H, bias=False),        # (2H, H)
        "wout": init_linear(keys[7], H, C, bias=False),          # (H, C)
    }


# ---------------------------- pure-JAX reference ----------------------------

def ref_time_lstm(x, ts, p):
    w_all, b_all, u_all, b_u, w_d, b_d = p
    B, SEQ, H = x.shape
    h = jnp.zeros((B, H), jnp.float32)
    c = jnp.zeros((B, H), jnp.float32)
    outs = []
    for s in range(SEQ):
        c_s1 = jnp.tanh(c @ w_d + b_d)
        c_s2 = c_s1 * ts[:, s:s + 1]
        c_adj = (c - c_s1) + c_s2
        z = h @ w_all + b_all + x[:, s] @ u_all + b_u
        f = jax.nn.sigmoid(z[:, :H])
        i = jax.nn.sigmoid(z[:, H:2 * H])
        o = jax.nn.sigmoid(z[:, 2 * H:3 * H])
        ct = jax.nn.sigmoid(z[:, 3 * H:])
        c = f * c_adj + i * ct
        h = o * jnp.tanh(c)
        outs.append(h)
    return jnp.stack(outs, 1)


def ref_forward(inputs, ts, params):
    B, SEQ, V = inputs.shape
    H = params["emb"].shape[1]
    emb = (inputs.reshape(B * SEQ, V) @ params["emb"]).reshape(B, SEQ, H)
    o1 = ref_time_lstm(emb, ts, params["rnn1"])
    o2 = ref_time_lstm(emb, ts, params["rnn2"])
    o1b = jnp.flip(ref_time_lstm(jnp.flip(emb, 1), jnp.flip(ts, 1),
                                 params["rnn1b"]), 1)
    o2b = jnp.flip(ref_time_lstm(jnp.flip(emb, 1), jnp.flip(ts, 1),
                                 params["rnn2b"]), 1)
    c1 = jnp.concatenate([o1, o1b], -1)
    c2 = jnp.concatenate([o2, o2b], -1)
    E = jnp.sum(c1 * params["wa"].reshape(1, 1, -1), -1)
    alpha = jax.nn.softmax(E, axis=1)
    Beta = jnp.tanh(c2 @ params["wb"])
    ctx = jnp.sum(emb * Beta * alpha[:, :, None], 1)
    return ctx @ params["wout"]


# ---------------------------------- main -------------------------------------

if __name__ == "__main__":
    B, SEQ, H, C, VOCAB = 2, 8, 32, 4, 1400   # input_size == hidden_size (required)

    key = jax.random.PRNGKey(0)
    k_params, k_in, k_ts = jax.random.split(key, 3)
    params = init_retain(k_params, VOCAB, H, C)
    prep = prepare_params(params, H)

    # multi-hot visit vectors (as list_to_tensor would produce), positive timestamps
    inputs = jax.random.bernoulli(k_in, 0.02, (B, SEQ, VOCAB)).astype(jnp.float32)
    timestamps = jax.random.uniform(k_ts, (B, SEQ), jnp.float32, 1.0, 10.0)

    retain_fn = jax.jit(retain_forward)
    logits = retain_fn(inputs, timestamps, prep)
    jax.block_until_ready(logits)

    ref = ref_forward(inputs, timestamps, params)
    np.testing.assert_allclose(np.asarray(logits), np.asarray(ref),
                               rtol=1e-3, atol=1e-4)
    assert logits.shape == (B, C)
    print("KERNEL_OK")
</pallas_src>

<mosaic_0001>
module attributes {stable_mosaic.version = 11 : i64} {
  func.func @embed_uproj_kernel(%arg0: i32, %arg1: memref<64x1408xf32, #tpu.memory_space<vmem>>, %arg2: memref<1408x32xf32, #tpu.memory_space<vmem>>, %arg3: memref<32x512xf32, #tpu.memory_space<vmem>>, %arg4: memref<1x512xf32, #tpu.memory_space<vmem>>, %arg5: memref<64x544xf32, #tpu.memory_space<vmem>>) attributes {dimension_semantics = [#tpu.dimension_semantics<parallel>], iteration_bounds = array<i64: 1>, scalar_prefetch = 0 : i64, scratch_operands = 0 : i64, tpu.core_type = #tpu.core_type<tc>, window_params = [{transform_indices = @transform_0, window_bounds = array<i64: 64, 1408>}, {pipeline_mode = #tpu.pipeline_mode<synchronous>, transform_indices = @transform_1, window_bounds = array<i64: 1408, 32>}, {pipeline_mode = #tpu.pipeline_mode<synchronous>, transform_indices = @transform_2, window_bounds = array<i64: 32, 512>}, {pipeline_mode = #tpu.pipeline_mode<synchronous>, transform_indices = @transform_3, window_bounds = array<i64: 1, 512>}, {transform_indices = @transform_4, window_bounds = array<i64: 64, 544>}]} {
    %c0 = arith.constant 0 : index
    %c0_0 = arith.constant 0 : index
    %0 = vector.load %arg1[%c0, %c0_0] : memref<64x1408xf32, #tpu.memory_space<vmem>>, vector<64x1408xf32>
    %c0_1 = arith.constant 0 : index
    %c0_2 = arith.constant 0 : index
    %1 = vector.load %arg2[%c0_1, %c0_2] : memref<1408x32xf32, #tpu.memory_space<vmem>>, vector<1408x32xf32>
    %cst = arith.constant dense<0.000000e+00> : vector<64x32xf32>
    %2 = tpu.matmul %0, %1, %cst {dimension_numbers = #tpu.dot_dimension_numbers<[1], [0], [0], [1], [0, 0, 1, 1], [], []>} : vector<64x1408xf32>, vector<1408x32xf32>, vector<64x32xf32> -> vector<64x32xf32>
    %c0_3 = arith.constant 0 : index
    %c0_4 = arith.constant 0 : index
    %3 = vector.load %arg3[%c0_3, %c0_4] : memref<32x512xf32, #tpu.memory_space<vmem>>, vector<32x512xf32>
    %cst_5 = arith.constant dense<0.000000e+00> : vector<64x512xf32>
    %4 = tpu.matmul %2, %3, %cst_5 {dimension_numbers = #tpu.dot_dimension_numbers<[1], [0], [0], [1], [0, 0, 1, 1], [], []>} : vector<64x32xf32>, vector<32x512xf32>, vector<64x512xf32> -> vector<64x512xf32>
    %c0_6 = arith.constant 0 : index
    %c0_7 = arith.constant 0 : index
    %5 = vector.load %arg4[%c0_6, %c0_7] : memref<1x512xf32, #tpu.memory_space<vmem>>, vector<1x512xf32>
    %6 = vector.broadcast %5 : vector<1x512xf32> to vector<64x512xf32>
    %7 = arith.addf %4, %6 : vector<64x512xf32>
    %8 = tpu.concatenate %7, %2 in 1 : vector<64x512xf32>, vector<64x32xf32> -> vector<64x544xf32>
    %c0_8 = arith.constant 0 : index
    %c0_9 = arith.constant 0 : index
    %9 = vector.load %arg5[%c0_8, %c0_9] : memref<64x544xf32, #tpu.memory_space<vmem>>, vector<64x544xf32>
    tpu.vector_store %arg5[%c0_8, %c0_9], %8 {strides = array<i32>} : memref<64x544xf32, #tpu.memory_space<vmem>>, vector<64x544xf32>,
    return
  }
  func.func @transform_0(%arg0: i32) -> (i32, i32) {
    %c0_i32 = arith.constant 0 : i32
    %c0_i32_0 = arith.constant 0 : i32
    return %arg0, %c0_i32 : i32, i32
  }
  func.func @transform_1(%arg0: i32) -> (i32, i32) {
    %c0_i32 = arith.constant 0 : i32
    %c0_i32_0 = arith.constant 0 : i32
    %c0_i32_1 = arith.constant 0 : i32
    return %c0_i32, %c0_i32_0 : i32, i32
  }
  func.func @transform_2(%arg0: i32) -> (i32, i32) {
    %c0_i32 = arith.constant 0 : i32
    %c0_i32_0 = arith.constant 0 : i32
    %c0_i32_1 = arith.constant 0 : i32
    return %c0_i32, %c0_i32_0 : i32, i32
  }
  func.func @transform_3(%arg0: i32) -> (i32, i32) {
    %c0_i32 = arith.constant 0 : i32
    %c0_i32_0 = arith.constant 0 : i32
    %c0_i32_1 = arith.constant 0 : i32
    return %c0_i32, %c0_i32_0 : i32, i32
  }
  func.func @transform_4(%arg0: i32) -> (i32, i32) {
    %c0_i32 = arith.constant 0 : i32
    %c0_i32_0 = arith.constant 0 : i32
    return %arg0, %c0_i32 : i32, i32
  }
}

module attributes {stable_mosaic.version = 11 : i64} {
  func.func @fused_recurrence_head_kernel(%arg0: i32, %arg1: memref<8x8x512xf32, #tpu.memory_space<vmem>>, %arg2: memref<8x8x1xf32, #tpu.memory_space<vmem>>, %arg3: memref<8x8x32xf32, #tpu.memory_space<vmem>>, %arg4: memref<128x512xf32, #tpu.memory_space<vmem>>, %arg5: memref<128x128xf32, #tpu.memory_space<vmem>>, %arg6: memref<1x128xf32, #tpu.memory_space<vmem>>, %arg7: memref<64x33xf32, #tpu.memory_space<vmem>>, %arg8: memref<64x33xf32, #tpu.memory_space<vmem>>, %arg9: memref<32x4xf32, #tpu.memory_space<vmem>>, %arg10: memref<8x4xf32, #tpu.memory_space<vmem>>, %arg11: memref<8x8x128xf32, #tpu.memory_space<vmem>>) attributes {dimension_semantics = [#tpu.dimension_semantics<arbitrary>], iteration_bounds = array<i64: 1>, scalar_prefetch = 0 : i64, scratch_operands = 1 : i64, tpu.core_type = #tpu.core_type<tc>, window_params = [{pipeline_mode = #tpu.pipeline_mode<synchronous>, transform_indices = @transform_0, window_bounds = array<i64: 8, 8, 512>}, {pipeline_mode = #tpu.pipeline_mode<synchronous>, transform_indices = @transform_1, window_bounds = array<i64: 8, 8, 1>}, {pipeline_mode = #tpu.pipeline_mode<synchronous>, transform_indices = @transform_2, window_bounds = array<i64: 8, 8, 32>}, {pipeline_mode = #tpu.pipeline_mode<synchronous>, transform_indices = @transform_3, window_bounds = array<i64: 128, 512>}, {pipeline_mode = #tpu.pipeline_mode<synchronous>, transform_indices = @transform_4, window_bounds = array<i64: 128, 128>}, {pipeline_mode = #tpu.pipeline_mode<synchronous>, transform_indices = @transform_5, window_bounds = array<i64: 1, 128>}, {pipeline_mode = #tpu.pipeline_mode<synchronous>, transform_indices = @transform_6, window_bounds = array<i64: 64, 33>}, {pipeline_mode = #tpu.pipeline_mode<synchronous>, transform_indices = @transform_7, window_bounds = array<i64: 64, 33>}, {pipeline_mode = #tpu.pipeline_mode<synchronous>, transform_indices = @transform_8, window_bounds = array<i64: 32, 4>}, {pipeline_mode = #tpu.pipeline_mode<synchronous>, transform_indices = @transform_9, window_bounds = array<i64: 8, 4>}]} {
    %c0 = arith.constant 0 : index
    %c0_0 = arith.constant 0 : index
    %0 = vector.load %arg6[%c0, %c0_0] : memref<1x128xf32, #tpu.memory_space<vmem>>, vector<1x128xf32>
    %1 = vector.shape_cast %0 : vector<1x128xf32> to vector<1x128xf32>
    %2 = vector.broadcast %1 : vector<1x128xf32> to vector<8x128xf32>
    %cst = arith.constant 0.000000e+00 : f32
    %3 = vector.broadcast %cst : f32 to vector<8x128xf32>
    %c0_i32 = arith.constant 0 : i32
    %c0_1 = arith.constant 0 : index
    %c0_2 = arith.constant 0 : index
    %4 = vector.load %arg5[%c0_1, %c0_2] : memref<128x128xf32, #tpu.memory_space<vmem>>, vector<128x128xf32>
    %cst_3 = arith.constant dense<0.000000e+00> : vector<8x128xf32>
    %5 = tpu.matmul %3, %4, %cst_3 {dimension_numbers = #tpu.dot_dimension_numbers<[1], [0], [0], [1], [0, 0, 1, 1], [], []>} : vector<8x128xf32>, vector<128x128xf32>, vector<8x128xf32> -> vector<8x128xf32>
    %6 = arith.addf %5, %2 : vector<8x128xf32>
    %7 = math.tanh %6 : vector<8x128xf32>
    %8 = arith.index_cast %c0_i32 : i32 to index
    %c0_4 = arith.constant 0 : index
    %c0_5 = arith.constant 0 : index
    %9 = vector.load %arg2[%8, %c0_4, %c0_5] : memref<8x8x1xf32, #tpu.memory_space<vmem>>, vector<1x8x1xf32>
    %10 = vector.shape_cast %9 : vector<1x8x1xf32> to vector<8x1xf32>
    %11 = vector.shape_cast %10 : vector<8x1xf32> to vector<8x1xf32>
    %12 = vector.broadcast %11 : vector<8x1xf32> to vector<8x64xf32>
    %c7_i32 = arith.constant 7 : i32
    %13 = arith.subi %c7_i32, %c0_i32 : i32
    %14 = arith.index_cast %13 : i32 to index
    %c0_6 = arith.constant 0 : index
    %c0_7 = arith.constant 0 : index
    %15 = vector.load %arg2[%14, %c0_6, %c0_7] : memref<8x8x1xf32, #tpu.memory_space<vmem>>, vector<1x8x1xf32>
    %16 = vector.shape_cast %15 : vector<1x8x1xf32> to vector<8x1xf32>
    %17 = vector.shape_cast %16 : vector<8x1xf32> to vector<8x1xf32>
    %18 = vector.broadcast %17 : vector<8x1xf32> to vector<8x64xf32>
    %19 = tpu.concatenate %12, %18 in 1 : vector<8x64xf32>, vector<8x64xf32> -> vector<8x128xf32>
    %20 = arith.subf %3, %7 : vector<8x128xf32>
    %21 = arith.mulf %7, %19 : vector<8x128xf32>
    %22 = arith.addf %20, %21 : vector<8x128xf32>
    %c0_8 = arith.constant 0 : index
    %c0_9 = arith.constant 0 : index
    %23 = vector.load %arg4[%c0_8, %c0_9] : memref<128x512xf32, #tpu.memory_space<vmem>>, vector<128x512xf32>
    %cst_10 = arith.constant dense<0.000000e+00> : vector<8x512xf32>
    %24 = tpu.matmul %3, %23, %cst_10 {dimension_numbers = #tpu.dot_dimension_numbers<[1], [0], [0], [1], [0, 0, 1, 1], [], []>} : vector<8x128xf32>, vector<128x512xf32>, vector<8x512xf32> -> vector<8x512xf32>
    %25 = arith.index_cast %c0_i32 : i32 to index
    %c0_11 = arith.constant 0 : index
    %c0_12 = arith.constant 0 : index
    %26 = vector.load %arg1[%25, %c0_11, %c0_12] : memref<8x8x512xf32, #tpu.memory_space<vmem>>, vector<1x8x512xf32>
    %27 = vector.shape_cast %26 : vector<1x8x512xf32> to vector<8x512xf32>
    %28 = arith.addf %24, %27 : vector<8x512xf32>
    %29 = arith.negf %28 : vector<8x512xf32>
    %30 = math.exp %29 : vector<8x512xf32>
    %cst_13 = arith.constant 1.000000e+00 : f32
    %31 = vector.broadcast %cst_13 : f32 to vector<8x512xf32>
    %32 = arith.addf %31, %30 : vector<8x512xf32>
    %33 = arith.divf %31, %32 : vector<8x512xf32>
    %34 = vector.extract_strided_slice %33 {offsets = [0, 0], sizes = [8, 128], strides = [1, 1]} : vector<8x512xf32> to vector<8x128xf32>
    %35 = vector.extract_strided_slice %33 {offsets = [0, 128], sizes = [8, 128], strides = [1, 1]} : vector<8x512xf32> to vector<8x128xf32>
    %36 = vector.extract_strided_slice %33 {offsets = [0, 256], sizes = [8, 128], strides = [1, 1]} : vector<8x512xf32> to vector<8x128xf32>
    %37 = vector.extract_strided_slice %33 {offsets = [0, 384], sizes = [8, 128], strides = [1, 1]} : vector<8x512xf32> to vector<8x128xf32>
    %38 = arith.mulf %34, %22 : vector<8x128xf32>
    %39 = arith.mulf %35, %37 : vector<8x128xf32>
    %40 = arith.addf %38, %39 : vector<8x128xf32>
    %41 = math.tanh %40 : vector<8x128xf32>
    %42 = arith.mulf %36, %41 : vector<8x128xf32>
    %43 = arith.index_cast %c0_i32 : i32 to index
    %c0_14 = arith.constant 0 : index
    %c0_15 = arith.constant 0 : index
    %44 = vector.load %arg11[%43, %c0_14, %c0_15] : memref<8x8x128xf32, #tpu.memory_space<vmem>>, vector<1x8x128xf32>
    %45 = vector.shape_cast %44 : vector<1x8x128xf32> to vector<8x128xf32>
    %46 = vector.shape_cast %42 : vector<8x128xf32> to vector<1x8x128xf32>
    tpu.vector_store %arg11[%43, %c0_14, %c0_15], %46 {strides = array<i32>} : memref<8x8x128xf32, #tpu.memory_space<vmem>>, vector<1x8x128xf32>,
    %c1_i32 = arith.constant 1 : i32
    %c0_16 = arith.constant 0 : index
    %c0_17 = arith.constant 0 : index
    %47 = vector.load %arg5[%c0_16, %c0_17] : memref<128x128xf32, #tpu.memory_space<vmem>>, vector<128x128xf32>
    %cst_18 = arith.constant dense<0.000000e+00> : vector<8x128xf32>
    %48 = tpu.matmul %40, %47, %cst_18 {dimension_numbers = #tpu.dot_dimension_numbers<[1], [0], [0], [1], [0, 0, 1, 1], [], []>} : vector<8x128xf32>, vector<128x128xf32>, vector<8x128xf32> -> vector<8x128xf32>
    %49 = arith.addf %48, %2 : vector<8x128xf32>
    %50 = math.tanh %49 : vector<8x128xf32>
    %51 = arith.index_cast %c1_i32 : i32 to index
    %c0_19 = arith.constant 0 : index
    %c0_20 = arith.constant 0 : index
    %52 = vector.load %arg2[%51, %c0_19, %c0_20] : memref<8x8x1xf32, #tpu.memory_space<vmem>>, vector<1x8x1xf32>
    %53 = vector.shape_cast %52 : vector<1x8x1xf32> to vector<8x1xf32>
    %54 = vector.shape_cast %53 : vector<8x1xf32> to vector<8x1xf32>
    %55 = vector.broadcast %54 : vector<8x1xf32> to vector<8x64xf32>
    %c7_i32_21 = arith.constant 7 : i32
    %56 = arith.subi %c7_i32_21, %c1_i32 : i32
    %57 = arith.index_cast %56 : i32 to index
    %c0_22 = arith.constant 0 : index
    %c0_23 = arith.constant 0 : index
    %58 = vector.load %arg2[%57, %c0_22, %c0_23] : memref<8x8x1xf32, #tpu.memory_space<vmem>>, vector<1x8x1xf32>
    %59 = vector.shape_cast %58 : vector<1x8x1xf32> to vector<8x1xf32>
    %60 = vector.shape_cast %59 : vector<8x1xf32> to vector<8x1xf32>
    %61 = vector.broadcast %60 : vector<8x1xf32> to vector<8x64xf32>
    %62 = tpu.concatenate %55, %61 in 1 : vector<8x64xf32>, vector<8x64xf32> -> vector<8x128xf32>
    %63 = arith.subf %40, %50 : vector<8x128xf32>
    %64 = arith.mulf %50, %62 : vector<8x128xf32>
    %65 = arith.addf %63, %64 : vector<8x128xf32>
    %c0_24 = arith.constant 0 : index
    %c0_25 = arith.constant 0 : index
    %66 = vector.load %arg4[%c0_24, %c0_25] : memref<128x512xf32, #tpu.memory_space<vmem>>, vector<128x512xf32>
    %cst_26 = arith.constant dense<0.000000e+00> : vector<8x512xf32>
    %67 = tpu.matmul %42, %66, %cst_26 {dimension_numbers = #tpu.dot_dimension_numbers<[1], [0], [0], [1], [0, 0, 1, 1], [], []>} : vector<8x128xf32>, vector<128x512xf32>, vector<8x512xf32> -> vector<8x512xf32>
    %68 = arith.index_cast %c1_i32 : i32 to index
    %c0_27 = arith.constant 0 : index
    %c0_28 = arith.constant 0 : index
    %69 = vector.load %arg1[%68, %c0_27, %c0_28] : memref<8x8x512xf32, #tpu.memory_space<vmem>>, vector<1x8x512xf32>
    %70 = vector.shape_cast %69 : vector<1x8x512xf32> to vector<8x512xf32>
    %71 = arith.addf %67, %70 : vector<8x512xf32>
    %72 = arith.negf %71 : vector<8x512xf32>
    %73 = math.exp %72 : vector<8x512xf32>
    %cst_29 = arith.constant 1.000000e+00 : f32
    %74 = vector.broadcast %cst_29 : f32 to vector<8x512xf32>
    %75 = arith.addf %74, %73 : vector<8x512xf32>
    %76 = arith.divf %74, %75 : vector<8x512xf32>
    %77 = vector.extract_strided_slice %76 {offsets = [0, 0], sizes = [8, 128], strides = [1, 1]} : vector<8x512xf32> to vector<8x128xf32>
    %78 = vector.extract_strided_slice %76 {offsets = [0, 128], sizes = [8, 128], strides = [1, 1]} : vector<8x512xf32> to vector<8x128xf32>
    %79 = vector.extract_strided_slice %76 {offsets = [0, 256], sizes = [8, 128], strides = [1, 1]} : vector<8x512xf32> to vector<8x128xf32>
    %80 = vector.extract_strided_slice %76 {offsets = [0, 384], sizes = [8, 128], strides = [1, 1]} : vector<8x512xf32> to vector<8x128xf32>
    %81 = arith.mulf %77, %65 : vector<8x128xf32>
    %82 = arith.mulf %78, %80 : vector<8x128xf32>
    %83 = arith.addf %81, %82 : vector<8x128xf32>
    %84 = math.tanh %83 : vector<8x128xf32>
    %85 = arith.mulf %79, %84 : vector<8x128xf32>
    %86 = arith.index_cast %c1_i32 : i32 to index
    %c0_30 = arith.constant 0 : index
    %c0_31 = arith.constant 0 : index
    %87 = vector.load %arg11[%86, %c0_30, %c0_31] : memref<8x8x128xf32, #tpu.memory_space<vmem>>, vector<1x8x128xf32>
    %88 = vector.shape_cast %87 : vector<1x8x128xf32> to vector<8x128xf32>
    %89 = vector.shape_cast %85 : vector<8x128xf32> to vector<1x8x128xf32>
    tpu.vector_store %arg11[%86, %c0_30, %c0_31], %89 {strides = array<i32>} : memref<8x8x128xf32, #tpu.memory_space<vmem>>, vector<1x8x128xf32>,
    %c2_i32 = arith.constant 2 : i32
    %c0_32 = arith.constant 0 : index
    %c0_33 = arith.constant 0 : index
    %90 = vector.load %arg5[%c0_32, %c0_33] : memref<128x128xf32, #tpu.memory_space<vmem>>, vector<128x128xf32>
    %cst_34 = arith.constant dense<0.000000e+00> : vector<8x128xf32>
    %91 = tpu.matmul %83, %90, %cst_34 {dimension_numbers = #tpu.dot_dimension_numbers<[1], [0], [0], [1], [0, 0, 1, 1], [], []>} : vector<8x128xf32>, vector<128x128xf32>, vector<8x128xf32> -> vector<8x128xf32>
    %92 = arith.addf %91, %2 : vector<8x128xf32>
    %93 = math.tanh %92 : vector<8x128xf32>
    %94 = arith.index_cast %c2_i32 : i32 to index
    %c0_35 = arith.constant 0 : index
    %c0_36 = arith.constant 0 : index
    %95 = vector.load %arg2[%94, %c0_35, %c0_36] : memref<8x8x1xf32, #tpu.memory_space<vmem>>, vector<1x8x1xf32>
    %96 = vector.shape_cast %95 : vector<1x8x1xf32> to vector<8x1xf32>
    %97 = vector.shape_cast %96 : vector<8x1xf32> to vector<8x1xf32>
    %98 = vector.broadcast %97 : vector<8x1xf32> to vector<8x64xf32>
    %c7_i32_37 = arith.constant 7 : i32
    %99 = arith.subi %c7_i32_37, %c2_i32 : i32
    %100 = arith.index_cast %99 : i32 to index
    %c0_38 = arith.constant 0 : index
    %c0_39 = arith.constant 0 : index
    %101 = vector.load %arg2[%100, %c0_38, %c0_39] : memref<8x8x1xf32, #tpu.memory_space<vmem>>, vector<1x8x1xf32>
    %102 = vector.shape_cast %101 : vector<1x8x1xf32> to vector<8x1xf32>
    %103 = vector.shape_cast %102 : vector<8x1xf32> to vector<8x1xf32>
    %104 = vector.broadcast %103 : vector<8x1xf32> to vector<8x64xf32>
    %105 = tpu.concatenate %98, %104 in 1 : vector<8x64xf32>, vector<8x64xf32> -> vector<8x128xf32>
    %106 = arith.subf %83, %93 : vector<8x128xf32>
    %107 = arith.mulf %93, %105 : vector<8x128xf32>
    %108 = arith.addf %106, %107 : vector<8x128xf32>
    %c0_40 = arith.constant 0 : index
    %c0_41 = arith.constant 0 : index
    %109 = vector.load %arg4[%c0_40, %c0_41] : memref<128x512xf32, #tpu.memory_space<vmem>>, vector<128x512xf32>
    %cst_42 = arith.constant dense<0.000000e+00> : vector<8x512xf32>
    %110 = tpu.matmul %85, %109, %cst_42 {dimension_numbers = #tpu.dot_dimension_numbers<[1], [0], [0], [1], [0, 0, 1, 1], [], []>} : vector<8x128xf32>, vector<128x512xf32>, vector<8x512xf32> -> vector<8x512xf32>
    %111 = arith.index_cast %c2_i32 : i32 to index
    %c0_43 = arith.constant 0 : index
    %c0_44 = arith.constant 0 : index
    %112 = vector.load %arg1[%111, %c0_43, %c0_44] : memref<8x8x512xf32, #tpu.memory_space<vmem>>, vector<1x8x512xf32>
    %113 = vector.shape_cast %112 : vector<1x8x512xf32> to vector<8x512xf32>
    %114 = arith.addf %110, %113 : vector<8x512xf32>
    %115 = arith.negf %114 : vector<8x512xf32>
    %116 = math.exp %115 : vector<8x512xf32>
    %cst_45 = arith.constant 1.000000e+00 : f32
    %117 = vector.broadcast %cst_45 : f32 to vector<8x512xf32>
    %118 = arith.addf %117, %116 : vector<8x512xf32>
    %119 = arith.divf %117, %118 : vector<8x512xf32>
    %120 = vector.extract_strided_slice %119 {offsets = [0, 0], sizes = [8, 128], strides = [1, 1]} : vector<8x512xf32> to vector<8x128xf32>
    %121 = vector.extract_strided_slice %119 {offsets = [0, 128], sizes = [8, 128], strides = [1, 1]} : vector<8x512xf32> to vector<8x128xf32>
    %122 = vector.extract_strided_slice %119 {offsets = [0, 256], sizes = [8, 128], strides = [1, 1]} : vector<8x512xf32> to vector<8x128xf32>
    %123 = vector.extract_strided_slice %119 {offsets = [0, 384], sizes = [8, 128], strides = [1, 1]} : vector<8x512xf32> to vector<8x128xf32>
    %124 = arith.mulf %120, %108 : vector<8x128xf32>
    %125 = arith.mulf %121, %123 : vector<8x128xf32>
    %126 = arith.addf %124, %125 : vector<8x128xf32>
    %127 = math.tanh %126 : vector<8x128xf32>
    %128 = arith.mulf %122, %127 : vector<8x128xf32>
    %129 = arith.index_cast %c2_i32 : i32 to index
    %c0_46 = arith.constant 0 : index
    %c0_47 = arith.constant 0 : index
    %130 = vector.load %arg11[%129, %c0_46, %c0_47] : memref<8x8x128xf32, #tpu.memory_space<vmem>>, vector<1x8x128xf32>
    %131 = vector.shape_cast %130 : vector<1x8x128xf32> to vector<8x128xf32>
    %132 = vector.shape_cast %128 : vector<8x128xf32> to vector<1x8x128xf32>
    tpu.vector_store %arg11[%129, %c0_46, %c0_47], %132 {strides = array<i32>} : memref<8x8x128xf32, #tpu.memory_space<vmem>>, vector<1x8x128xf32>,
    %c3_i32 = arith.constant 3 : i32
    %c0_48 = arith.constant 0 : index
    %c0_49 = arith.constant 0 : index
    %133 = vector.load %arg5[%c0_48, %c0_49] : memref<128x128xf32, #tpu.memory_space<vmem>>, vector<128x128xf32>
    %cst_50 = arith.constant dense<0.000000e+00> : vector<8x128xf32>
    %134 = tpu.matmul %126, %133, %cst_50 {dimension_numbers = #tpu.dot_dimension_numbers<[1], [0], [0], [1], [0, 0, 1, 1], [], []>} : vector<8x128xf32>, vector<128x128xf32>, vector<8x128xf32> -> vector<8x128xf32>
    %135 = arith.addf %134, %2 : vector<8x128xf32>
    %136 = math.tanh %135 : vector<8x128xf32>
    %137 = arith.index_cast %c3_i32 : i32 to index
    %c0_51 = arith.constant 0 : index
    %c0_52 = arith.constant 0 : index
    %138 = vector.load %arg2[%137, %c0_51, %c0_52] : memref<8x8x1xf32, #tpu.memory_space<vmem>>, vector<1x8x1xf32>
    %139 = vector.shape_cast %138 : vector<1x8x1xf32> to vector<8x1xf32>
    %140 = vector.shape_cast %139 : vector<8x1xf32> to vector<8x1xf32>
    %141 = vector.broadcast %140 : vector<8x1xf32> to vector<8x64xf32>
    %c7_i32_53 = arith.constant 7 : i32
    %142 = arith.subi %c7_i32_53, %c3_i32 : i32
    %143 = arith.index_cast %142 : i32 to index
    %c0_54 = arith.constant 0 : index
    %c0_55 = arith.constant 0 : index
    %144 = vector.load %arg2[%143, %c0_54, %c0_55] : memref<8x8x1xf32, #tpu.memory_space<vmem>>, vector<1x8x1xf32>
    %145 = vector.shape_cast %144 : vector<1x8x1xf32> to vector<8x1xf32>
    %146 = vector.shape_cast %145 : vector<8x1xf32> to vector<8x1xf32>
    %147 = vector.broadcast %146 : vector<8x1xf32> to vector<8x64xf32>
    %148 = tpu.concatenate %141, %147 in 1 : vector<8x64xf32>, vector<8x64xf32> -> vector<8x128xf32>
    %149 = arith.subf %126, %136 : vector<8x128xf32>
    %150 = arith.mulf %136, %148 : vector<8x128xf32>
    %151 = arith.addf %149, %150 : vector<8x128xf32>
    %c0_56 = arith.constant 0 : index
    %c0_57 = arith.constant 0 : index
    %152 = vector.load %arg4[%c0_56, %c0_57] : memref<128x512xf32, #tpu.memory_space<vmem>>, vector<128x512xf32>
    %cst_58 = arith.constant dense<0.000000e+00> : vector<8x512xf32>
    %153 = tpu.matmul %128, %152, %cst_58 {dimension_numbers = #tpu.dot_dimension_numbers<[1], [0], [0], [1], [0, 0, 1, 1], [], []>} : vector<8x128xf32>, vector<128x512xf32>, vector<8x512xf32> -> vector<8x512xf32>
    %154 = arith.index_cast %c3_i32 : i32 to index
    %c0_59 = arith.constant 0 : index
    %c0_60 = arith.constant 0 : index
    %155 = vector.load %arg1[%154, %c0_59, %c0_60] : memref<8x8x512xf32, #tpu.memory_space<vmem>>, vector<1x8x512xf32>
    %156 = vector.shape_cast %155 : vector<1x8x512xf32> to vector<8x512xf32>
    %157 = arith.addf %153, %156 : vector<8x512xf32>
    %158 = arith.negf %157 : vector<8x512xf32>
    %159 = math.exp %158 : vector<8x512xf32>
    %cst_61 = arith.constant 1.000000e+00 : f32
    %160 = vector.broadcast %cst_61 : f32 to vector<8x512xf32>
    %161 = arith.addf %160, %159 : vector<8x512xf32>
    %162 = arith.divf %160, %161 : vector<8x512xf32>
    %163 = vector.extract_strided_slice %162 {offsets = [0, 0], sizes = [8, 128], strides = [1, 1]} : vector<8x512xf32> to vector<8x128xf32>
    %164 = vector.extract_strided_slice %162 {offsets = [0, 128], sizes = [8, 128], strides = [1, 1]} : vector<8x512xf32> to vector<8x128xf32>
    %165 = vector.extract_strided_slice %162 {offsets = [0, 256], sizes = [8, 128], strides = [1, 1]} : vector<8x512xf32> to vector<8x128xf32>
    %166 = vector.extract_strided_slice %162 {offsets = [0, 384], sizes = [8, 128], strides = [1, 1]} : vector<8x512xf32> to vector<8x128xf32>
    %167 = arith.mulf %163, %151 : vector<8x128xf32>
    %168 = arith.mulf %164, %166 : vector<8x128xf32>
    %169 = arith.addf %167, %168 : vector<8x128xf32>
    %170 = math.tanh %169 : vector<8x128xf32>
    %171 = arith.mulf %165, %170 : vector<8x128xf32>
    %172 = arith.index_cast %c3_i32 : i32 to index
    %c0_62 = arith.constant 0 : index
    %c0_63 = arith.constant 0 : index
    %173 = vector.load %arg11[%172, %c0_62, %c0_63] : memref<8x8x128xf32, #tpu.memory_space<vmem>>, vector<1x8x128xf32>
    %174 = vector.shape_cast %173 : vector<1x8x128xf32> to vector<8x128xf32>
    %175 = vector.shape_cast %171 : vector<8x128xf32> to vector<1x8x128xf32>
    tpu.vector_store %arg11[%172, %c0_62, %c0_63], %175 {strides = array<i32>} : memref<8x8x128xf32, #tpu.memory_space<vmem>>, vector<1x8x128xf32>,
    %c4_i32 = arith.constant 4 : i32
    %c0_64 = arith.constant 0 : index
    %c0_65 = arith.constant 0 : index
    %176 = vector.load %arg5[%c0_64, %c0_65] : memref<128x128xf32, #tpu.memory_space<vmem>>, vector<128x128xf32>
    %cst_66 = arith.constant dense<0.000000e+00> : vector<8x128xf32>
    %177 = tpu.matmul %169, %176, %cst_66 {dimension_numbers = #tpu.dot_dimension_numbers<[1], [0], [0], [1], [0, 0, 1, 1], [], []>} : vector<8x128xf32>, vector<128x128xf32>, vector<8x128xf32> -> vector<8x128xf32>
    %178 = arith.addf %177, %2 : vector<8x128xf32>
    %179 = math.tanh %178 : vector<8x128xf32>
    %180 = arith.index_cast %c4_i32 : i32 to index
    %c0_67 = arith.constant 0 : index
    %c0_68 = arith.constant 0 : index
    %181 = vector.load %arg2[%180, %c0_67, %c0_68] : memref<8x8x1xf32, #tpu.memory_space<vmem>>, vector<1x8x1xf32>
    %182 = vector.shape_cast %181 : vector<1x8x1xf32> to vector<8x1xf32>
    %183 = vector.shape_cast %182 : vector<8x1xf32> to vector<8x1xf32>
    %184 = vector.broadcast %183 : vector<8x1xf32> to vector<8x64xf32>
    %c7_i32_69 = arith.constant 7 : i32
    %185 = arith.subi %c7_i32_69, %c4_i32 : i32
    %186 = arith.index_cast %185 : i32 to index
    %c0_70 = arith.constant 0 : index
    %c0_71 = arith.constant 0 : index
    %187 = vector.load %arg2[%186, %c0_70, %c0_71] : memref<8x8x1xf32, #tpu.memory_space<vmem>>, vector<1x8x1xf32>
    %188 = vector.shape_cast %187 : vector<1x8x1xf32> to vector<8x1xf32>
    %189 = vector.shape_cast %188 : vector<8x1xf32> to vector<8x1xf32>
    %190 = vector.broadcast %189 : vector<8x1xf32> to vector<8x64xf32>
    %191 = tpu.concatenate %184, %190 in 1 : vector<8x64xf32>, vector<8x64xf32> -> vector<8x128xf32>
    %192 = arith.subf %169, %179 : vector<8x128xf32>
    %193 = arith.mulf %179, %191 : vector<8x128xf32>
    %194 = arith.addf %192, %193 : vector<8x128xf32>
    %c0_72 = arith.constant 0 : index
    %c0_73 = arith.constant 0 : index
    %195 = vector.load %arg4[%c0_72, %c0_73] : memref<128x512xf32, #tpu.memory_space<vmem>>, vector<128x512xf32>
    %cst_74 = arith.constant dense<0.000000e+00> : vector<8x512xf32>
    %196 = tpu.matmul %171, %195, %cst_74 {dimension_numbers = #tpu.dot_dimension_numbers<[1], [0], [0], [1], [0, 0, 1, 1], [], []>} : vector<8x128xf32>, vector<128x512xf32>, vector<8x512xf32> -> vector<8x512xf32>
    %197 = arith.index_cast %c4_i32 : i32 to index
    %c0_75 = arith.constant 0 : index
    %c0_76 = arith.constant 0 : index
    %198 = vector.load %arg1[%197, %c0_75, %c0_76] : memref<8x8x512xf32, #tpu.memory_space<vmem>>, vector<1x8x512xf32>
    %199 = vector.shape_cast %198 : vector<1x8x512xf32> to vector<8x512xf32>
    %200 = arith.addf %196, %199 : vector<8x512xf32>
    %201 = arith.negf %200 : vector<8x512xf32>
    %202 = math.exp %201 : vector<8x512xf32>
    %cst_77 = arith.constant 1.000000e+00 : f32
    %203 = vector.broadcast %cst_77 : f32 to vector<8x512xf32>
    %204 = arith.addf %203, %202 : vector<8x512xf32>
    %205 = arith.divf %203, %204 : vector<8x512xf32>
    %206 = vector.extract_strided_slice %205 {offsets = [0, 0], sizes = [8, 128], strides = [1, 1]} : vector<8x512xf32> to vector<8x128xf32>
    %207 = vector.extract_strided_slice %205 {offsets = [0, 128], sizes = [8, 128], strides = [1, 1]} : vector<8x512xf32> to vector<8x128xf32>
    %208 = vector.extract_strided_slice %205 {offsets = [0, 256], sizes = [8, 128], strides = [1, 1]} : vector<8x512xf32> to vector<8x128xf32>
    %209 = vector.extract_strided_slice %205 {offsets = [0, 384], sizes = [8, 128], strides = [1, 1]} : vector<8x512xf32> to vector<8x128xf32>
    %210 = arith.mulf %206, %194 : vector<8x128xf32>
    %211 = arith.mulf %207, %209 : vector<8x128xf32>
    %212 = arith.addf %210, %211 : vector<8x128xf32>
    %213 = math.tanh %212 : vector<8x128xf32>
    %214 = arith.mulf %208, %213 : vector<8x128xf32>
    %215 = arith.index_cast %c4_i32 : i32 to index
    %c0_78 = arith.constant 0 : index
    %c0_79 = arith.constant 0 : index
    %216 = vector.load %arg11[%215, %c0_78, %c0_79] : memref<8x8x128xf32, #tpu.memory_space<vmem>>, vector<1x8x128xf32>
    %217 = vector.shape_cast %216 : vector<1x8x128xf32> to vector<8x128xf32>
    %218 = vector.shape_cast %214 : vector<8x128xf32> to vector<1x8x128xf32>
    tpu.vector_store %arg11[%215, %c0_78, %c0_79], %218 {strides = array<i32>} : memref<8x8x128xf32, #tpu.memory_space<vmem>>, vector<1x8x128xf32>,
    %c5_i32 = arith.constant 5 : i32
    %c0_80 = arith.constant 0 : index
    %c0_81 = arith.constant 0 : index
    %219 = vector.load %arg5[%c0_80, %c0_81] : memref<128x128xf32, #tpu.memory_space<vmem>>, vector<128x128xf32>
    %cst_82 = arith.constant dense<0.000000e+00> : vector<8x128xf32>
    %220 = tpu.matmul %212, %219, %cst_82 {dimension_numbers = #tpu.dot_dimension_numbers<[1], [0], [0], [1], [0, 0, 1, 1], [], []>} : vector<8x128xf32>, vector<128x128xf32>, vector<8x128xf32> -> vector<8x128xf32>
    %221 = arith.addf %220, %2 : vector<8x128xf32>
    %222 = math.tanh %221 : vector<8x128xf32>
    %223 = arith.index_cast %c5_i32 : i32 to index
    %c0_83 = arith.constant 0 : index
    %c0_84 = arith.constant 0 : index
    %224 = vector.load %arg2[%223, %c0_83, %c0_84] : memref<8x8x1xf32, #tpu.memory_space<vmem>>, vector<1x8x1xf32>
    %225 = vector.shape_cast %224 : vector<1x8x1xf32> to vector<8x1xf32>
    %226 = vector.shape_cast %225 : vector<8x1xf32> to vector<8x1xf32>
    %227 = vector.broadcast %226 : vector<8x1xf32> to vector<8x64xf32>
    %c7_i32_85 = arith.constant 7 : i32
    %228 = arith.subi %c7_i32_85, %c5_i32 : i32
    %229 = arith.index_cast %228 : i32 to index
    %c0_86 = arith.constant 0 : index
    %c0_87 = arith.constant 0 : index
    %230 = vector.load %arg2[%229, %c0_86, %c0_87] : memref<8x8x1xf32, #tpu.memory_space<vmem>>, vector<1x8x1xf32>
    %231 = vector.shape_cast %230 : vector<1x8x1xf32> to vector<8x1xf32>
    %232 = vector.shape_cast %231 : vector<8x1xf32> to vector<8x1xf32>
    %233 = vector.broadcast %232 : vector<8x1xf32> to vector<8x64xf32>
    %234 = tpu.concatenate %227, %233 in 1 : vector<8x64xf32>, vector<8x64xf32> -> vector<8x128xf32>
    %235 = arith.subf %212, %222 : vector<8x128xf32>
    %236 = arith.mulf %222, %234 : vector<8x128xf32>
    %237 = arith.addf %235, %236 : vector<8x128xf32>
    %c0_88 = arith.constant 0 : index
    %c0_89 = arith.constant 0 : index
    %238 = vector.load %arg4[%c0_88, %c0_89] : memref<128x512xf32, #tpu.memory_space<vmem>>, vector<128x512xf32>
    %cst_90 = arith.constant dense<0.000000e+00> : vector<8x512xf32>
    %239 = tpu.matmul %214, %238, %cst_90 {dimension_numbers = #tpu.dot_dimension_numbers<[1], [0], [0], [1], [0, 0, 1, 1], [], []>} : vector<8x128xf32>, vector<128x512xf32>, vector<8x512xf32> -> vector<8x512xf32>
    %240 = arith.index_cast %c5_i32 : i32 to index
    %c0_91 = arith.constant 0 : index
    %c0_92 = arith.constant 0 : index
    %241 = vector.load %arg1[%240, %c0_91, %c0_92] : memref<8x8x512xf32, #tpu.memory_space<vmem>>, vector<1x8x512xf32>
    %242 = vector.shape_cast %241 : vector<1x8x512xf32> to vector<8x512xf32>
    %243 = arith.addf %239, %242 : vector<8x512xf32>
    %244 = arith.negf %243 : vector<8x512xf32>
    %245 = math.exp %244 : vector<8x512xf32>
    %cst_93 = arith.constant 1.000000e+00 : f32
    %246 = vector.broadcast %cst_93 : f32 to vector<8x512xf32>
    %247 = arith.addf %246, %245 : vector<8x512xf32>
    %248 = arith.divf %246, %247 : vector<8x512xf32>
    %249 = vector.extract_strided_slice %248 {offsets = [0, 0], sizes = [8, 128], strides = [1, 1]} : vector<8x512xf32> to vector<8x128xf32>
    %250 = vector.extract_strided_slice %248 {offsets = [0, 128], sizes = [8, 128], strides = [1, 1]} : vector<8x512xf32> to vector<8x128xf32>
    %251 = vector.extract_strided_slice %248 {offsets = [0, 256], sizes = [8, 128], strides = [1, 1]} : vector<8x512xf32> to vector<8x128xf32>
    %252 = vector.extract_strided_slice %248 {offsets = [0, 384], sizes = [8, 128], strides = [1, 1]} : vector<8x512xf32> to vector<8x128xf32>
    %253 = arith.mulf %249, %237 : vector<8x128xf32>
    %254 = arith.mulf %250, %252 : vector<8x128xf32>
    %255 = arith.addf %253, %254 : vector<8x128xf32>
    %256 = math.tanh %255 : vector<8x128xf32>
    %257 = arith.mulf %251, %256 : vector<8x128xf32>
    %258 = arith.index_cast %c5_i32 : i32 to index
    %c0_94 = arith.constant 0 : index
    %c0_95 = arith.constant 0 : index
    %259 = vector.load %arg11[%258, %c0_94, %c0_95] : memref<8x8x128xf32, #tpu.memory_space<vmem>>, vector<1x8x128xf32>
    %260 = vector.shape_cast %259 : vector<1x8x128xf32> to vector<8x128xf32>
    %261 = vector.shape_cast %257 : vector<8x128xf32> to vector<1x8x128xf32>
    tpu.vector_store %arg11[%258, %c0_94, %c0_95], %261 {strides = array<i32>} : memref<8x8x128xf32, #tpu.memory_space<vmem>>, vector<1x8x128xf32>,
    %c6_i32 = arith.constant 6 : i32
    %c0_96 = arith.constant 0 : index
    %c0_97 = arith.constant 0 : index
    %262 = vector.load %arg5[%c0_96, %c0_97] : memref<128x128xf32, #tpu.memory_space<vmem>>, vector<128x128xf32>
    %cst_98 = arith.constant dense<0.000000e+00> : vector<8x128xf32>
    %263 = tpu.matmul %255, %262, %cst_98 {dimension_numbers = #tpu.dot_dimension_numbers<[1], [0], [0], [1], [0, 0, 1, 1], [], []>} : vector<8x128xf32>, vector<128x128xf32>, vector<8x128xf32> -> vector<8x128xf32>
    %264 = arith.addf %263, %2 : vector<8x128xf32>
    %265 = math.tanh %264 : vector<8x128xf32>
    %266 = arith.index_cast %c6_i32 : i32 to index
    %c0_99 = arith.constant 0 : index
    %c0_100 = arith.constant 0 : index
    %267 = vector.load %arg2[%266, %c0_99, %c0_100] : memref<8x8x1xf32, #tpu.memory_space<vmem>>, vector<1x8x1xf32>
    %268 = vector.shape_cast %267 : vector<1x8x1xf32> to vector<8x1xf32>
    %269 = vector.shape_cast %268 : vector<8x1xf32> to vector<8x1xf32>
    %270 = vector.broadcast %269 : vector<8x1xf32> to vector<8x64xf32>
    %c7_i32_101 = arith.constant 7 : i32
    %271 = arith.subi %c7_i32_101, %c6_i32 : i32
    %272 = arith.index_cast %271 : i32 to index
    %c0_102 = arith.constant 0 : index
    %c0_103 = arith.constant 0 : index
    %273 = vector.load %arg2[%272, %c0_102, %c0_103] : memref<8x8x1xf32, #tpu.memory_space<vmem>>, vector<1x8x1xf32>
    %274 = vector.shape_cast %273 : vector<1x8x1xf32> to vector<8x1xf32>
    %275 = vector.shape_cast %274 : vector<8x1xf32> to vector<8x1xf32>
    %276 = vector.broadcast %275 : vector<8x1xf32> to vector<8x64xf32>
    %277 = tpu.concatenate %270, %276 in 1 : vector<8x64xf32>, vector<8x64xf32> -> vector<8x128xf32>
    %278 = arith.subf %255, %265 : vector<8x128xf32>
    %279 = arith.mulf %265, %277 : vector<8x128xf32>
    %280 = arith.addf %278, %279 : vector<8x128xf32>
    %c0_104 = arith.constant 0 : index
    %c0_105 = arith.constant 0 : index
    %281 = vector.load %arg4[%c0_104, %c0_105] : memref<128x512xf32, #tpu.memory_space<vmem>>, vector<128x512xf32>
    %cst_106 = arith.constant dense<0.000000e+00> : vector<8x512xf32>
    %282 = tpu.matmul %257, %281, %cst_106 {dimension_numbers = #tpu.dot_dimension_numbers<[1], [0], [0], [1], [0, 0, 1, 1], [], []>} : vector<8x128xf32>, vector<128x512xf32>, vector<8x512xf32> -> vector<8x512xf32>
    %283 = arith.index_cast %c6_i32 : i32 to index
    %c0_107 = arith.constant 0 : index
    %c0_108 = arith.constant 0 : index
    %284 = vector.load %arg1[%283, %c0_107, %c0_108] : memref<8x8x512xf32, #tpu.memory_space<vmem>>, vector<1x8x512xf32>
    %285 = vector.shape_cast %284 : vector<1x8x512xf32> to vector<8x512xf32>
    %286 = arith.addf %282, %285 : vector<8x512xf32>
    %287 = arith.negf %286 : vector<8x512xf32>
    %288 = math.exp %287 : vector<8x512xf32>
    %cst_109 = arith.constant 1.000000e+00 : f32
    %289 = vector.broadcast %cst_109 : f32 to vector<8x512xf32>
    %290 = arith.addf %289, %288 : vector<8x512xf32>
    %291 = arith.divf %289, %290 : vector<8x512xf32>
    %292 = vector.extract_strided_slice %291 {offsets = [0, 0], sizes = [8, 128], strides = [1, 1]} : vector<8x512xf32> to vector<8x128xf32>
    %293 = vector.extract_strided_slice %291 {offsets = [0, 128], sizes = [8, 128], strides = [1, 1]} : vector<8x512xf32> to vector<8x128xf32>
    %294 = vector.extract_strided_slice %291 {offsets = [0, 256], sizes = [8, 128], strides = [1, 1]} : vector<8x512xf32> to vector<8x128xf32>
    %295 = vector.extract_strided_slice %291 {offsets = [0, 384], sizes = [8, 128], strides = [1, 1]} : vector<8x512xf32> to vector<8x128xf32>
    %296 = arith.mulf %292, %280 : vector<8x128xf32>
    %297 = arith.mulf %293, %295 : vector<8x128xf32>
    %298 = arith.addf %296, %297 : vector<8x128xf32>
    %299 = math.tanh %298 : vector<8x128xf32>
    %300 = arith.mulf %294, %299 : vector<8x128xf32>
    %301 = arith.index_cast %c6_i32 : i32 to index
    %c0_110 = arith.constant 0 : index
    %c0_111 = arith.constant 0 : index
    %302 = vector.load %arg11[%301, %c0_110, %c0_111] : memref<8x8x128xf32, #tpu.memory_space<vmem>>, vector<1x8x128xf32>
    %303 = vector.shape_cast %302 : vector<1x8x128xf32> to vector<8x128xf32>
    %304 = vector.shape_cast %300 : vector<8x128xf32> to vector<1x8x128xf32>
    tpu.vector_store %arg11[%301, %c0_110, %c0_111], %304 {strides = array<i32>} : memref<8x8x128xf32, #tpu.memory_space<vmem>>, vector<1x8x128xf32>,
    %c7_i32_112 = arith.constant 7 : i32
    %c0_113 = arith.constant 0 : index
    %c0_114 = arith.constant 0 : index
    %305 = vector.load %arg5[%c0_113, %c0_114] : memref<128x128xf32, #tpu.memory_space<vmem>>, vector<128x128xf32>
    %cst_115 = arith.constant dense<0.000000e+00> : vector<8x128xf32>
    %306 = tpu.matmul %298, %305, %cst_115 {dimension_numbers = #tpu.dot_dimension_numbers<[1], [0], [0], [1], [0, 0, 1, 1], [], []>} : vector<8x128xf32>, vector<128x128xf32>, vector<8x128xf32> -> vector<8x128xf32>
    %307 = arith.addf %306, %2 : vector<8x128xf32>
    %308 = math.tanh %307 : vector<8x128xf32>
    %309 = arith.index_cast %c7_i32_112 : i32 to index
    %c0_116 = arith.constant 0 : index
    %c0_117 = arith.constant 0 : index
    %310 = vector.load %arg2[%309, %c0_116, %c0_117] : memref<8x8x1xf32, #tpu.memory_space<vmem>>, vector<1x8x1xf32>
    %311 = vector.shape_cast %310 : vector<1x8x1xf32> to vector<8x1xf32>
    %312 = vector.shape_cast %311 : vector<8x1xf32> to vector<8x1xf32>
    %313 = vector.broadcast %312 : vector<8x1xf32> to vector<8x64xf32>
    %c7_i32_118 = arith.constant 7 : i32
    %314 = arith.subi %c7_i32_118, %c7_i32_112 : i32
    %315 = arith.index_cast %314 : i32 to index
    %c0_119 = arith.constant 0 : index
    %c0_120 = arith.constant 0 : index
    %316 = vector.load %arg2[%315, %c0_119, %c0_120] : memref<8x8x1xf32, #tpu.memory_space<vmem>>, vector<1x8x1xf32>
    %317 = vector.shape_cast %316 : vector<1x8x1xf32> to vector<8x1xf32>
    %318 = vector.shape_cast %317 : vector<8x1xf32> to vector<8x1xf32>
    %319 = vector.broadcast %318 : vector<8x1xf32> to vector<8x64xf32>
    %320 = tpu.concatenate %313, %319 in 1 : vector<8x64xf32>, vector<8x64xf32> -> vector<8x128xf32>
    %321 = arith.subf %298, %308 : vector<8x128xf32>
    %322 = arith.mulf %308, %320 : vector<8x128xf32>
    %323 = arith.addf %321, %322 : vector<8x128xf32>
    %c0_121 = arith.constant 0 : index
    %c0_122 = arith.constant 0 : index
    %324 = vector.load %arg4[%c0_121, %c0_122] : memref<128x512xf32, #tpu.memory_space<vmem>>, vector<128x512xf32>
    %cst_123 = arith.constant dense<0.000000e+00> : vector<8x512xf32>
    %325 = tpu.matmul %300, %324, %cst_123 {dimension_numbers = #tpu.dot_dimension_numbers<[1], [0], [0], [1], [0, 0, 1, 1], [], []>} : vector<8x128xf32>, vector<128x512xf32>, vector<8x512xf32> -> vector<8x512xf32>
    %326 = arith.index_cast %c7_i32_112 : i32 to index
    %c0_124 = arith.constant 0 : index
    %c0_125 = arith.constant 0 : index
    %327 = vector.load %arg1[%326, %c0_124, %c0_125] : memref<8x8x512xf32, #tpu.memory_space<vmem>>, vector<1x8x512xf32>
    %328 = vector.shape_cast %327 : vector<1x8x512xf32> to vector<8x512xf32>
    %329 = arith.addf %325, %328 : vector<8x512xf32>
    %330 = arith.negf %329 : vector<8x512xf32>
    %331 = math.exp %330 : vector<8x512xf32>
    %cst_126 = arith.constant 1.000000e+00 : f32
    %332 = vector.broadcast %cst_126 : f32 to vector<8x512xf32>
    %333 = arith.addf %332, %331 : vector<8x512xf32>
    %334 = arith.divf %332, %333 : vector<8x512xf32>
    %335 = vector.extract_strided_slice %334 {offsets = [0, 0], sizes = [8, 128], strides = [1, 1]} : vector<8x512xf32> to vector<8x128xf32>
    %336 = vector.extract_strided_slice %334 {offsets = [0, 128], sizes = [8, 128], strides = [1, 1]} : vector<8x512xf32> to vector<8x128xf32>
    %337 = vector.extract_strided_slice %334 {offsets = [0, 256], sizes = [8, 128], strides = [1, 1]} : vector<8x512xf32> to vector<8x128xf32>
    %338 = vector.extract_strided_slice %334 {offsets = [0, 384], sizes = [8, 128], strides = [1, 1]} : vector<8x512xf32> to vector<8x128xf32>
    %339 = arith.mulf %335, %323 : vector<8x128xf32>
    %340 = arith.mulf %336, %338 : vector<8x128xf32>
    %341 = arith.addf %339, %340 : vector<8x128xf32>
    %342 = math.tanh %341 : vector<8x128xf32>
    %343 = arith.mulf %337, %342 : vector<8x128xf32>
    %344 = arith.index_cast %c7_i32_112 : i32 to index
    %c0_127 = arith.constant 0 : index
    %c0_128 = arith.constant 0 : index
    %345 = vector.load %arg11[%344, %c0_127, %c0_128] : memref<8x8x128xf32, #tpu.memory_space<vmem>>, vector<1x8x128xf32>
    %346 = vector.shape_cast %345 : vector<1x8x128xf32> to vector<8x128xf32>
    %347 = vector.shape_cast %343 : vector<8x128xf32> to vector<1x8x128xf32>
    tpu.vector_store %arg11[%344, %c0_127, %c0_128], %347 {strides = array<i32>} : memref<8x8x128xf32, #tpu.memory_space<vmem>>, vector<1x8x128xf32>,
    %c8_i32 = arith.constant 8 : i32
    %cst_129 = arith.constant 0xFF800000 : f32
    %348 = vector.broadcast %cst_129 : f32 to vector<8x1xf32>
    %cst_130 = arith.constant 0.000000e+00 : f32
    %349 = vector.broadcast %cst_130 : f32 to vector<8x1xf32>
    %cst_131 = arith.constant 0.000000e+00 : f32
    %350 = vector.broadcast %cst_131 : f32 to vector<8x32xf32>
    %c0_i32_132 = arith.constant 0 : i32
    %351 = arith.index_cast %c0_i32_132 : i32 to index
    %c0_133 = arith.constant 0 : index
    %c0_134 = arith.constant 0 : index
    %352 = vector.load %arg11[%351, %c0_133, %c0_134] : memref<8x8x128xf32, #tpu.memory_space<vmem>>, vector<1x8x128xf32>
    %353 = vector.shape_cast %352 : vector<1x8x128xf32> to vector<8x128xf32>
    %354 = vector.extract_strided_slice %353 {offsets = [0, 0], sizes = [8, 64], strides = [1, 1]} : vector<8x128xf32> to vector<8x64xf32>
    %c7_i32_135 = arith.constant 7 : i32
    %355 = arith.subi %c7_i32_135, %c0_i32_132 : i32
    %356 = arith.index_cast %355 : i32 to index
    %c0_136 = arith.constant 0 : index
    %c0_137 = arith.constant 0 : index
    %357 = vector.load %arg11[%356, %c0_136, %c0_137] : memref<8x8x128xf32, #tpu.memory_space<vmem>>, vector<1x8x128xf32>
    %358 = vector.shape_cast %357 : vector<1x8x128xf32> to vector<8x128xf32>
    %359 = vector.extract_strided_slice %358 {offsets = [0, 64], sizes = [8, 64], strides = [1, 1]} : vector<8x128xf32> to vector<8x64xf32>
    %c0_138 = arith.constant 0 : index
    %c0_139 = arith.constant 0 : index
    %360 = vector.load %arg7[%c0_138, %c0_139] : memref<64x33xf32, #tpu.memory_space<vmem>>, vector<64x33xf32>
    %cst_140 = arith.constant dense<0.000000e+00> : vector<8x33xf32>
    %361 = tpu.matmul %354, %360, %cst_140 {dimension_numbers = #tpu.dot_dimension_numbers<[1], [0], [0], [1], [0, 0, 1, 1], [], []>} : vector<8x64xf32>, vector<64x33xf32>, vector<8x33xf32> -> vector<8x33xf32>
    %c0_141 = arith.constant 0 : index
    %c0_142 = arith.constant 0 : index
    %362 = vector.load %arg8[%c0_141, %c0_142] : memref<64x33xf32, #tpu.memory_space<vmem>>, vector<64x33xf32>
    %cst_143 = arith.constant dense<0.000000e+00> : vector<8x33xf32>
    %363 = tpu.matmul %359, %362, %cst_143 {dimension_numbers = #tpu.dot_dimension_numbers<[1], [0], [0], [1], [0, 0, 1, 1], [], []>} : vector<8x64xf32>, vector<64x33xf32>, vector<8x33xf32> -> vector<8x33xf32>
    %364 = arith.addf %361, %363 : vector<8x33xf32>
    %365 = vector.extract_strided_slice %364 {offsets = [0, 0], sizes = [8, 32], strides = [1, 1]} : vector<8x33xf32> to vector<8x32xf32>
    %366 = math.tanh %365 : vector<8x32xf32>
    %367 = vector.extract_strided_slice %364 {offsets = [0, 32], sizes = [8, 1], strides = [1, 1]} : vector<8x33xf32> to vector<8x1xf32>
    %368 = arith.maximumf %348, %367 : vector<8x1xf32>
    %369 = arith.subf %348, %368 : vector<8x1xf32>
    %370 = math.exp %369 : vector<8x1xf32>
    %371 = arith.subf %367, %368 : vector<8x1xf32>
    %372 = math.exp %371 : vector<8x1xf32>
    %373 = arith.mulf %349, %370 : vector<8x1xf32>
    %374 = arith.addf %373, %372 : vector<8x1xf32>
    %375 = vector.broadcast %370 : vector<8x1xf32> to vector<8x32xf32>
    %376 = arith.mulf %350, %375 : vector<8x32xf32>
    %377 = vector.broadcast %372 : vector<8x1xf32> to vector<8x32xf32>
    %378 = arith.mulf %377, %366 : vector<8x32xf32>
    %379 = arith.index_cast %c0_i32_132 : i32 to index
    %c0_144 = arith.constant 0 : index
    %c0_145 = arith.constant 0 : index
    %380 = vector.load %arg3[%379, %c0_144, %c0_145] : memref<8x8x32xf32, #tpu.memory_space<vmem>>, vector<1x8x32xf32>
    %381 = vector.shape_cast %380 : vector<1x8x32xf32> to vector<8x32xf32>
    %382 = arith.mulf %378, %381 : vector<8x32xf32>
    %383 = arith.addf %376, %382 : vector<8x32xf32>
    %c1_i32_146 = arith.constant 1 : i32
    %384 = arith.index_cast %c1_i32_146 : i32 to index
    %c0_147 = arith.constant 0 : index
    %c0_148 = arith.constant 0 : index
    %385 = vector.load %arg11[%384, %c0_147, %c0_148] : memref<8x8x128xf32, #tpu.memory_space<vmem>>, vector<1x8x128xf32>
    %386 = vector.shape_cast %385 : vector<1x8x128xf32> to vector<8x128xf32>
    %387 = vector.extract_strided_slice %386 {offsets = [0, 0], sizes = [8, 64], strides = [1, 1]} : vector<8x128xf32> to vector<8x64xf32>
    %c7_i32_149 = arith.constant 7 : i32
    %388 = arith.subi %c7_i32_149, %c1_i32_146 : i32
    %389 = arith.index_cast %388 : i32 to index
    %c0_150 = arith.constant 0 : index
    %c0_151 = arith.constant 0 : index
    %390 = vector.load %arg11[%389, %c0_150, %c0_151] : memref<8x8x128xf32, #tpu.memory_space<vmem>>, vector<1x8x128xf32>
    %391 = vector.shape_cast %390 : vector<1x8x128xf32> to vector<8x128xf32>
    %392 = vector.extract_strided_slice %391 {offsets = [0, 64], sizes = [8, 64], strides = [1, 1]} : vector<8x128xf32> to vector<8x64xf32>
    %c0_152 = arith.constant 0 : index
    %c0_153 = arith.constant 0 : index
    %393 = vector.load %arg7[%c0_152, %c0_153] : memref<64x33xf32, #tpu.memory_space<vmem>>, vector<64x33xf32>
    %cst_154 = arith.constant dense<0.000000e+00> : vector<8x33xf32>
    %394 = tpu.matmul %387, %393, %cst_154 {dimension_numbers = #tpu.dot_dimension_numbers<[1], [0], [0], [1], [0, 0, 1, 1], [], []>} : vector<8x64xf32>, vector<64x33xf32>, vector<8x33xf32> -> vector<8x33xf32>
    %c0_155 = arith.constant 0 : index
    %c0_156 = arith.constant 0 : index
    %395 = vector.load %arg8[%c0_155, %c0_156] : memref<64x33xf32, #tpu.memory_space<vmem>>, vector<64x33xf32>
    %cst_157 = arith.constant dense<0.000000e+00> : vector<8x33xf32>
    %396 = tpu.matmul %392, %395, %cst_157 {dimension_numbers = #tpu.dot_dimension_numbers<[1], [0], [0], [1], [0, 0, 1, 1], [], []>} : vector<8x64xf32>, vector<64x33xf32>, vector<8x33xf32> -> vector<8x33xf32>
    %397 = arith.addf %394, %396 : vector<8x33xf32>
    %398 = vector.extract_strided_slice %397 {offsets = [0, 0], sizes = [8, 32], strides = [1, 1]} : vector<8x33xf32> to vector<8x32xf32>
    %399 = math.tanh %398 : vector<8x32xf32>
    %400 = vector.extract_strided_slice %397 {offsets = [0, 32], sizes = [8, 1], strides = [1, 1]} : vector<8x33xf32> to vector<8x1xf32>
    %401 = arith.maximumf %368, %400 : vector<8x1xf32>
    %402 = arith.subf %368, %401 : vector<8x1xf32>
    %403 = math.exp %402 : vector<8x1xf32>
    %404 = arith.subf %400, %401 : vector<8x1xf32>
    %405 = math.exp %404 : vector<8x1xf32>
    %406 = arith.mulf %374, %403 : vector<8x1xf32>
    %407 = arith.addf %406, %405 : vector<8x1xf32>
    %408 = vector.broadcast %403 : vector<8x1xf32> to vector<8x32xf32>
    %409 = arith.mulf %383, %408 : vector<8x32xf32>
    %410 = vector.broadcast %405 : vector<8x1xf32> to vector<8x32xf32>
    %411 = arith.mulf %410, %399 : vector<8x32xf32>
    %412 = arith.index_cast %c1_i32_146 : i32 to index
    %c0_158 = arith.constant 0 : index
    %c0_159 = arith.constant 0 : index
    %413 = vector.load %arg3[%412, %c0_158, %c0_159] : memref<8x8x32xf32, #tpu.memory_space<vmem>>, vector<1x8x32xf32>
    %414 = vector.shape_cast %413 : vector<1x8x32xf32> to vector<8x32xf32>
    %415 = arith.mulf %411, %414 : vector<8x32xf32>
    %416 = arith.addf %409, %415 : vector<8x32xf32>
    %c2_i32_160 = arith.constant 2 : i32
    %417 = arith.index_cast %c2_i32_160 : i32 to index
    %c0_161 = arith.constant 0 : index
    %c0_162 = arith.constant 0 : index
    %418 = vector.load %arg11[%417, %c0_161, %c0_162] : memref<8x8x128xf32, #tpu.memory_space<vmem>>, vector<1x8x128xf32>
    %419 = vector.shape_cast %418 : vector<1x8x128xf32> to vector<8x128xf32>
    %420 = vector.extract_strided_slice %419 {offsets = [0, 0], sizes = [8, 64], strides = [1, 1]} : vector<8x128xf32> to vector<8x64xf32>
    %c7_i32_163 = arith.constant 7 : i32
    %421 = arith.subi %c7_i32_163, %c2_i32_160 : i32
    %422 = arith.index_cast %421 : i32 to index
    %c0_164 = arith.constant 0 : index
    %c0_165 = arith.constant 0 : index
    %423 = vector.load %arg11[%422, %c0_164, %c0_165] : memref<8x8x128xf32, #tpu.memory_space<vmem>>, vector<1x8x128xf32>
    %424 = vector.shape_cast %423 : vector<1x8x128xf32> to vector<8x128xf32>
    %425 = vector.extract_strided_slice %424 {offsets = [0, 64], sizes = [8, 64], strides = [1, 1]} : vector<8x128xf32> to vector<8x64xf32>
    %c0_166 = arith.constant 0 : index
    %c0_167 = arith.constant 0 : index
    %426 = vector.load %arg7[%c0_166, %c0_167] : memref<64x33xf32, #tpu.memory_space<vmem>>, vector<64x33xf32>
    %cst_168 = arith.constant dense<0.000000e+00> : vector<8x33xf32>
    %427 = tpu.matmul %420, %426, %cst_168 {dimension_numbers = #tpu.dot_dimension_numbers<[1], [0], [0], [1], [0, 0, 1, 1], [], []>} : vector<8x64xf32>, vector<64x33xf32>, vector<8x33xf32> -> vector<8x33xf32>
    %c0_169 = arith.constant 0 : index
    %c0_170 = arith.constant 0 : index
    %428 = vector.load %arg8[%c0_169, %c0_170] : memref<64x33xf32, #tpu.memory_space<vmem>>, vector<64x33xf32>
    %cst_171 = arith.constant dense<0.000000e+00> : vector<8x33xf32>
    %429 = tpu.matmul %425, %428, %cst_171 {dimension_numbers = #tpu.dot_dimension_numbers<[1], [0], [0], [1], [0, 0, 1, 1], [], []>} : vector<8x64xf32>, vector<64x33xf32>, vector<8x33xf32> -> vector<8x33xf32>
    %430 = arith.addf %427, %429 : vector<8x33xf32>
    %431 = vector.extract_strided_slice %430 {offsets = [0, 0], sizes = [8, 32], strides = [1, 1]} : vector<8x33xf32> to vector<8x32xf32>
    %432 = math.tanh %431 : vector<8x32xf32>
    %433 = vector.extract_strided_slice %430 {offsets = [0, 32], sizes = [8, 1], strides = [1, 1]} : vector<8x33xf32> to vector<8x1xf32>
    %434 = arith.maximumf %401, %433 : vector<8x1xf32>
    %435 = arith.subf %401, %434 : vector<8x1xf32>
    %436 = math.exp %435 : vector<8x1xf32>
    %437 = arith.subf %433, %434 : vector<8x1xf32>
    %438 = math.exp %437 : vector<8x1xf32>
    %439 = arith.mulf %407, %436 : vector<8x1xf32>
    %440 = arith.addf %439, %438 : vector<8x1xf32>
    %441 = vector.broadcast %436 : vector<8x1xf32> to vector<8x32xf32>
    %442 = arith.mulf %416, %441 : vector<8x32xf32>
    %443 = vector.broadcast %438 : vector<8x1xf32> to vector<8x32xf32>
    %444 = arith.mulf %443, %432 : vector<8x32xf32>
    %445 = arith.index_cast %c2_i32_160 : i32 to index
    %c0_172 = arith.constant 0 : index
    %c0_173 = arith.constant 0 : index
    %446 = vector.load %arg3[%445, %c0_172, %c0_173] : memref<8x8x32xf32, #tpu.memory_space<vmem>>, vector<1x8x32xf32>
    %447 = vector.shape_cast %446 : vector<1x8x32xf32> to vector<8x32xf32>
    %448 = arith.mulf %444, %447 : vector<8x32xf32>
    %449 = arith.addf %442, %448 : vector<8x32xf32>
    %c3_i32_174 = arith.constant 3 : i32
    %450 = arith.index_cast %c3_i32_174 : i32 to index
    %c0_175 = arith.constant 0 : index
    %c0_176 = arith.constant 0 : index
    %451 = vector.load %arg11[%450, %c0_175, %c0_176] : memref<8x8x128xf32, #tpu.memory_space<vmem>>, vector<1x8x128xf32>
    %452 = vector.shape_cast %451 : vector<1x8x128xf32> to vector<8x128xf32>
    %453 = vector.extract_strided_slice %452 {offsets = [0, 0], sizes = [8, 64], strides = [1, 1]} : vector<8x128xf32> to vector<8x64xf32>
    %c7_i32_177 = arith.constant 7 : i32
    %454 = arith.subi %c7_i32_177, %c3_i32_174 : i32
    %455 = arith.index_cast %454 : i32 to index
    %c0_178 = arith.constant 0 : index
    %c0_179 = arith.constant 0 : index
    %456 = vector.load %arg11[%455, %c0_178, %c0_179] : memref<8x8x128xf32, #tpu.memory_space<vmem>>, vector<1x8x128xf32>
    %457 = vector.shape_cast %456 : vector<1x8x128xf32> to vector<8x128xf32>
    %458 = vector.extract_strided_slice %457 {offsets = [0, 64], sizes = [8, 64], strides = [1, 1]} : vector<8x128xf32> to vector<8x64xf32>
    %c0_180 = arith.constant 0 : index
    %c0_181 = arith.constant 0 : index
    %459 = vector.load %arg7[%c0_180, %c0_181] : memref<64x33xf32, #tpu.memory_space<vmem>>, vector<64x33xf32>
    %cst_182 = arith.constant dense<0.000000e+00> : vector<8x33xf32>
    %460 = tpu.matmul %453, %459, %cst_182 {dimension_numbers = #tpu.dot_dimension_numbers<[1], [0], [0], [1], [0, 0, 1, 1], [], []>} : vector<8x64xf32>, vector<64x33xf32>, vector<8x33xf32> -> vector<8x33xf32>
    %c0_183 = arith.constant 0 : index
    %c0_184 = arith.constant 0 : index
    %461 = vector.load %arg8[%c0_183, %c0_184] : memref<64x33xf32, #tpu.memory_space<vmem>>, vector<64x33xf32>
    %cst_185 = arith.constant dense<0.000000e+00> : vector<8x33xf32>
    %462 = tpu.matmul %458, %461, %cst_185 {dimension_numbers = #tpu.dot_dimension_numbers<[1], [0], [0], [1], [0, 0, 1, 1], [], []>} : vector<8x64xf32>, vector<64x33xf32>, vector<8x33xf32> -> vector<8x33xf32>
    %463 = arith.addf %460, %462 : vector<8x33xf32>
    %464 = vector.extract_strided_slice %463 {offsets = [0, 0], sizes = [8, 32], strides = [1, 1]} : vector<8x33xf32> to vector<8x32xf32>
    %465 = math.tanh %464 : vector<8x32xf32>
    %466 = vector.extract_strided_slice %463 {offsets = [0, 32], sizes = [8, 1], strides = [1, 1]} : vector<8x33xf32> to vector<8x1xf32>
    %467 = arith.maximumf %434, %466 : vector<8x1xf32>
    %468 = arith.subf %434, %467 : vector<8x1xf32>
    %469 = math.exp %468 : vector<8x1xf32>
    %470 = arith.subf %466, %467 : vector<8x1xf32>
    %471 = math.exp %470 : vector<8x1xf32>
    %472 = arith.mulf %440, %469 : vector<8x1xf32>
    %473 = arith.addf %472, %471 : vector<8x1xf32>
    %474 = vector.broadcast %469 : vector<8x1xf32> to vector<8x32xf32>
    %475 = arith.mulf %449, %474 : vector<8x32xf32>
    %476 = vector.broadcast %471 : vector<8x1xf32> to vector<8x32xf32>
    %477 = arith.mulf %476, %465 : vector<8x32xf32>
    %478 = arith.index_cast %c3_i32_174 : i32 to index
    %c0_186 = arith.constant 0 : index
    %c0_187 = arith.constant 0 : index
    %479 = vector.load %arg3[%478, %c0_186, %c0_187] : memref<8x8x32xf32, #tpu.memory_space<vmem>>, vector<1x8x32xf32>
    %480 = vector.shape_cast %479 : vector<1x8x32xf32> to vector<8x32xf32>
    %481 = arith.mulf %477, %480 : vector<8x32xf32>
    %482 = arith.addf %475, %481 : vector<8x32xf32>
    %c4_i32_188 = arith.constant 4 : i32
    %483 = arith.index_cast %c4_i32_188 : i32 to index
    %c0_189 = arith.constant 0 : index
    %c0_190 = arith.constant 0 : index
    %484 = vector.load %arg11[%483, %c0_189, %c0_190] : memref<8x8x128xf32, #tpu.memory_space<vmem>>, vector<1x8x128xf32>
    %485 = vector.shape_cast %484 : vector<1x8x128xf32> to vector<8x128xf32>
    %486 = vector.extract_strided_slice %485 {offsets = [0, 0], sizes = [8, 64], strides = [1, 1]} : vector<8x128xf32> to vector<8x64xf32>
    %c7_i32_191 = arith.constant 7 : i32
    %487 = arith.subi %c7_i32_191, %c4_i32_188 : i32
    %488 = arith.index_cast %487 : i32 to index
    %c0_192 = arith.constant 0 : index
    %c0_193 = arith.constant 0 : index
    %489 = vector.load %arg11[%488, %c0_192, %c0_193] : memref<8x8x128xf32, #tpu.memory_space<vmem>>, vector<1x8x128xf32>
    %490 = vector.shape_cast %489 : vector<1x8x128xf32> to vector<8x128xf32>
    %491 = vector.extract_strided_slice %490 {offsets = [0, 64], sizes = [8, 64], strides = [1, 1]} : vector<8x128xf32> to vector<8x64xf32>
    %c0_194 = arith.constant 0 : index
    %c0_195 = arith.constant 0 : index
    %492 = vector.load %arg7[%c0_194, %c0_195] : memref<64x33xf32, #tpu.memory_space<vmem>>, vector<64x33xf32>
    %cst_196 = arith.constant dense<0.000000e+00> : vector<8x33xf32>
    %493 = tpu.matmul %486, %492, %cst_196 {dimension_numbers = #tpu.dot_dimension_numbers<[1], [0], [0], [1], [0, 0, 1, 1], [], []>} : vector<8x64xf32>, vector<64x33xf32>, vector<8x33xf32> -> vector<8x33xf32>
    %c0_197 = arith.constant 0 : index
    %c0_198 = arith.constant 0 : index
    %494 = vector.load %arg8[%c0_197, %c0_198] : memref<64x33xf32, #tpu.memory_space<vmem>>, vector<64x33xf32>
    %cst_199 = arith.constant dense<0.000000e+00> : vector<8x33xf32>
    %495 = tpu.matmul %491, %494, %cst_199 {dimension_numbers = #tpu.dot_dimension_numbers<[1], [0], [0], [1], [0, 0, 1, 1], [], []>} : vector<8x64xf32>, vector<64x33xf32>, vector<8x33xf32> -> vector<8x33xf32>
    %496 = arith.addf %493, %495 : vector<8x33xf32>
    %497 = vector.extract_strided_slice %496 {offsets = [0, 0], sizes = [8, 32], strides = [1, 1]} : vector<8x33xf32> to vector<8x32xf32>
    %498 = math.tanh %497 : vector<8x32xf32>
    %499 = vector.extract_strided_slice %496 {offsets = [0, 32], sizes = [8, 1], strides = [1, 1]} : vector<8x33xf32> to vector<8x1xf32>
    %500 = arith.maximumf %467, %499 : vector<8x1xf32>
    %501 = arith.subf %467, %500 : vector<8x1xf32>
    %502 = math.exp %501 : vector<8x1xf32>
    %503 = arith.subf %499, %500 : vector<8x1xf32>
    %504 = math.exp %503 : vector<8x1xf32>
    %505 = arith.mulf %473, %502 : vector<8x1xf32>
    %506 = arith.addf %505, %504 : vector<8x1xf32>
    %507 = vector.broadcast %502 : vector<8x1xf32> to vector<8x32xf32>
    %508 = arith.mulf %482, %507 : vector<8x32xf32>
    %509 = vector.broadcast %504 : vector<8x1xf32> to vector<8x32xf32>
    %510 = arith.mulf %509, %498 : vector<8x32xf32>
    %511 = arith.index_cast %c4_i32_188 : i32 to index
    %c0_200 = arith.constant 0 : index
    %c0_201 = arith.constant 0 : index
    %512 = vector.load %arg3[%511, %c0_200, %c0_201] : memref<8x8x32xf32, #tpu.memory_space<vmem>>, vector<1x8x32xf32>
    %513 = vector.shape_cast %512 : vector<1x8x32xf32> to vector<8x32xf32>
    %514 = arith.mulf %510, %513 : vector<8x32xf32>
    %515 = arith.addf %508, %514 : vector<8x32xf32>
    %c5_i32_202 = arith.constant 5 : i32
    %516 = arith.index_cast %c5_i32_202 : i32 to index
    %c0_203 = arith.constant 0 : index
    %c0_204 = arith.constant 0 : index
    %517 = vector.load %arg11[%516, %c0_203, %c0_204] : memref<8x8x128xf32, #tpu.memory_space<vmem>>, vector<1x8x128xf32>
    %518 = vector.shape_cast %517 : vector<1x8x128xf32> to vector<8x128xf32>
    %519 = vector.extract_strided_slice %518 {offsets = [0, 0], sizes = [8, 64], strides = [1, 1]} : vector<8x128xf32> to vector<8x64xf32>
    %c7_i32_205 = arith.constant 7 : i32
    %520 = arith.subi %c7_i32_205, %c5_i32_202 : i32
    %521 = arith.index_cast %520 : i32 to index
    %c0_206 = arith.constant 0 : index
    %c0_207 = arith.constant 0 : index
    %522 = vector.load %arg11[%521, %c0_206, %c0_207] : memref<8x8x128xf32, #tpu.memory_space<vmem>>, vector<1x8x128xf32>
    %523 = vector.shape_cast %522 : vector<1x8x128xf32> to vector<8x128xf32>
    %524 = vector.extract_strided_slice %523 {offsets = [0, 64], sizes = [8, 64], strides = [1, 1]} : vector<8x128xf32> to vector<8x64xf32>
    %c0_208 = arith.constant 0 : index
    %c0_209 = arith.constant 0 : index
    %525 = vector.load %arg7[%c0_208, %c0_209] : memref<64x33xf32, #tpu.memory_space<vmem>>, vector<64x33xf32>
    %cst_210 = arith.constant dense<0.000000e+00> : vector<8x33xf32>
    %526 = tpu.matmul %519, %525, %cst_210 {dimension_numbers = #tpu.dot_dimension_numbers<[1], [0], [0], [1], [0, 0, 1, 1], [], []>} : vector<8x64xf32>, vector<64x33xf32>, vector<8x33xf32> -> vector<8x33xf32>
    %c0_211 = arith.constant 0 : index
    %c0_212 = arith.constant 0 : index
    %527 = vector.load %arg8[%c0_211, %c0_212] : memref<64x33xf32, #tpu.memory_space<vmem>>, vector<64x33xf32>
    %cst_213 = arith.constant dense<0.000000e+00> : vector<8x33xf32>
    %528 = tpu.matmul %524, %527, %cst_213 {dimension_numbers = #tpu.dot_dimension_numbers<[1], [0], [0], [1], [0, 0, 1, 1], [], []>} : vector<8x64xf32>, vector<64x33xf32>, vector<8x33xf32> -> vector<8x33xf32>
    %529 = arith.addf %526, %528 : vector<8x33xf32>
    %530 = vector.extract_strided_slice %529 {offsets = [0, 0], sizes = [8, 32], strides = [1, 1]} : vector<8x33xf32> to vector<8x32xf32>
    %531 = math.tanh %530 : vector<8x32xf32>
    %532 = vector.extract_strided_slice %529 {offsets = [0, 32], sizes = [8, 1], strides = [1, 1]} : vector<8x33xf32> to vector<8x1xf32>
    %533 = arith.maximumf %500, %532 : vector<8x1xf32>
    %534 = arith.subf %500, %533 : vector<8x1xf32>
    %535 = math.exp %534 : vector<8x1xf32>
    %536 = arith.subf %532, %533 : vector<8x1xf32>
    %537 = math.exp %536 : vector<8x1xf32>
    %538 = arith.mulf %506, %535 : vector<8x1xf32>
    %539 = arith.addf %538, %537 : vector<8x1xf32>
    %540 = vector.broadcast %535 : vector<8x1xf32> to vector<8x32xf32>
    %541 = arith.mulf %515, %540 : vector<8x32xf32>
    %542 = vector.broadcast %537 : vector<8x1xf32> to vector<8x32xf32>
    %543 = arith.mulf %542, %531 : vector<8x32xf32>
    %544 = arith.index_cast %c5_i32_202 : i32 to index
    %c0_214 = arith.constant 0 : index
    %c0_215 = arith.constant 0 : index
    %545 = vector.load %arg3[%544, %c0_214, %c0_215] : memref<8x8x32xf32, #tpu.memory_space<vmem>>, vector<1x8x32xf32>
    %546 = vector.shape_cast %545 : vector<1x8x32xf32> to vector<8x32xf32>
    %547 = arith.mulf %543, %546 : vector<8x32xf32>
    %548 = arith.addf %541, %547 : vector<8x32xf32>
    %c6_i32_216 = arith.constant 6 : i32
    %549 = arith.index_cast %c6_i32_216 : i32 to index
    %c0_217 = arith.constant 0 : index
    %c0_218 = arith.constant 0 : index
    %550 = vector.load %arg11[%549, %c0_217, %c0_218] : memref<8x8x128xf32, #tpu.memory_space<vmem>>, vector<1x8x128xf32>
    %551 = vector.shape_cast %550 : vector<1x8x128xf32> to vector<8x128xf32>
    %552 = vector.extract_strided_slice %551 {offsets = [0, 0], sizes = [8, 64], strides = [1, 1]} : vector<8x128xf32> to vector<8x64xf32>
    %c7_i32_219 = arith.constant 7 : i32
    %553 = arith.subi %c7_i32_219, %c6_i32_216 : i32
    %554 = arith.index_cast %553 : i32 to index
    %c0_220 = arith.constant 0 : index
    %c0_221 = arith.constant 0 : index
    %555 = vector.load %arg11[%554, %c0_220, %c0_221] : memref<8x8x128xf32, #tpu.memory_space<vmem>>, vector<1x8x128xf32>
    %556 = vector.shape_cast %555 : vector<1x8x128xf32> to vector<8x128xf32>
    %557 = vector.extract_strided_slice %556 {offsets = [0, 64], sizes = [8, 64], strides = [1, 1]} : vector<8x128xf32> to vector<8x64xf32>
    %c0_222 = arith.constant 0 : index
    %c0_223 = arith.constant 0 : index
    %558 = vector.load %arg7[%c0_222, %c0_223] : memref<64x33xf32, #tpu.memory_space<vmem>>, vector<64x33xf32>
    %cst_224 = arith.constant dense<0.000000e+00> : vector<8x33xf32>
    %559 = tpu.matmul %552, %558, %cst_224 {dimension_numbers = #tpu.dot_dimension_numbers<[1], [0], [0], [1], [0, 0, 1, 1], [], []>} : vector<8x64xf32>, vector<64x33xf32>, vector<8x33xf32> -> vector<8x33xf32>
    %c0_225 = arith.constant 0 : index
    %c0_226 = arith.constant 0 : index
    %560 = vector.load %arg8[%c0_225, %c0_226] : memref<64x33xf32, #tpu.memory_space<vmem>>, vector<64x33xf32>
    %cst_227 = arith.constant dense<0.000000e+00> : vector<8x33xf32>
    %561 = tpu.matmul %557, %560, %cst_227 {dimension_numbers = #tpu.dot_dimension_numbers<[1], [0], [0], [1], [0, 0, 1, 1], [], []>} : vector<8x64xf32>, vector<64x33xf32>, vector<8x33xf32> -> vector<8x33xf32>
    %562 = arith.addf %559, %561 : vector<8x33xf32>
    %563 = vector.extract_strided_slice %562 {offsets = [0, 0], sizes = [8, 32], strides = [1, 1]} : vector<8x33xf32> to vector<8x32xf32>
    %564 = math.tanh %563 : vector<8x32xf32>
    %565 = vector.extract_strided_slice %562 {offsets = [0, 32], sizes = [8, 1], strides = [1, 1]} : vector<8x33xf32> to vector<8x1xf32>
    %566 = arith.maximumf %533, %565 : vector<8x1xf32>
    %567 = arith.subf %533, %566 : vector<8x1xf32>
    %568 = math.exp %567 : vector<8x1xf32>
    %569 = arith.subf %565, %566 : vector<8x1xf32>
    %570 = math.exp %569 : vector<8x1xf32>
    %571 = arith.mulf %539, %568 : vector<8x1xf32>
    %572 = arith.addf %571, %570 : vector<8x1xf32>
    %573 = vector.broadcast %568 : vector<8x1xf32> to vector<8x32xf32>
    %574 = arith.mulf %548, %573 : vector<8x32xf32>
    %575 = vector.broadcast %570 : vector<8x1xf32> to vector<8x32xf32>
    %576 = arith.mulf %575, %564 : vector<8x32xf32>
    %577 = arith.index_cast %c6_i32_216 : i32 to index
    %c0_228 = arith.constant 0 : index
    %c0_229 = arith.constant 0 : index
    %578 = vector.load %arg3[%577, %c0_228, %c0_229] : memref<8x8x32xf32, #tpu.memory_space<vmem>>, vector<1x8x32xf32>
    %579 = vector.shape_cast %578 : vector<1x8x32xf32> to vector<8x32xf32>
    %580 = arith.mulf %576, %579 : vector<8x32xf32>
    %581 = arith.addf %574, %580 : vector<8x32xf32>
    %c7_i32_230 = arith.constant 7 : i32
    %582 = arith.index_cast %c7_i32_230 : i32 to index
    %c0_231 = arith.constant 0 : index
    %c0_232 = arith.constant 0 : index
    %583 = vector.load %arg11[%582, %c0_231, %c0_232] : memref<8x8x128xf32, #tpu.memory_space<vmem>>, vector<1x8x128xf32>
    %584 = vector.shape_cast %583 : vector<1x8x128xf32> to vector<8x128xf32>
    %585 = vector.extract_strided_slice %584 {offsets = [0, 0], sizes = [8, 64], strides = [1, 1]} : vector<8x128xf32> to vector<8x64xf32>
    %c7_i32_233 = arith.constant 7 : i32
    %586 = arith.subi %c7_i32_233, %c7_i32_230 : i32
    %587 = arith.index_cast %586 : i32 to index
    %c0_234 = arith.constant 0 : index
    %c0_235 = arith.constant 0 : index
    %588 = vector.load %arg11[%587, %c0_234, %c0_235] : memref<8x8x128xf32, #tpu.memory_space<vmem>>, vector<1x8x128xf32>
    %589 = vector.shape_cast %588 : vector<1x8x128xf32> to vector<8x128xf32>
    %590 = vector.extract_strided_slice %589 {offsets = [0, 64], sizes = [8, 64], strides = [1, 1]} : vector<8x128xf32> to vector<8x64xf32>
    %c0_236 = arith.constant 0 : index
    %c0_237 = arith.constant 0 : index
    %591 = vector.load %arg7[%c0_236, %c0_237] : memref<64x33xf32, #tpu.memory_space<vmem>>, vector<64x33xf32>
    %cst_238 = arith.constant dense<0.000000e+00> : vector<8x33xf32>
    %592 = tpu.matmul %585, %591, %cst_238 {dimension_numbers = #tpu.dot_dimension_numbers<[1], [0], [0], [1], [0, 0, 1, 1], [], []>} : vector<8x64xf32>, vector<64x33xf32>, vector<8x33xf32> -> vector<8x33xf32>
    %c0_239 = arith.constant 0 : index
    %c0_240 = arith.constant 0 : index
    %593 = vector.load %arg8[%c0_239, %c0_240] : memref<64x33xf32, #tpu.memory_space<vmem>>, vector<64x33xf32>
    %cst_241 = arith.constant dense<0.000000e+00> : vector<8x33xf32>
    %594 = tpu.matmul %590, %593, %cst_241 {dimension_numbers = #tpu.dot_dimension_numbers<[1], [0], [0], [1], [0, 0, 1, 1], [], []>} : vector<8x64xf32>, vector<64x33xf32>, vector<8x33xf32> -> vector<8x33xf32>
    %595 = arith.addf %592, %594 : vector<8x33xf32>
    %596 = vector.extract_strided_slice %595 {offsets = [0, 0], sizes = [8, 32], strides = [1, 1]} : vector<8x33xf32> to vector<8x32xf32>
    %597 = math.tanh %596 : vector<8x32xf32>
    %598 = vector.extract_strided_slice %595 {offsets = [0, 32], sizes = [8, 1], strides = [1, 1]} : vector<8x33xf32> to vector<8x1xf32>
    %599 = arith.maximumf %566, %598 : vector<8x1xf32>
    %600 = arith.subf %566, %599 : vector<8x1xf32>
    %601 = math.exp %600 : vector<8x1xf32>
    %602 = arith.subf %598, %599 : vector<8x1xf32>
    %603 = math.exp %602 : vector<8x1xf32>
    %604 = arith.mulf %572, %601 : vector<8x1xf32>
    %605 = arith.addf %604, %603 : vector<8x1xf32>
    %606 = vector.broadcast %601 : vector<8x1xf32> to vector<8x32xf32>
    %607 = arith.mulf %581, %606 : vector<8x32xf32>
    %608 = vector.broadcast %603 : vector<8x1xf32> to vector<8x32xf32>
    %609 = arith.mulf %608, %597 : vector<8x32xf32>
    %610 = arith.index_cast %c7_i32_230 : i32 to index
    %c0_242 = arith.constant 0 : index
    %c0_243 = arith.constant 0 : index
    %611 = vector.load %arg3[%610, %c0_242, %c0_243] : memref<8x8x32xf32, #tpu.memory_space<vmem>>, vector<1x8x32xf32>
    %612 = vector.shape_cast %611 : vector<1x8x32xf32> to vector<8x32xf32>
    %613 = arith.mulf %609, %612 : vector<8x32xf32>
    %614 = arith.addf %607, %613 : vector<8x32xf32>
    %c8_i32_244 = arith.constant 8 : i32
    %615 = tpu.reciprocal %605 : vector<8x1xf32> -> vector<8x1xf32>
    %616 = vector.broadcast %615 : vector<8x1xf32> to vector<8x32xf32>
    %617 = arith.mulf %614, %616 : vector<8x32xf32>
    %c0_245 = arith.constant 0 : index
    %c0_246 = arith.constant 0 : index
    %618 = vector.load %arg9[%c0_245, %c0_246] : memref<32x4xf32, #tpu.memory_space<vmem>>, vector<32x4xf32>
    %cst_247 = arith.constant dense<0.000000e+00> : vector<8x4xf32>
    %619 = tpu.matmul %617, %618, %cst_247 {dimension_numbers = #tpu.dot_dimension_numbers<[1], [0], [0], [1], [0, 0, 1, 1], [], []>} : vector<8x32xf32>, vector<32x4xf32>, vector<8x4xf32> -> vector<8x4xf32>
    %c0_248 = arith.constant 0 : index
    %c0_249 = arith.constant 0 : index
    %620 = vector.load %arg10[%c0_248, %c0_249] : memref<8x4xf32, #tpu.memory_space<vmem>>, vector<8x4xf32>
    tpu.vector_store %arg10[%c0_248, %c0_249], %619 {strides = array<i32>} : memref<8x4xf32, #tpu.memory_space<vmem>>, vector<8x4xf32>,
    return
  }
  func.func @transform_0(%arg0: i32) -> (i32, i32, i32) {
    %c0_i32 = arith.constant 0 : i32
    %c0_i32_0 = arith.constant 0 : i32
    %c0_i32_1 = arith.constant 0 : i32
    %c0_i32_2 = arith.constant 0 : i32
    return %c0_i32, %c0_i32_0, %c0_i32_1 : i32, i32, i32
  }
  func.func @transform_1(%arg0: i32) -> (i32, i32, i32) {
    %c0_i32 = arith.constant 0 : i32
    %c0_i32_0 = arith.constant 0 : i32
    %c0_i32_1 = arith.constant 0 : i32
    %c0_i32_2 = arith.constant 0 : i32
    return %c0_i32, %c0_i32_0, %c0_i32_1 : i32, i32, i32
  }
  func.func @transform_2(%arg0: i32) -> (i32, i32, i32) {
    %c0_i32 = arith.constant 0 : i32
    %c0_i32_0 = arith.constant 0 : i32
    %c0_i32_1 = arith.constant 0 : i32
    %c0_i32_2 = arith.constant 0 : i32
    return %c0_i32, %c0_i32_0, %c0_i32_1 : i32, i32, i32
  }
  func.func @transform_3(%arg0: i32) -> (i32, i32) {
    %c0_i32 = arith.constant 0 : i32
    %c0_i32_0 = arith.constant 0 : i32
    %c0_i32_1 = arith.constant 0 : i32
    return %c0_i32, %c0_i32_0 : i32, i32
  }
  func.func @transform_4(%arg0: i32) -> (i32, i32) {
    %c0_i32 = arith.constant 0 : i32
    %c0_i32_0 = arith.constant 0 : i32
    %c0_i32_1 = arith.constant 0 : i32
    return %c0_i32, %c0_i32_0 : i32, i32
  }
  func.func @transform_5(%arg0: i32) -> (i32, i32) {
    %c0_i32 = arith.constant 0 : i32
    %c0_i32_0 = arith.constant 0 : i32
    %c0_i32_1 = arith.constant 0 : i32
    return %c0_i32, %c0_i32_0 : i32, i32
  }
  func.func @transform_6(%arg0: i32) -> (i32, i32) {
    %c0_i32 = arith.constant 0 : i32
    %c0_i32_0 = arith.constant 0 : i32
    %c0_i32_1 = arith.constant 0 : i32
    return %c0_i32, %c0_i32_0 : i32, i32
  }
  func.func @transform_7(%arg0: i32) -> (i32, i32) {
    %c0_i32 = arith.constant 0 : i32
    %c0_i32_0 = arith.constant 0 : i32
    %c0_i32_1 = arith.constant 0 : i32
    return %c0_i32, %c0_i32_0 : i32, i32
  }
  func.func @transform_8(%arg0: i32) -> (i32, i32) {
    %c0_i32 = arith.constant 0 : i32
    %c0_i32_0 = arith.constant 0 : i32
    %c0_i32_1 = arith.constant 0 : i32
    return %c0_i32, %c0_i32_0 : i32, i32
  }
  func.func @transform_9(%arg0: i32) -> (i32, i32) {
    %c0_i32 = arith.constant 0 : i32
    %c0_i32_0 = arith.constant 0 : i32
    %c0_i32_1 = arith.constant 0 : i32
    return %c0_i32, %c0_i32_0 : i32, i32
  }
}

</mosaic_0001>

<bundles_post_ra>
// kernel: retain_forward.2
= control target key start
LH: loop header
LB: loop body
LE: loop exit
PB: predicated region body
PF: predicated region fallthrough
CT: control target
= control target key end

     0   :  { %vm949_vm0 = vcmask 261120   ;;  %s2920_s1 = inlined_call_operand.vmem [shape: f32[1408,32], index: 1, kind: input, shape index: {}]   ;;  %s2921_s0 = inlined_call_operand.vmem [shape: f32[64,1408], index: 0, kind: input, shape index: {}]   ;;  %s2922_s2 = inlined_call_operand.vmem [shape: f32[32,512], index: 2, kind: input, shape index: {}]   ;;  %s2923_s4 = inlined_call_operand.vmem [shape: f32[64,544], index: 4, kind: output, shape index: {}]   ;;  %s2924_s3 = inlined_call_operand.vmem [shape: f32[1,512], index: 3, kind: input, shape index: {}]  }
   0x1   :  { %v121_v0 = vld [vmem:[%s2920_s1 + $0x80] sm:$0xff]  ;;  %v122_v1 = vld [vmem:[%s2920_s1 + $0x88] sm:$0xff]  ;;  %v123_v11 = vld [vmem:[%s2920_s1 + $0x90] sm:$0xff] }
   0x2   :  { %v153_v2 = vld [vmem:[%s2920_s1 + $0x180] sm:$0xff]  ;;  %v1608_v3 = vpack.c.bf16 %v122_v1, %v121_v0  ;;  %v154_v4 = vld [vmem:[%s2920_s1 + $0x188] sm:$0xff]  ;;  %v124_v13 = vld [vmem:[%s2920_s1 + $0x98] sm:$0xff] }
   0x3   :  { %v105_v5 = vld [vmem:[%s2920_s1] sm:$0xff]  ;;  %v106_v6 = vld [vmem:[%s2920_s1 + $0x8] sm:$0xff]  ;;  %v1640_v7 = vpack.c.bf16 %v154_v4, %v153_v2  ;;  %v155_v14 = vld [vmem:[%s2920_s1 + $0x190] sm:$0xff]  ;;  %v1612_v16 = vpack.c.bf16 %v124_v13, %v123_v11 }
   0x4   :  { %v1610_v8 = vpack.c.bf16 %v106_v6, %v105_v5  ;;  %v137_v9 = vld [vmem:[%s2920_s1 + $0x100] sm:$0xff]  ;;  %v138_v10 = vld [vmem:[%s2920_s1 + $0x108] sm:$0xff]  ;;  %1609 = vmatprep.subr.bf16.mxu0 %v1608_v3  ;;  %v156_v15 = vld [vmem:[%s2920_s1 + $0x198] sm:$0xff] }
   0x5   :  { %v1642_v12 = vpack.c.bf16 %v138_v10, %v137_v9  ;;  %1641 = vmatprep.subr.bf16.mxu1 %v1640_v7  ;;  %v1644_v17 = vpack.c.bf16 %v156_v15, %v155_v14  ;;  %v107_v18 = vld [vmem:[%s2920_s1 + $0x10] sm:$0xff]  ;;  %v108_v19 = vld [vmem:[%s2920_s1 + $0x18] sm:$0xff]  ;;  %v125_v23 = vld [vmem:[%s2920_s1 + $0xa0] sm:$0xff] }
   0x6   :  { %1611 = vmatpush3.bf16.msra.mxu0 %v1610_v8  ;;  %v139_v20 = vld [vmem:[%s2920_s1 + $0x110] sm:$0xff]  ;;  %v1614_v21 = vpack.c.bf16 %v108_v19, %v107_v18  ;;  %v140_v22 = vld [vmem:[%s2920_s1 + $0x118] sm:$0xff]  ;;  %v126_v24 = vld [vmem:[%s2920_s1 + $0xa8] sm:$0xff] }
   0x7   :  { %1643 = vmatpush3.bf16.msra.mxu1 %v1642_v12  ;;  %1613 = vmatprep.subr.bf16.mxu0 %v1612_v16  ;;  %v1646_v25 = vpack.c.bf16 %v140_v22, %v139_v20  ;;  %v1616_v26 = vpack.c.bf16 %v126_v24, %v125_v23  ;;  %v157_v27 = vld [vmem:[%s2920_s1 + $0x1a0] sm:$0xff]  ;;  %v158_v28 = vld [vmem:[%s2920_s1 + $0x1a8] sm:$0xff]  ;;  %v127_v35 = vld [vmem:[%s2920_s1 + $0xb0] sm:$0xff] }
   0x8   :  { %1645 = vmatprep.subr.bf16.mxu1 %v1644_v17  ;;  %v109_v29 = vld [vmem:[%s2920_s1 + $0x20] sm:$0xff]  ;;  %v1648_v30 = vpack.c.bf16 %v158_v28, %v157_v27  ;;  %v110_v31 = vld [vmem:[%s2920_s1 + $0x28] sm:$0xff]  ;;  %v128_v36 = vld [vmem:[%s2920_s1 + $0xb8] sm:$0xff] }
   0x9   :  { %v141_v32 = vld [vmem:[%s2920_s1 + $0x120] sm:$0xff]  ;;  %v142_v33 = vld [vmem:[%s2920_s1 + $0x128] sm:$0xff]  ;;  %v1618_v34 = vpack.c.bf16 %v110_v31, %v109_v29  ;;  %v159_v37 = vld [vmem:[%s2920_s1 + $0x1b0] sm:$0xff]  ;;  %v1620_v39 = vpack.c.bf16 %v128_v36, %v127_v35 }
   0xa   :  { %1615 = vmatpush3.bf16.msra.mxu0 %v1614_v21  ;;  %v1650_v38 = vpack.c.bf16 %v142_v33, %v141_v32  ;;  %v160_v40 = vld [vmem:[%s2920_s1 + $0x1b8] sm:$0xff]  ;;  %v111_v41 = vld [vmem:[%s2920_s1 + $0x30] sm:$0xff]  ;;  %v129_v46 = vld [vmem:[%s2920_s1 + $0xc0] sm:$0xff] }
   0xb   :  { %1647 = vmatpush3.bf16.msra.mxu1 %v1646_v25  ;;  %1617 = vmatprep.subr.bf16.mxu0 %v1616_v26  ;;  %v112_v42 = vld [vmem:[%s2920_s1 + $0x38] sm:$0xff]  ;;  %v1652_v43 = vpack.c.bf16 %v160_v40, %v159_v37  ;;  %v143_v44 = vld [vmem:[%s2920_s1 + $0x130] sm:$0xff]  ;;  %v130_v47 = vld [vmem:[%s2920_s1 + $0xc8] sm:$0xff] }
   0xc   :  { %1649 = vmatprep.subr.bf16.mxu1 %v1648_v30  ;;  %v144_v45 = vld [vmem:[%s2920_s1 + $0x138] sm:$0xff]  ;;  %v161_v48 = vld [vmem:[%s2920_s1 + $0x1c0] sm:$0xff]  ;;  %v162_v49 = vld [vmem:[%s2920_s1 + $0x1c8] sm:$0xff]  ;;  %v1622_v50 = vpack.c.bf16 %v112_v42, %v111_v41  ;;  %v1624_v52 = vpack.c.bf16 %v130_v47, %v129_v46 }
   0xd   :  { %v1654_v51 = vpack.c.bf16 %v144_v45, %v143_v44  ;;  %v113_v53 = vld [vmem:[%s2920_s1 + $0x40] sm:$0xff]  ;;  %v114_v54 = vld [vmem:[%s2920_s1 + $0x48] sm:$0xff]  ;;  %v1656_v56 = vpack.c.bf16 %v162_v49, %v161_v48  ;;  %v131_v58 = vld [vmem:[%s2920_s1 + $0xd0] sm:$0xff] }
   0xe   :  { %1619 = vmatpush3.bf16.msra.mxu0 %v1618_v34  ;;  %v145_v55 = vld [vmem:[%s2920_s1 + $0x140] sm:$0xff]  ;;  %v146_v57 = vld [vmem:[%s2920_s1 + $0x148] sm:$0xff]  ;;  %v132_v59 = vld [vmem:[%s2920_s1 + $0xd8] sm:$0xff]  ;;  %v1626_v62 = vpack.c.bf16 %v114_v54, %v113_v53 }
   0xf   :  { %1651 = vmatpush3.bf16.msra.mxu1 %v1650_v38  ;;  %1621 = vmatprep.subr.bf16.mxu0 %v1620_v39  ;;  %v163_v60 = vld [vmem:[%s2920_s1 + $0x1d0] sm:$0xff]  ;;  %v164_v61 = vld [vmem:[%s2920_s1 + $0x1d8] sm:$0xff]  ;;  %v1658_v63 = vpack.c.bf16 %v146_v57, %v145_v55  ;;  %v1628_v0 = vpack.c.bf16 %v132_v59, %v131_v58  ;;  %v133_v6 = vld [vmem:[%s2920_s1 + $0xe0] sm:$0xff] }
  0x10   :  { %1653 = vmatprep.subr.bf16.mxu1 %v1652_v43  ;;  %v115_v1 = vld [vmem:[%s2920_s1 + $0x50] sm:$0xff]  ;;  %v116_v2 = vld [vmem:[%s2920_s1 + $0x58] sm:$0xff]  ;;  %v1660_v4 = vpack.c.bf16 %v164_v61, %v163_v60  ;;  %v134_v7 = vld [vmem:[%s2920_s1 + $0xe8] sm:$0xff] }
  0x11   :  { %v147_v3 = vld [vmem:[%s2920_s1 + $0x150] sm:$0xff]  ;;  %v148_v5 = vld [vmem:[%s2920_s1 + $0x158] sm:$0xff]  ;;  %v165_v8 = vld [vmem:[%s2920_s1 + $0x1e0] sm:$0xff]  ;;  %v1630_v10 = vpack.c.bf16 %v116_v2, %v115_v1  ;;  %v1632_v14 = vpack.c.bf16 %v134_v7, %v133_v6 }
  0x12   :  { %1623 = vmatpush3.bf16.msra.mxu0 %v1622_v50  ;;  %v166_v9 = vld [vmem:[%s2920_s1 + $0x1e8] sm:$0xff]  ;;  %v117_v11 = vld [vmem:[%s2920_s1 + $0x60] sm:$0xff]  ;;  %v1662_v13 = vpack.c.bf16 %v148_v5, %v147_v3  ;;  %v20_v17 = vld [vmem:[%s2921_s0 + $0x18] sm:$0xff] }
  0x13   :  { %1655 = vmatpush3.bf16.msra.mxu1 %v1654_v51  ;;  %1625 = vmatprep.subr.bf16.mxu0 %v1624_v52  ;;  %v118_v12 = vld [vmem:[%s2920_s1 + $0x68] sm:$0xff]  ;;  %v149_v15 = vld [vmem:[%s2920_s1 + $0x160] sm:$0xff]  ;;  %v1664_v18 = vpack.c.bf16 %v166_v9, %v165_v8  ;;  %v135_v20 = vld [vmem:[%s2920_s1 + $0xf0] sm:$0xff] }
  0x14   :  { %1657 = vmatprep.subr.bf16.mxu1 %v1656_v56  ;;  %v18_v16 = vld [vmem:[%s2921_s0 + $0x8] sm:$0xff]  ;;  %v136_v21 = vld [vmem:[%s2920_s1 + $0xf8] sm:$0xff]  ;;  %v167_v22 = vld [vmem:[%s2920_s1 + $0x1f0] sm:$0xff]  ;;  %450 = vmatprep.mubr.f32.mxu1 %v20_v17  ;;  %v1634_v24 = vpack.c.bf16 %v118_v12, %v117_v11 }
  0x15   :  { %v150_v19 = vld [vmem:[%s2920_s1 + $0x168] sm:$0xff]  ;;  %345 = vmatprep.mubr.f32.mxu0 %v18_v16  ;;  %v168_v23 = vld [vmem:[%s2920_s1 + $0x1f8] sm:$0xff]  ;;  %v1636_v26 = vpack.c.bf16 %v136_v21, %v135_v20  ;;  %v119_v27 = vld [vmem:[%s2920_s1 + $0x70] sm:$0xff] }
  0x16   :  { %1627 = vmatpush3.bf16.msra.mxu0 %v1626_v62  ;;  %v1666_v25 = vpack.c.bf16 %v150_v19, %v149_v15  ;;  %v120_v28 = vld [vmem:[%s2920_s1 + $0x78] sm:$0xff]  ;;  %v151_v29 = vld [vmem:[%s2920_s1 + $0x170] sm:$0xff]  ;;  %v1668_v30 = vpack.c.bf16 %v168_v23, %v167_v22  ;;  %v185_v32 = vld [vmem:[%s2920_s1 + $0x280] sm:$0xff] }
  0x17   :  { %1659 = vmatpush3.bf16.msra.mxu1 %v1658_v63  ;;  %1629 = vmatprep.subr.bf16.mxu0 %v1628_v0  ;;  %v152_v31 = vld [vmem:[%s2920_s1 + $0x178] sm:$0xff]  ;;  %v186_v33 = vld [vmem:[%s2920_s1 + $0x288] sm:$0xff]  ;;  %v217_v34 = vld [vmem:[%s2920_s1 + $0x380] sm:$0xff]  ;;  %v1638_v36 = vpack.c.bf16 %v120_v28, %v119_v27 }
  0x18   :  { %1661 = vmatprep.subr.bf16.mxu1 %v1660_v4  ;;  %v218_v35 = vld [vmem:[%s2920_s1 + $0x388] sm:$0xff]  ;;  %v1670_v37 = vpack.c.bf16 %v152_v31, %v151_v29  ;;  %v1672_v38 = vpack.c.bf16 %v186_v33, %v185_v32  ;;  %v169_v39 = vld [vmem:[%s2920_s1 + $0x200] sm:$0xff]  ;;  %v187_v45 = vld [vmem:[%s2920_s1 + $0x290] sm:$0xff] }
  0x19   :  { %v170_v40 = vld [vmem:[%s2920_s1 + $0x208] sm:$0xff]  ;;  %v17_v41 = vld [vmem:[%s2921_s0] sm:$0xff]  ;;  %v1704_v42 = vpack.c.bf16 %v218_v35, %v217_v34  ;;  %v188_v46 = vld [vmem:[%s2920_s1 + $0x298] sm:$0xff] }
  0x1a   :  { %1631 = vmatpush3.bf16.msra.mxu0 %v1630_v10  ;;  %v201_v43 = vld [vmem:[%s2920_s1 + $0x300] sm:$0xff]  ;;  %v202_v44 = vld [vmem:[%s2920_s1 + $0x308] sm:$0xff]  ;;  %v19_v47 = vld [vmem:[%s2921_s0 + $0x10] sm:$0xff]  ;;  %v1674_v48 = vpack.c.bf16 %v170_v40, %v169_v39  ;;  %v1676_v57 = vpack.c.bf16 %v188_v46, %v187_v45 }
  0x1b   :  { %1663 = vmatpush3.bf16.msra.mxu1 %v1662_v13  ;;  %1633 = vmatprep.subr.bf16.mxu0 %v1632_v14  ;;  %v219_v49 = vld [vmem:[%s2920_s1 + $0x390] sm:$0xff]  ;;  %v220_v50 = vld [vmem:[%s2920_s1 + $0x398] sm:$0xff]  ;;  %v29_v51 = vld [vmem:[%s2921_s0 + $0x60] sm:$0xff]  ;;  %v1706_v55 = vpack.c.bf16 %v202_v44, %v201_v43 }
  0x1c   :  { %1665 = vmatprep.subr.bf16.mxu1 %v1664_v18  ;;  %v171_v52 = vld [vmem:[%s2920_s1 + $0x210] sm:$0xff]  ;;  %v172_v53 = vld [vmem:[%s2920_s1 + $0x218] sm:$0xff]  ;;  %v1708_v59 = vpack.c.bf16 %v220_v50, %v219_v49  ;;  %v189_v61 = vld [vmem:[%s2920_s1 + $0x2a0] sm:$0xff] }
  0x1d   :  { %v31_v54 = vld [vmem:[%s2921_s0 + $0x70] sm:$0xff]  ;;  %v28_v56 = vld [vmem:[%s2921_s0 + $0x58] sm:$0xff]  ;;  %v190_v62 = vld [vmem:[%s2920_s1 + $0x2a8] sm:$0xff]  ;;  %v1678_v0 = vpack.c.bf16 %v172_v53, %v171_v52 }
  0x1e   :  { %1635 = vmatpush3.bf16.msra.mxu0 %v1634_v24  ;;  %v203_v58 = vld [vmem:[%s2920_s1 + $0x310] sm:$0xff]  ;;  %v204_v60 = vld [vmem:[%s2920_s1 + $0x318] sm:$0xff]  ;;  %v30_v63 = vld [vmem:[%s2921_s0 + $0x68] sm:$0xff]  ;;  %v1680_v9 = vpack.c.bf16 %v190_v62, %v189_v61 }
  0x1f   :  { %1667 = vmatpush3.bf16.msra.mxu1 %v1666_v25  ;;  %1637 = vmatprep.subr.bf16.mxu0 %v1636_v26  ;;  %v221_v1 = vld [vmem:[%s2920_s1 + $0x3a0] sm:$0xff]  ;;  %v222_v2 = vld [vmem:[%s2920_s1 + $0x3a8] sm:$0xff]  ;;  %v40_v3 = vld [vmem:[%s2921_s0 + $0xb8] sm:$0xff]  ;;  %v1710_v7 = vpack.c.bf16 %v204_v60, %v203_v58 }
  0x20   :  { %1669 = vmatprep.subr.bf16.mxu1 %v1668_v30  ;;  %v173_v4 = vld [vmem:[%s2920_s1 + $0x220] sm:$0xff]  ;;  %v174_v5 = vld [vmem:[%s2920_s1 + $0x228] sm:$0xff]  ;;  %v39_v8 = vld [vmem:[%s2921_s0 + $0xb0] sm:$0xff]  ;;  %v1712_v11 = vpack.c.bf16 %v222_v2, %v221_v1 }
  0x21   :  { %v42_v6 = vld [vmem:[%s2921_s0 + $0xc8] sm:$0xff]  ;;  %v205_v10 = vld [vmem:[%s2920_s1 + $0x320] sm:$0xff]  ;;  %v191_v13 = vld [vmem:[%s2920_s1 + $0x2b0] sm:$0xff]  ;;  %v1682_v16 = vpack.c.bf16 %v174_v5, %v173_v4 }
  0x22   :  { %1639 = vmatpush3.bf16.msra.mxu0 %v1638_v36  ;;  %v206_v12 = vld [vmem:[%s2920_s1 + $0x328] sm:$0xff]  ;;  %v192_v14 = vld [vmem:[%s2920_s1 + $0x2b8] sm:$0xff]  ;;  %v41_v15 = vld [vmem:[%s2921_s0 + $0xc0] sm:$0xff] }
  0x23   :  { %1671 = vmatpush3.bf16.msra.mxu1 %v1670_v37  ;;  %1673 = vmatprep.subr.bf16.mxu0 %v1672_v38  ;;  %v223_v17 = vld [vmem:[%s2920_s1 + $0x3b0] sm:$0xff]  ;;  %v224_v18 = vld [vmem:[%s2920_s1 + $0x3b8] sm:$0xff]  ;;  %v53_v22 = vld [vmem:[%s2921_s0 + $0x120] sm:$0xff]  ;;  %v1714_v23 = vpack.c.bf16 %v206_v12, %v205_v10  ;;  %v1684_v25 = vpack.c.bf16 %v192_v14, %v191_v13 }
  0x24   :  { %1705 = vmatprep.subr.bf16.mxu1 %v1704_v42  ;;  %v51_v19 = vld [vmem:[%s2921_s0 + $0x110] sm:$0xff]  ;;  %v176_v21 = vld [vmem:[%s2920_s1 + $0x238] sm:$0xff]  ;;  %v50_v24 = vld [vmem:[%s2921_s0 + $0x108] sm:$0xff]  ;;  %v1716_v27 = vpack.c.bf16 %v224_v18, %v223_v17 }
  0x25   :  { %346 = vmatmul.mubr.f32.vlgmr.msra.gmra.mrb[0].mxu0 %v17_v41  ;;  %v175_v20 = vld [vmem:[%s2920_s1 + $0x230] sm:$0xff]  ;;  %v208_v28 = vld [vmem:[%s2920_s1 + $0x338] sm:$0xff]  ;;  %v193_v29 = vld [vmem:[%s2920_s1 + $0x2c0] sm:$0xff] }
  0x26   :  { %451 = vmatmul.mubr.f32.vlgmr.msra.gmra.mrb[0].mxu1 %v19_v47  ;;  %1675 = vmatpush3.bf16.msra.mxu0 %v1674_v48  ;;  %v207_v26 = vld [vmem:[%s2920_s1 + $0x330] sm:$0xff]  ;;  %v194_v30 = vld [vmem:[%s2920_s1 + $0x2c8] sm:$0xff]  ;;  %v52_v31 = vld [vmem:[%s2921_s0 + $0x118] sm:$0xff]  ;;  %v1686_v32 = vpack.c.bf16 %v176_v21, %v175_v20 }
  0x27   :  { %350 = vmatprep.mubr.f32.mxu0 %v29_v51  ;;  %455 = vmatprep.mubr.f32.mxu1 %v31_v54  ;;  %v225_v33 = vld [vmem:[%s2920_s1 + $0x3c0] sm:$0xff]  ;;  %v226_v34 = vld [vmem:[%s2920_s1 + $0x3c8] sm:$0xff]  ;;  %v64_v38 = vld [vmem:[%s2921_s0 + $0x178] sm:$0xff]  ;;  %v1718_v39 = vpack.c.bf16 %v208_v28, %v207_v26  ;;  %v1688_v41 = vpack.c.bf16 %v194_v30, %v193_v29 }
  0x28   :  { %1707 = vmatpush3.bf16.msra.mxu1 %v1706_v55  ;;  %1677 = vmatprep.subr.bf16.mxu0 %v1676_v57  ;;  %v62_v35 = vld [vmem:[%s2921_s0 + $0x168] sm:$0xff]  ;;  %v177_v36 = vld [vmem:[%s2920_s1 + $0x240] sm:$0xff]  ;;  %v1720_v43 = vpack.c.bf16 %v226_v34, %v225_v33  ;;  %v195_v45 = vld [vmem:[%s2920_s1 + $0x2d0] sm:$0xff] }
  0x29   :  { %351 = vmatmul.mubr.f32.gmra.mrb[2].mxu0 %v28_v56  ;;  %1709 = vmatprep.subr.bf16.mxu1 %v1708_v59  ;;  %v178_v37 = vld [vmem:[%s2920_s1 + $0x248] sm:$0xff]  ;;  %v61_v40 = vld [vmem:[%s2921_s0 + $0x160] sm:$0xff]  ;;  %v196_v46 = vld [vmem:[%s2920_s1 + $0x2d8] sm:$0xff] }
  0x2a   :  { %456 = vmatmul.mubr.f32.gmra.mrb[2].mxu1 %v30_v63  ;;  %1679 = vmatpush3.bf16.msra.mxu0 %v1678_v0  ;;  %v209_v42 = vld [vmem:[%s2920_s1 + $0x340] sm:$0xff]  ;;  %v210_v44 = vld [vmem:[%s2920_s1 + $0x348] sm:$0xff]  ;;  %v63_v47 = vld [vmem:[%s2921_s0 + $0x170] sm:$0xff]  ;;  %v1690_v48 = vpack.c.bf16 %v178_v37, %v177_v36  ;;  %v1692_v57 = vpack.c.bf16 %v196_v46, %v195_v45 }
  0x2b   :  { %355 = vmatprep.mubr.f32.mxu0 %v40_v3  ;;  %460 = vmatprep.mubr.f32.mxu1 %v42_v6  ;;  %v227_v49 = vld [vmem:[%s2920_s1 + $0x3d0] sm:$0xff]  ;;  %v228_v50 = vld [vmem:[%s2920_s1 + $0x3d8] sm:$0xff]  ;;  %v73_v51 = vld [vmem:[%s2921_s0 + $0x1c0] sm:$0xff]  ;;  %v1722_v55 = vpack.c.bf16 %v210_v44, %v209_v42 }
  0x2c   :  { %1711 = vmatpush3.bf16.msra.mxu1 %v1710_v7  ;;  %1681 = vmatprep.subr.bf16.mxu0 %v1680_v9  ;;  %v179_v52 = vld [vmem:[%s2920_s1 + $0x250] sm:$0xff]  ;;  %v180_v53 = vld [vmem:[%s2920_s1 + $0x258] sm:$0xff]  ;;  %v1724_v59 = vpack.c.bf16 %v228_v50, %v227_v49  ;;  %v197_v61 = vld [vmem:[%s2920_s1 + $0x2e0] sm:$0xff] }
  0x2d   :  { %356 = vmatmul.mubr.f32.gmra.mrb[4].mxu0 %v39_v8  ;;  %1713 = vmatprep.subr.bf16.mxu1 %v1712_v11  ;;  %v75_v54 = vld [vmem:[%s2921_s0 + $0x1d0] sm:$0xff]  ;;  %v72_v56 = vld [vmem:[%s2921_s0 + $0x1b8] sm:$0xff]  ;;  %v198_v62 = vld [vmem:[%s2920_s1 + $0x2e8] sm:$0xff]  ;;  %v1694_v0 = vpack.c.bf16 %v180_v53, %v179_v52 }
  0x2e   :  { %461 = vmatmul.mubr.f32.gmra.mrb[4].mxu1 %v41_v15  ;;  %1683 = vmatpush3.bf16.msra.mxu0 %v1682_v16  ;;  %v211_v58 = vld [vmem:[%s2920_s1 + $0x350] sm:$0xff]  ;;  %v212_v60 = vld [vmem:[%s2920_s1 + $0x358] sm:$0xff]  ;;  %v74_v63 = vld [vmem:[%s2921_s0 + $0x1c8] sm:$0xff]  ;;  %v1696_v9 = vpack.c.bf16 %v198_v62, %v197_v61 }
  0x2f   :  { %360 = vmatprep.mubr.f32.mxu0 %v51_v19  ;;  %465 = vmatprep.mubr.f32.mxu1 %v53_v22  ;;  %v229_v1 = vld [vmem:[%s2920_s1 + $0x3e0] sm:$0xff]  ;;  %v230_v2 = vld [vmem:[%s2920_s1 + $0x3e8] sm:$0xff]  ;;  %v84_v3 = vld [vmem:[%s2921_s0 + $0x218] sm:$0xff]  ;;  %v1726_v7 = vpack.c.bf16 %v212_v60, %v211_v58 }
  0x30   :  { %1715 = vmatpush3.bf16.msra.mxu1 %v1714_v23  ;;  %1685 = vmatprep.subr.bf16.mxu0 %v1684_v25  ;;  %v181_v4 = vld [vmem:[%s2920_s1 + $0x260] sm:$0xff]  ;;  %v182_v5 = vld [vmem:[%s2920_s1 + $0x268] sm:$0xff]  ;;  %v83_v8 = vld [vmem:[%s2921_s0 + $0x210] sm:$0xff]  ;;  %v1728_v11 = vpack.c.bf16 %v230_v2, %v229_v1 }
  0x31   :  { %361 = vmatmul.mubr.f32.gmra.mrb[6].mxu0 %v50_v24  ;;  %1717 = vmatprep.subr.bf16.mxu1 %v1716_v27  ;;  %v86_v6 = vld [vmem:[%s2921_s0 + $0x228] sm:$0xff]  ;;  %v213_v10 = vld [vmem:[%s2920_s1 + $0x360] sm:$0xff]  ;;  %v199_v13 = vld [vmem:[%s2920_s1 + $0x2f0] sm:$0xff]  ;;  %v1698_v16 = vpack.c.bf16 %v182_v5, %v181_v4 }
  0x32   :  { %466 = vmatmul.mubr.f32.gmra.mrb[6].mxu1 %v52_v31  ;;  %1687 = vmatpush3.bf16.msra.mxu0 %v1686_v32  ;;  %v214_v12 = vld [vmem:[%s2920_s1 + $0x368] sm:$0xff]  ;;  %v200_v14 = vld [vmem:[%s2920_s1 + $0x2f8] sm:$0xff]  ;;  %v85_v15 = vld [vmem:[%s2921_s0 + $0x220] sm:$0xff] }
  0x33   :  { %365 = vmatprep.mubr.f32.mxu0 %v62_v35  ;;  %470 = vmatprep.mubr.f32.mxu1 %v64_v38  ;;  %v231_v17 = vld [vmem:[%s2920_s1 + $0x3f0] sm:$0xff]  ;;  %v232_v18 = vld [vmem:[%s2920_s1 + $0x3f8] sm:$0xff]  ;;  %v97_v22 = vld [vmem:[%s2921_s0 + $0x280] sm:$0xff]  ;;  %v1730_v23 = vpack.c.bf16 %v214_v12, %v213_v10  ;;  %v1700_v24 = vpack.c.bf16 %v200_v14, %v199_v13 }
  0x34   :  { %1719 = vmatpush3.bf16.msra.mxu1 %v1718_v39  ;;  %1689 = vmatprep.subr.bf16.mxu0 %v1688_v41  ;;  %v95_v19 = vld [vmem:[%s2921_s0 + $0x270] sm:$0xff]  ;;  %v184_v21 = vld [vmem:[%s2920_s1 + $0x278] sm:$0xff]  ;;  %v249_v25 = vld [vmem:[%s2920_s1 + $0x480] sm:$0xff]  ;;  %v1732_v27 = vpack.c.bf16 %v232_v18, %v231_v17 }
  0x35   :  { %366 = vmatmul.mubr.f32.gmra.mrb[8].mxu0 %v61_v40  ;;  %1721 = vmatprep.subr.bf16.mxu1 %v1720_v43  ;;  %v183_v20 = vld [vmem:[%s2920_s1 + $0x270] sm:$0xff]  ;;  %v250_v26 = vld [vmem:[%s2920_s1 + $0x488] sm:$0xff]  ;;  %v216_v29 = vld [vmem:[%s2920_s1 + $0x378] sm:$0xff] }
  0x36   :  { %471 = vmatmul.mubr.f32.gmra.mrb[8].mxu1 %v63_v47  ;;  %1691 = vmatpush3.bf16.msra.mxu0 %v1690_v48  ;;  %v215_v28 = vld [vmem:[%s2920_s1 + $0x370] sm:$0xff]  ;;  %v94_v30 = vld [vmem:[%s2921_s0 + $0x268] sm:$0xff]  ;;  %v1702_v31 = vpack.c.bf16 %v184_v21, %v183_v20  ;;  %v265_v32 = vld [vmem:[%s2920_s1 + $0x500] sm:$0xff]  ;;  %v1736_v35 = vpack.c.bf16 %v250_v26, %v249_v25 }
  0x37   :  { %370 = vmatprep.mubr.f32.mxu0 %v73_v51  ;;  %475 = vmatprep.mubr.f32.mxu1 %v75_v54  ;;  %v266_v33 = vld [vmem:[%s2920_s1 + $0x508] sm:$0xff]  ;;  %v96_v34 = vld [vmem:[%s2921_s0 + $0x278] sm:$0xff]  ;;  %v233_v36 = vld [vmem:[%s2920_s1 + $0x400] sm:$0xff]  ;;  %v1734_v39 = vpack.c.bf16 %v216_v29, %v215_v28 }
  0x38   :  { %1723 = vmatpush3.bf16.msra.mxu1 %v1722_v55  ;;  %1693 = vmatprep.subr.bf16.mxu0 %v1692_v57  ;;  %v234_v37 = vld [vmem:[%s2920_s1 + $0x408] sm:$0xff]  ;;  %v251_v40 = vld [vmem:[%s2920_s1 + $0x490] sm:$0xff]  ;;  %v252_v41 = vld [vmem:[%s2920_s1 + $0x498] sm:$0xff]  ;;  %v1768_v43 = vpack.c.bf16 %v266_v33, %v265_v32 }
  0x39   :  { %371 = vmatmul.mubr.f32.gmra.mrb[10].mxu0 %v72_v56  ;;  %1725 = vmatprep.subr.bf16.mxu1 %v1724_v59  ;;  %v22_v38 = vld [vmem:[%s2921_s0 + $0x28] sm:$0xff]  ;;  %v24_v42 = vld [vmem:[%s2921_s0 + $0x38] sm:$0xff]  ;;  %v21_v44 = vld [vmem:[%s2921_s0 + $0x20] sm:$0xff]  ;;  %v1738_v45 = vpack.c.bf16 %v234_v37, %v233_v36  ;;  %v1740_v49 = vpack.c.bf16 %v252_v41, %v251_v40 }
  0x3a   :  { %476 = vmatmul.mubr.f32.gmra.mrb[10].mxu1 %v74_v63  ;;  %1695 = vmatpush3.bf16.msra.mxu0 %v1694_v0  ;;  %v267_v46 = vld [vmem:[%s2920_s1 + $0x510] sm:$0xff]  ;;  %v268_v47 = vld [vmem:[%s2920_s1 + $0x518] sm:$0xff]  ;;  %v33_v48 = vld [vmem:[%s2921_s0 + $0x80] sm:$0xff] }
  0x3b   :  { %375 = vmatprep.mubr.f32.mxu0 %v84_v3  ;;  %480 = vmatprep.mubr.f32.mxu1 %v86_v6  ;;  %v235_v50 = vld [vmem:[%s2920_s1 + $0x410] sm:$0xff]  ;;  %v236_v51 = vld [vmem:[%s2920_s1 + $0x418] sm:$0xff]  ;;  %v253_v53 = vld [vmem:[%s2920_s1 + $0x4a0] sm:$0xff]  ;;  %v1772_v56 = vpack.c.bf16 %v268_v47, %v267_v46 }
  0x3c   :  { %1727 = vmatpush3.bf16.msra.mxu1 %v1726_v7  ;;  %1697 = vmatprep.subr.bf16.mxu0 %v1696_v9  ;;  %v23_v52 = vld [vmem:[%s2921_s0 + $0x30] sm:$0xff]  ;;  %v254_v54 = vld [vmem:[%s2920_s1 + $0x4a8] sm:$0xff]  ;;  %v32_v57 = vld [vmem:[%s2921_s0 + $0x78] sm:$0xff]  ;;  %v1742_v58 = vpack.c.bf16 %v236_v51, %v235_v50 }
  0x3d   :  { %376 = vmatmul.mubr.f32.gmra.mrb[12].mxu0 %v83_v8  ;;  %1729 = vmatprep.subr.bf16.mxu1 %v1728_v11  ;;  %v35_v55 = vld [vmem:[%s2921_s0 + $0x90] sm:$0xff]  ;;  %v269_v59 = vld [vmem:[%s2920_s1 + $0x520] sm:$0xff]  ;;  %v270_v60 = vld [vmem:[%s2920_s1 + $0x528] sm:$0xff]  ;;  %v1744_v62 = vpack.c.bf16 %v254_v54, %v253_v53 }
  0x3e   :  { %481 = vmatmul.mubr.f32.gmra.mrb[12].mxu1 %v85_v15  ;;  %1699 = vmatpush3.bf16.msra.mxu0 %v1698_v16  ;;  %v44_v61 = vld [vmem:[%s2921_s0 + $0xd8] sm:$0xff]  ;;  %v237_v63 = vld [vmem:[%s2920_s1 + $0x420] sm:$0xff]  ;;  %v238_v0 = vld [vmem:[%s2920_s1 + $0x428] sm:$0xff]  ;;  %v1776_v5 = vpack.c.bf16 %v270_v60, %v269_v59 }
  0x3f   :  { %380 = vmatprep.mubr.f32.mxu0 %v95_v19  ;;  %485 = vmatprep.mubr.f32.mxu1 %v97_v22  ;;  %v34_v1 = vld [vmem:[%s2921_s0 + $0x88] sm:$0xff]  ;;  %v255_v2 = vld [vmem:[%s2920_s1 + $0x4b0] sm:$0xff]  ;;  %v256_v3 = vld [vmem:[%s2920_s1 + $0x4b8] sm:$0xff]  ;;  %v1746_v7 = vpack.c.bf16 %v238_v0, %v237_v63 }
  0x40   :  { %1731 = vmatpush3.bf16.msra.mxu1 %v1730_v23  ;;  %1701 = vmatprep.subr.bf16.mxu0 %v1700_v24  ;;  %v46_v4 = vld [vmem:[%s2921_s0 + $0xe8] sm:$0xff]  ;;  %v43_v6 = vld [vmem:[%s2921_s0 + $0xd0] sm:$0xff]  ;;  %v272_v9 = vld [vmem:[%s2920_s1 + $0x538] sm:$0xff]  ;;  %v1748_v11 = vpack.c.bf16 %v256_v3, %v255_v2 }
  0x41   :  { %381 = vmatmul.mubr.f32.gmra.mrb[14].mxu0 %v94_v30  ;;  %1733 = vmatprep.subr.bf16.mxu1 %v1732_v27  ;;  %v271_v8 = vld [vmem:[%s2920_s1 + $0x530] sm:$0xff]  ;;  %v240_v13 = vld [vmem:[%s2920_s1 + $0x438] sm:$0xff]  ;;  %v45_v14 = vld [vmem:[%s2921_s0 + $0xe0] sm:$0xff] }
  0x42   :  { %486 = vmatmul.mubr.f32.gmra.mrb[14].mxu1 %v96_v34  ;;  %1703 = vmatpush3.bf16.msra.mxu0 %v1702_v31  ;;  %v55_v10 = vld [vmem:[%s2921_s0 + $0x130] sm:$0xff]  ;;  %v257_v15 = vld [vmem:[%s2920_s1 + $0x4c0] sm:$0xff]  ;;  %v258_v16 = vld [vmem:[%s2920_s1 + $0x4c8] sm:$0xff]  ;;  %v1780_v18 = vpack.c.bf16 %v272_v9, %v271_v8 }
  0x43   :  { %555 = vmatprep.mubr.f32.mxu0 %v22_v38  ;;  %1737 = vmatprep.subr.bf16.mxu0 %v1736_v35  ;;  %v239_v12 = vld [vmem:[%s2920_s1 + $0x430] sm:$0xff]  ;;  %v57_v17 = vld [vmem:[%s2921_s0 + $0x140] sm:$0xff]  ;;  %v54_v19 = vld [vmem:[%s2921_s0 + $0x128] sm:$0xff]  ;;  %v1752_v24 = vpack.c.bf16 %v258_v16, %v257_v15 }
  0x44   :  { %1735 = vmatpush3.bf16.msra.mxu1 %v1734_v39  ;;  %660 = vmatprep.mubr.f32.mxu1 %v24_v42  ;;  %v1750_v20 = vpack.c.bf16 %v240_v13, %v239_v12  ;;  %v273_v21 = vld [vmem:[%s2920_s1 + $0x540] sm:$0xff]  ;;  %v274_v22 = vld [vmem:[%s2920_s1 + $0x548] sm:$0xff]  ;;  %v56_v27 = vld [vmem:[%s2921_s0 + $0x138] sm:$0xff] }
  0x45   :  { %556 = vmatmul.mubr.f32.vlgmr.msra.gmra.mrb[16].mxu0 %v21_v44  ;;  %1769 = vmatprep.subr.bf16.mxu1 %v1768_v43  ;;  %v66_v23 = vld [vmem:[%s2921_s0 + $0x188] sm:$0xff]  ;;  %v241_v25 = vld [vmem:[%s2920_s1 + $0x440] sm:$0xff]  ;;  %v259_v28 = vld [vmem:[%s2920_s1 + $0x4d0] sm:$0xff]  ;;  %v1784_v31 = vpack.c.bf16 %v274_v22, %v273_v21 }
  0x46   :  { %1739 = vmatpush3.bf16.msra.mxu0 %v1738_v45  ;;  %560 = vmatprep.mubr.f32.mxu0 %v33_v48  ;;  %v242_v26 = vld [vmem:[%s2920_s1 + $0x448] sm:$0xff]  ;;  %v260_v29 = vld [vmem:[%s2920_s1 + $0x4d8] sm:$0xff]  ;;  %v65_v32 = vld [vmem:[%s2921_s0 + $0x180] sm:$0xff] }
  0x47   :  { %661 = vmatmul.mubr.f32.vlgmr.msra.gmra.mrb[16].mxu1 %v23_v52  ;;  %1741 = vmatprep.subr.bf16.mxu0 %v1740_v49  ;;  %v68_v30 = vld [vmem:[%s2921_s0 + $0x198] sm:$0xff]  ;;  %v1754_v33 = vpack.c.bf16 %v242_v26, %v241_v25  ;;  %v275_v34 = vld [vmem:[%s2920_s1 + $0x550] sm:$0xff]  ;;  %v77_v36 = vld [vmem:[%s2921_s0 + $0x1e0] sm:$0xff]  ;;  %v1756_v37 = vpack.c.bf16 %v260_v29, %v259_v28 }
  0x48   :  { %665 = vmatprep.mubr.f32.mxu1 %v35_v55  ;;  %1771 = vmatpush3.bf16.msra.mxu1 %v1768_v43  ;;  %v276_v35 = vld [vmem:[%s2920_s1 + $0x558] sm:$0xff]  ;;  %v243_v38 = vld [vmem:[%s2920_s1 + $0x450] sm:$0xff]  ;;  %v261_v41 = vld [vmem:[%s2920_s1 + $0x4e0] sm:$0xff] }
  0x49   :  { %561 = vmatmul.mubr.f32.gmra.mrb[18].mxu0 %v32_v57  ;;  %1773 = vmatprep.subr.bf16.mxu1 %v1772_v56  ;;  %v244_v39 = vld [vmem:[%s2920_s1 + $0x458] sm:$0xff]  ;;  %v67_v40 = vld [vmem:[%s2921_s0 + $0x190] sm:$0xff]  ;;  %v262_v42 = vld [vmem:[%s2920_s1 + $0x4e8] sm:$0xff]  ;;  %v1788_v44 = vpack.c.bf16 %v276_v35, %v275_v34 }
  0x4a   :  { %1743 = vmatpush3.bf16.msra.mxu0 %v1742_v58  ;;  %565 = vmatprep.mubr.f32.mxu0 %v44_v61  ;;  %v79_v43 = vld [vmem:[%s2921_s0 + $0x1f0] sm:$0xff]  ;;  %v76_v45 = vld [vmem:[%s2921_s0 + $0x1d8] sm:$0xff]  ;;  %v1758_v46 = vpack.c.bf16 %v244_v39, %v243_v38  ;;  %v277_v47 = vld [vmem:[%s2920_s1 + $0x560] sm:$0xff]  ;;  %v1760_v50 = vpack.c.bf16 %v262_v42, %v261_v41 }
  0x4b   :  { %666 = vmatmul.mubr.f32.gmra.mrb[18].mxu1 %v34_v1  ;;  %1745 = vmatprep.subr.bf16.mxu0 %v1744_v62  ;;  %v278_v48 = vld [vmem:[%s2920_s1 + $0x568] sm:$0xff]  ;;  %v88_v49 = vld [vmem:[%s2921_s0 + $0x238] sm:$0xff]  ;;  %v245_v51 = vld [vmem:[%s2920_s1 + $0x460] sm:$0xff] }
  0x4c   :  { %670 = vmatprep.mubr.f32.mxu1 %v46_v4  ;;  %1775 = vmatpush3.bf16.msra.mxu1 %v1772_v56  ;;  %v246_v52 = vld [vmem:[%s2920_s1 + $0x468] sm:$0xff]  ;;  %v263_v54 = vld [vmem:[%s2920_s1 + $0x4f0] sm:$0xff]  ;;  %v264_v55 = vld [vmem:[%s2920_s1 + $0x4f8] sm:$0xff]  ;;  %v1792_v57 = vpack.c.bf16 %v278_v48, %v277_v47 }
  0x4d   :  { %566 = vmatmul.mubr.f32.gmra.mrb[20].mxu0 %v43_v6  ;;  %1777 = vmatprep.subr.bf16.mxu1 %v1776_v5  ;;  %v78_v53 = vld [vmem:[%s2921_s0 + $0x1e8] sm:$0xff]  ;;  %v87_v58 = vld [vmem:[%s2921_s0 + $0x230] sm:$0xff]  ;;  %v1762_v59 = vpack.c.bf16 %v246_v52, %v245_v51  ;;  %v280_v61 = vld [vmem:[%s2920_s1 + $0x578] sm:$0xff]  ;;  %v1764_v63 = vpack.c.bf16 %v264_v55, %v263_v54 }
  0x4e   :  { %1747 = vmatpush3.bf16.msra.mxu0 %v1746_v7  ;;  %570 = vmatprep.mubr.f32.mxu0 %v55_v10  ;;  %v90_v56 = vld [vmem:[%s2921_s0 + $0x248] sm:$0xff]  ;;  %v279_v60 = vld [vmem:[%s2920_s1 + $0x570] sm:$0xff]  ;;  %v248_v1 = vld [vmem:[%s2920_s1 + $0x478] sm:$0xff] }
  0x4f   :  { %671 = vmatmul.mubr.f32.gmra.mrb[20].mxu1 %v45_v14  ;;  %1749 = vmatprep.subr.bf16.mxu0 %v1748_v11  ;;  %v99_v62 = vld [vmem:[%s2921_s0 + $0x290] sm:$0xff]  ;;  %v89_v2 = vld [vmem:[%s2921_s0 + $0x240] sm:$0xff]  ;;  %v1796_v4 = vpack.c.bf16 %v280_v61, %v279_v60  ;;  %v26_v7 = vld [vmem:[%s2921_s0 + $0x48] sm:$0xff] }
  0x50   :  { %675 = vmatprep.mubr.f32.mxu1 %v57_v17  ;;  %1779 = vmatpush3.bf16.msra.mxu1 %v1776_v5  ;;  %v247_v0 = vld [vmem:[%s2920_s1 + $0x470] sm:$0xff]  ;;  %v101_v3 = vld [vmem:[%s2921_s0 + $0x2a0] sm:$0xff]  ;;  %v98_v5 = vld [vmem:[%s2921_s0 + $0x288] sm:$0xff] }
  0x51   :  { %571 = vmatmul.mubr.f32.gmra.mrb[22].mxu0 %v54_v19  ;;  %1781 = vmatprep.subr.bf16.mxu1 %v1780_v18  ;;  %v1766_v6 = vpack.c.bf16 %v248_v1, %v247_v0  ;;  %v100_v8 = vld [vmem:[%s2921_s0 + $0x298] sm:$0xff]  ;;  %v27_v9 = vld [vmem:[%s2921_s0 + $0x50] sm:$0xff]  ;;  %v25_v10 = vld [vmem:[%s2921_s0 + $0x40] sm:$0xff] }
  0x52   :  { %1751 = vmatpush3.bf16.msra.mxu0 %v1750_v20  ;;  %575 = vmatprep.mubr.f32.mxu0 %v66_v23  ;;  %v37_v11 = vld [vmem:[%s2921_s0 + $0xa0] sm:$0xff]  ;;  %v38_v12 = vld [vmem:[%s2921_s0 + $0xa8] sm:$0xff]  ;;  %v36_v14 = vld [vmem:[%s2921_s0 + $0x98] sm:$0xff] }
  0x53   :  { %676 = vmatmul.mubr.f32.gmra.mrb[22].mxu1 %v56_v27  ;;  %1753 = vmatprep.subr.bf16.mxu0 %v1752_v24  ;;  %v49_v13 = vld [vmem:[%s2921_s0 + $0x100] sm:$0xff]  ;;  %v48_v15 = vld [vmem:[%s2921_s0 + $0xf8] sm:$0xff]  ;;  %v71_v17 = vld [vmem:[%s2921_s0 + $0x1b0] sm:$0xff] }
  0x54   :  { %680 = vmatprep.mubr.f32.mxu1 %v68_v30  ;;  %1783 = vmatpush3.bf16.msra.mxu1 %v1780_v18  ;;  %v60_v16 = vld [vmem:[%s2921_s0 + $0x158] sm:$0xff]  ;;  %v47_v18 = vld [vmem:[%s2921_s0 + $0xf0] sm:$0xff]  ;;  %v82_v20 = vld [vmem:[%s2921_s0 + $0x208] sm:$0xff] }
  0x55   :  { %576 = vmatmul.mubr.f32.gmra.mrb[24].mxu0 %v65_v32  ;;  %1785 = vmatprep.subr.bf16.mxu1 %v1784_v31  ;;  %v59_v19 = vld [vmem:[%s2921_s0 + $0x150] sm:$0xff]  ;;  %v93_v21 = vld [vmem:[%s2921_s0 + $0x260] sm:$0xff]  ;;  %v58_v22 = vld [vmem:[%s2921_s0 + $0x148] sm:$0xff] }
  0x56   :  { %1755 = vmatpush3.bf16.msra.mxu0 %v1754_v33  ;;  %580 = vmatprep.mubr.f32.mxu0 %v77_v36  ;;  %v70_v23 = vld [vmem:[%s2921_s0 + $0x1a8] sm:$0xff]  ;;  %v104_v24 = vld [vmem:[%s2921_s0 + $0x2b8] sm:$0xff]  ;;  %v69_v25 = vld [vmem:[%s2921_s0 + $0x1a0] sm:$0xff] }
  0x57   :  { %681 = vmatmul.mubr.f32.gmra.mrb[24].mxu1 %v67_v40  ;;  %1757 = vmatprep.subr.bf16.mxu0 %v1756_v37  ;;  %v81_v26 = vld [vmem:[%s2921_s0 + $0x200] sm:$0xff]  ;;  %v80_v27 = vld [vmem:[%s2921_s0 + $0x1f8] sm:$0xff]  ;;  %v91_v29 = vld [vmem:[%s2921_s0 + $0x250] sm:$0xff] }
  0x58   :  { %685 = vmatprep.mubr.f32.mxu1 %v79_v43  ;;  %1787 = vmatpush3.bf16.msra.mxu1 %v1784_v31  ;;  %v92_v28 = vld [vmem:[%s2921_s0 + $0x258] sm:$0xff]  ;;  %v103_v30 = vld [vmem:[%s2921_s0 + $0x2b0] sm:$0xff]  ;;  %v102_v31 = vld [vmem:[%s2921_s0 + $0x2a8] sm:$0xff] }
  0x59   :  { %581 = vmatmul.mubr.f32.gmra.mrb[26].mxu0 %v76_v45  ;;  %1789 = vmatprep.subr.bf16.mxu1 %v1788_v44  ;;  %v912_v32 = vld [vmem:[%s2922_s2 + $0x8] sm:$0xff]  ;;  %v914_v34 = vld [vmem:[%s2922_s2 + $0x18] sm:$0xff]  ;;  %v911_v37 = vld [vmem:[%s2922_s2] sm:$0xff] }
  0x5a   :  { %1759 = vmatpush3.bf16.msra.mxu0 %v1758_v46  ;;  %585 = vmatprep.mubr.f32.mxu0 %v88_v49  ;;  %v916_v33 = vld [vmem:[%s2922_s2 + $0x28] sm:$0xff]  ;;  %v918_v36 = vld [vmem:[%s2922_s2 + $0x38] sm:$0xff]  ;;  %v915_v38 = vld [vmem:[%s2922_s2 + $0x20] sm:$0xff] }
  0x5b   :  { %686 = vmatmul.mubr.f32.gmra.mrb[26].mxu1 %v78_v53  ;;  %1761 = vmatprep.subr.bf16.mxu0 %v1760_v50  ;;  %v1800_v35 = vpack.c.bf16 %v916_v33, %v912_v32  ;;  %v1808_v39 = vpack.c.bf16 %v918_v36, %v914_v34  ;;  %v1802_v40 = vpack.c.bf16 %v915_v38, %v911_v37  ;;  %v913_v41 = vld [vmem:[%s2922_s2 + $0x10] sm:$0xff]  ;;  %v924_v45 = vld [vmem:[%s2922_s2 + $0x68] sm:$0xff]  ;;  %v919_v46 = vld [vmem:[%s2922_s2 + $0x40] sm:$0xff] }
  0x5c   :  { %690 = vmatprep.mubr.f32.mxu1 %v90_v56  ;;  %1791 = vmatpush3.bf16.msra.mxu1 %v1788_v44  ;;  %v917_v42 = vld [vmem:[%s2922_s2 + $0x30] sm:$0xff]  ;;  %v920_v44 = vld [vmem:[%s2922_s2 + $0x48] sm:$0xff]  ;;  %v923_v48 = vld [vmem:[%s2922_s2 + $0x60] sm:$0xff]  ;;  %v1821_v56 = vmov 0.0  }
  0x5d   :  { %586 = vmatmul.mubr.f32.gmra.mrb[28].mxu0 %v87_v58  ;;  %1793 = vmatprep.subr.bf16.mxu1 %v1792_v57  ;;  %v2663_v43 = vpack.c.bf16 %v917_v42, %v913_v41  ;;  %v1804_v47 = vpack.c.bf16 %v924_v45, %v920_v44  ;;  %v922_v49 = vld [vmem:[%s2922_s2 + $0x58] sm:$0xff]  ;;  %v1806_v51 = vpack.c.bf16 %v923_v48, %v919_v46  ;;  %v921_v53 = vld [vmem:[%s2922_s2 + $0x50] sm:$0xff] }
  0x5e   :  { %1763 = vmatpush3.bf16.msra.mxu0 %v1762_v59  ;;  %590 = vmatprep.mubr.f32.mxu0 %v99_v62  ;;  %v926_v50 = vld [vmem:[%s2922_s2 + $0x78] sm:$0xff]  ;;  %v925_v54 = vld [vmem:[%s2922_s2 + $0x70] sm:$0xff] }
  0x5f   :  { %691 = vmatmul.mubr.f32.gmra.mrb[28].mxu1 %v89_v2  ;;  %1765 = vmatprep.subr.bf16.mxu0 %v1764_v63  ;;  %v2684_v52 = vpack.c.bf16 %v926_v50, %v922_v49  ;;  %v2692_v55 = vpack.c.bf16 %v925_v54, %v921_v53 }
  0x60   :  { %695 = vmatprep.mubr.f32.mxu1 %v101_v3  ;;  %1795 = vmatpush3.bf16.msra.mxu1 %v1792_v57 }
  0x61   :  { %591 = vmatmul.mubr.f32.gmra.mrb[30].mxu0 %v98_v5  ;;  %1797 = vmatprep.subr.bf16.mxu1 %v1796_v4 }
  0x62   :  { %1767 = vmatpush3.bf16.msra.mxu0 %v1766_v6  ;;  %765 = vmatprep.mubr.f32.mxu0 %v26_v7 }
  0x63   :  { %696 = vmatmul.mubr.f32.gmra.mrb[30].mxu1 %v100_v8  ;;  %1809 = vmatprep.subr.bf16.mxu0 %v1808_v39 }
  0x64   :  { %1799 = vmatpush3.bf16.msra.mxu1 %v1796_v4  ;;  %1596 = vmatprep.mubr.f32.mxu1 %v27_v9 }
  0x65   :  { %766 = vmatmul.mubr.f32.vlgmr.msra.gmra.mrb[32].mxu0 %v25_v10  ;;  %1801 = vmatprep.subr.bf16.mxu1 %v1800_v35 }
  0x66   :  { %770 = vmatprep.mubr.f32.mxu0 %v37_v11  ;;  %1811 = vmatpush1.bf16.msra.mxu0 %v2663_v43 }
  0x67   :  { %1597 = vmatmul.mubr.f32.vlgmr.msra.gmra.mrb[32].mxu1 %v38_v12  ;;  %1813 = vmatprep.subr.bf16.mxu0 %v2684_v52 }
  0x68   :  { %1599 = vmatprep.mubr.f32.mxu1 %v49_v13  ;;  %1803 = vmatpush1.bf16.msra.mxu1 %v1802_v40 }
  0x69   :  { %771 = vmatmul.mubr.f32.gmra.mrb[34].mxu0 %v36_v14  ;;  %1805 = vmatprep.subr.bf16.mxu1 %v1804_v47 }
  0x6a   :  { %775 = vmatprep.mubr.f32.mxu0 %v48_v15  ;;  %1815 = vmatpush1.bf16.msra.mxu0 %v2692_v55 }
  0x6b   :  { %1600 = vmatmul.mubr.f32.gmra.mrb[34].mxu1 %v60_v16 }
  0x6c   :  { %1602 = vmatprep.mubr.f32.mxu1 %v71_v17  ;;  %1807 = vmatpush1.bf16.msra.mxu1 %v1806_v51 }
  0x6d   :  { %776 = vmatmul.mubr.f32.gmra.mrb[36].mxu0 %v47_v18  ;;  %1816 = vmatprep.subr.bf16.mxu1 %v1808_v39 }
  0x6e   :  { %780 = vmatprep.mubr.f32.mxu0 %v59_v19 }
  0x6f   :  { %1603 = vmatmul.mubr.f32.gmra.mrb[36].mxu1 %v82_v20 }
  0x70   :  { %1605 = vmatprep.mubr.f32.mxu1 %v93_v21 }
  0x71   :  { %781 = vmatmul.mubr.f32.gmra.mrb[38].mxu0 %v58_v22 }
  0x72   :  { %785 = vmatprep.mubr.f32.mxu0 %v70_v23 }
  0x73   :  { %1606 = vmatmul.mubr.f32.gmra.mrb[38].mxu1 %v104_v24 }
  0x74   :  { %1038 = vmatprep.mubr.f32.mxu1 %v1821_v56 }
  0x75   :  { %786 = vmatmul.mubr.f32.gmra.mrb[40].mxu0 %v69_v25 }
  0x76   :  { %790 = vmatprep.mubr.f32.mxu0 %v81_v26 }
  0x79   :  { %791 = vmatmul.mubr.f32.gmra.mrb[42].mxu0 %v80_v27 }
  0x7a   :  { %795 = vmatprep.mubr.f32.mxu0 %v92_v28 }
  0x7d   :  { %796 = vmatmul.mubr.f32.gmra.mrb[44].mxu0 %v91_v29 }
  0x7e   :  { %800 = vmatprep.mubr.f32.mxu0 %v103_v30 }
  0x81   :  { %801 = vmatmul.mubr.f32.gmra.mrb[46].mxu0 %v102_v31 }
  0x82   :  { %1151 = vmatprep.mubr.f32.mxu0 %v1821_v56 }
  0xf8   :  { %v1292_v57 = vpop.f32.mrb[0].mxu0 }
  0xf9   :  { %v1348_v58 = vpop.f32.mrb[0].mxu1  ;;  %v1293_v59 = vpop.f32.mrb[1].mxu0 }
  0xfa   :  { %v1294_v60 = vadd.f32 %v1293_v59, %v1292_v57  ;;  %v1349_v61 = vpop.f32.mrb[1].mxu1 }
  0xfb   :  { %v1350_v62 = vadd.f32 %v1349_v61, %v1348_v58 }
  0xfc   :  { %v1295_v63 = vpop.f32.mrb[2].mxu0 }
  0xfd   :  { %v453_v0 = vadd.f32 %v1350_v62, %v1294_v60  ;;  %v1351_v1 = vpop.f32.mrb[2].mxu1  ;;  %v1296_v2 = vpop.f32.mrb[3].mxu0 }
  0xfe   :  { %v1297_v3 = vadd.f32 %v1296_v2, %v1295_v63  ;;  %v1352_v4 = vpop.f32.mrb[3].mxu1 }
  0xff   :  { %v1353_v5 = vadd.f32 %v1352_v4, %v1351_v1 }
 0x100   :  { %v1298_v6 = vpop.f32.mrb[4].mxu0 }
 0x101   :  { %v458_v7 = vadd.f32 %v1353_v5, %v1297_v3  ;;  %v1354_v8 = vpop.f32.mrb[4].mxu1  ;;  %v1299_v9 = vpop.f32.mrb[5].mxu0 }
 0x102   :  { %v1300_v10 = vadd.f32 %v1299_v9, %v1298_v6  ;;  %v1355_v11 = vpop.f32.mrb[5].mxu1 }
 0x103   :  { %v1356_v12 = vadd.f32 %v1355_v11, %v1354_v8 }
 0x104   :  { %v1301_v13 = vpop.f32.mrb[6].mxu0 }
 0x105   :  { %v463_v14 = vadd.f32 %v1356_v12, %v1300_v10  ;;  %v1357_v15 = vpop.f32.mrb[6].mxu1  ;;  %v1302_v16 = vpop.f32.mrb[7].mxu0 }
 0x106   :  { %v1303_v17 = vadd.f32 %v1302_v16, %v1301_v13  ;;  %v1358_v18 = vpop.f32.mrb[7].mxu1 }
 0x107   :  { %v1359_v19 = vadd.f32 %v1358_v18, %v1357_v15 }
 0x108   :  { %v1304_v20 = vpop.f32.mrb[8].mxu0 }
 0x109   :  { %v468_v21 = vadd.f32 %v1359_v19, %v1303_v17  ;;  %v1360_v22 = vpop.f32.mrb[8].mxu1  ;;  %v1305_v23 = vpop.f32.mrb[9].mxu0 }
 0x10a   :  { %v1306_v24 = vadd.f32 %v1305_v23, %v1304_v20  ;;  %v1361_v25 = vpop.f32.mrb[9].mxu1 }
 0x10b   :  { %v1362_v26 = vadd.f32 %v1361_v25, %v1360_v22 }
 0x10c   :  { %v1307_v27 = vpop.f32.mrb[10].mxu0 }
 0x10d   :  { %v473_v28 = vadd.f32 %v1362_v26, %v1306_v24  ;;  %v1363_v29 = vpop.f32.mrb[10].mxu1  ;;  %v1308_v30 = vpop.f32.mrb[11].mxu0 }
 0x10e   :  { %v1309_v31 = vadd.f32 %v1308_v30, %v1307_v27  ;;  %v1364_v32 = vpop.f32.mrb[11].mxu1 }
 0x10f   :  { %v1365_v33 = vadd.f32 %v1364_v32, %v1363_v29 }
 0x110   :  { %v1310_v34 = vpop.f32.mrb[12].mxu0 }
 0x111   :  { %v478_v35 = vadd.f32 %v1365_v33, %v1309_v31  ;;  %v1366_v36 = vpop.f32.mrb[12].mxu1  ;;  %v1311_v37 = vpop.f32.mrb[13].mxu0 }
 0x112   :  { %v1312_v38 = vadd.f32 %v1311_v37, %v1310_v34  ;;  %v1367_v39 = vpop.f32.mrb[13].mxu1 }
 0x113   :  { %v1368_v40 = vadd.f32 %v1367_v39, %v1366_v36 }
 0x114   :  { %v1313_v41 = vpop.f32.mrb[14].mxu0 }
 0x115   :  { %v483_v42 = vadd.f32 %v1368_v40, %v1312_v38  ;;  %v1369_v44 = vpop.f32.mrb[14].mxu1  ;;  %v1314_v45 = vpop.f32.mrb[15].mxu0 }
 0x116   :  { %v1315_v46 = vadd.f32 %v1314_v45, %v1313_v41  ;;  %v1370_v47 = vpop.f32.mrb[15].mxu1 }
 0x117   :  { %v1371_v48 = vadd.f32 %v1370_v47, %v1369_v44 }
 0x118   :  { %v1404_v49 = vpop.f32.mrb[16].mxu0 }
 0x119   :  { %v488_v50 = vadd.f32 %v1371_v48, %v1315_v46  ;;  %v1405_v51 = vpop.f32.mrb[17].mxu0 }
 0x11a   :  { %v1406_v53 = vadd.f32 %v1405_v51, %v1404_v49  ;;  %v1460_v54 = vpop.f32.mrb[16].mxu1 }
 0x11b   :  { %v1461_v57 = vpop.f32.mrb[17].mxu1 }
 0x11c   :  { %v558_v58 = vadd.f32 %v1406_v53, %v453_v0  ;;  %v1462_v59 = vadd.f32 %v1461_v57, %v1460_v54  ;;  %v1407_v60 = vpop.f32.mrb[18].mxu0 }
 0x11d   :  { %v1408_v61 = vpop.f32.mrb[19].mxu0 }
 0x11e   :  { %v663_v62 = vadd.f32 %v1462_v59, %v558_v58  ;;  %v1409_v63 = vadd.f32 %v1408_v61, %v1407_v60  ;;  %v1463_v1 = vpop.f32.mrb[18].mxu1 }
 0x11f   :  { %v1464_v2 = vpop.f32.mrb[19].mxu1 }
 0x120   :  { %v563_v3 = vadd.f32 %v1409_v63, %v458_v7  ;;  %v1465_v4 = vadd.f32 %v1464_v2, %v1463_v1  ;;  %v1410_v5 = vpop.f32.mrb[20].mxu0 }
 0x121   :  { %v1411_v6 = vpop.f32.mrb[21].mxu0 }
 0x122   :  { %v668_v8 = vadd.f32 %v1465_v4, %v563_v3  ;;  %v1412_v9 = vadd.f32 %v1411_v6, %v1410_v5  ;;  %v1466_v10 = vpop.f32.mrb[20].mxu1 }
 0x123   :  { %v1467_v11 = vpop.f32.mrb[21].mxu1 }
 0x124   :  { %v568_v12 = vadd.f32 %v1412_v9, %v463_v14  ;;  %v1468_v13 = vadd.f32 %v1467_v11, %v1466_v10  ;;  %v1413_v15 = vpop.f32.mrb[22].mxu0 }
 0x125   :  { %v1414_v16 = vpop.f32.mrb[23].mxu0 }
 0x126   :  { %v2698_v0 = vadd.f32 %v1468_v13, %v568_v12  ;;  %v1415_v17 = vadd.f32 %v1414_v16, %v1413_v15  ;;  %v1469_v18 = vpop.f32.mrb[22].mxu1 }
 0x127   :  { %v1470_v19 = vpop.f32.mrb[23].mxu1 }
 0x128   :  { %v573_v20 = vadd.f32 %v1415_v17, %v468_v21  ;;  %v1471_v22 = vadd.f32 %v1470_v19, %v1469_v18  ;;  %v1416_v23 = vpop.f32.mrb[24].mxu0 }
 0x129   :  { %v1417_v7 = vpop.f32.mrb[25].mxu0 }
 0x12a   :  { %v2700_v24 = vadd.f32 %v1471_v22, %v573_v20  ;;  %v1418_v25 = vadd.f32 %v1417_v7, %v1416_v23  ;;  %v1472_v26 = vpop.f32.mrb[24].mxu1 }
 0x12b   :  { %v1473_v27 = vpop.f32.mrb[25].mxu1 }
 0x12c   :  { %v578_v29 = vadd.f32 %v1418_v25, %v473_v28  ;;  %v1474_v30 = vadd.f32 %v1473_v27, %v1472_v26  ;;  %v1419_v14 = vpop.f32.mrb[26].mxu0 }
 0x12d   :  { %v1420_v31 = vpop.f32.mrb[27].mxu0 }
 0x12e   :  { %v2702_v32 = vadd.f32 %v1474_v30, %v578_v29  ;;  %v1421_v33 = vadd.f32 %v1420_v31, %v1419_v14  ;;  %v1475_v34 = vpop.f32.mrb[26].mxu1 }
 0x12f   :  { %v1476_v36 = vpop.f32.mrb[27].mxu1 }
 0x130   :  { %v583_v37 = vadd.f32 %v1421_v33, %v478_v35  ;;  %v1477_v38 = vadd.f32 %v1476_v36, %v1475_v34  ;;  %v1422_v21 = vpop.f32.mrb[28].mxu0 }
 0x131   :  { %v1423_v39 = vpop.f32.mrb[29].mxu0 }
 0x132   :  { %v2704_v40 = vadd.f32 %v1477_v38, %v583_v37  ;;  %v1424_v41 = vadd.f32 %v1423_v39, %v1422_v21  ;;  %v1478_v44 = vpop.f32.mrb[28].mxu1 }
 0x133   :  { %v1479_v45 = vpop.f32.mrb[29].mxu1 }
 0x134   :  { %v588_v46 = vadd.f32 %v1424_v41, %v483_v42  ;;  %v1480_v47 = vadd.f32 %v1479_v45, %v1478_v44  ;;  %v1425_v28 = vpop.f32.mrb[30].mxu0 }
 0x135   :  { %v1426_v48 = vpop.f32.mrb[31].mxu0 }
 0x136   :  { %v2706_v49 = vadd.f32 %v1480_v47, %v588_v46  ;;  %v1427_v51 = vadd.f32 %v1426_v48, %v1425_v28  ;;  %v1481_v53 = vpop.f32.mrb[30].mxu1  ;;  %v927_v46 = vld [vmem:[%s2924_s3] sm:$0xf] }
 0x137   :  { %v1482_v54 = vpop.f32.mrb[31].mxu1 }
 0x138   :  { %v593_v57 = vadd.f32 %v1427_v51, %v488_v50  ;;  %v1483_v58 = vadd.f32 %v1482_v54, %v1481_v53  ;;  %v1516_v35 = vpop.f32.mrb[32].mxu0 }
 0x139   :  { %v1517_v59 = vpop.f32.mrb[33].mxu0 }
 0x13a   :  { %v2708_v60 = vadd.f32 %v1483_v58, %v593_v57  ;;  %v1518_v61 = vadd.f32 %v1517_v59, %v1516_v35  ;;  %v1598_v63 = vpop.f32.mrb[32].mxu1 }
 0x13b   :  { %v872_v1 = vpop.f32.mrb[33].mxu1 }
 0x13c   :  { %v1519_v2 = vpop.f32.mrb[34].mxu0  ;;  %v768_v3 = vadd.f32 %v1518_v61, %v663_v62 }
 0x13d   :  { %v1520_v42 = vpop.f32.mrb[35].mxu0 }
 0x13e   :  { %v1521_v4 = vadd.f32 %v1520_v42, %v1519_v2  ;;  %v873_v5 = vadd.f32 %v872_v1, %v768_v3  ;;  %v1601_v6 = vpop.f32.mrb[34].mxu1 }
 0x13f   :  { %v882_v9 = vpop.f32.mrb[35].mxu1 }
 0x140   :  { %v773_v10 = vadd.f32 %v1521_v4, %v668_v8  ;;  %1204 = vst.msk [vmem:[%s2923_s4 + $0x20] sm:$0xff] %vm949_vm0, %v873_v5  ;;  %v1522_v50 = vpop.f32.mrb[36].mxu0  ;;  %1244 = vmatmul.mubr.msk.f32.vlgmr.msra.gmra.mrb[40].mxu1 %vm949_vm0, %v873_v5  ;;  %1252 = vmatmul.mubr.msk.f32.vlgmr.msra.gmra.mrb[48].mxu0 %vm949_vm0, %v873_v5 }
 0x141   :  { %v1523_v11 = vpop.f32.mrb[37].mxu0  ;;  %1818 = vmatpush1.bf16.msra.mxu1 %v2663_v43  ;;  %1044 = vmatprep.mubr.f32.mxu1 %v1821_v56 }
 0x142   :  { %v878_v62 = vadd.f32 %v1598_v63, %v773_v10  ;;  %v1524_v12 = vadd.f32 %v1523_v11, %v1522_v50  ;;  %1157 = vmatprep.mubr.f32.mxu0 %v1821_v56  ;;  %v1604_v8 = vpop.f32.mrb[36].mxu1  ;;  %1817 = vmatprep.subr.bf16.mxu1 %v2684_v52 }
 0x143   :  { %v892_v13 = vpop.f32.mrb[37].mxu1 }
 0x144   :  { %1209 = vst.msk [vmem:[%s2923_s4 + $0x48] sm:$0xff] %vm949_vm0, %v878_v62  ;;  %v1525_v15 = vpop.f32.mrb[38].mxu0  ;;  %1245 = vmatmul.mubr.msk.f32.gmra.mrb[42].mxu1 %vm949_vm0, %v878_v62  ;;  %1253 = vmatmul.mubr.msk.f32.gmra.mrb[50].mxu0 %vm949_vm0, %v878_v62  ;;  %v778_v43 = vadd.f32 %v1524_v12, %v2698_v0 }
 0x145   :  { %v1526_v16 = vpop.f32.mrb[39].mxu0  ;;  %1050 = vmatprep.mubr.f32.mxu1 %v1821_v56  ;;  %1163 = vmatprep.mubr.f32.mxu0 %v1821_v56 }
 0x146   :  { %v1527_v17 = vadd.f32 %v1526_v16, %v1525_v15  ;;  %v883_v52 = vadd.f32 %v882_v9, %v778_v43  ;;  %1819 = vmatpush1.bf16.msra.mxu1 %v2692_v55  ;;  %v1607_v18 = vpop.f32.mrb[38].mxu1 }
 0x147   :  { %v902_v19 = vpop.f32.mrb[39].mxu1 }
 0x148   :  { %v783_v20 = vadd.f32 %v1527_v17, %v2700_v24  ;;  %1214 = vst.msk [vmem:[%s2923_s4 + $0x70] sm:$0xff] %vm949_vm0, %v883_v52  ;;  %v1528_v22 = vpop.f32.mrb[40].mxu0  ;;  %1246 = vmatmul.mubr.msk.f32.gmra.mrb[44].mxu1 %vm949_vm0, %v883_v52  ;;  %1254 = vmatmul.mubr.msk.f32.gmra.mrb[52].mxu0 %vm949_vm0, %v883_v52 }
 0x149   :  { %v1529_v0 = vpop.f32.mrb[41].mxu0  ;;  %1056 = vmatprep.mubr.f32.mxu1 %v1821_v56  ;;  %1169 = vmatprep.mubr.f32.mxu0 %v1821_v56 }
 0x14a   :  { %v888_v55 = vadd.f32 %v1601_v6, %v783_v20  ;;  %v1530_v23 = vadd.f32 %v1529_v0, %v1528_v22 }
 0x14c   :  { %1219 = vst.msk [vmem:[%s2923_s4 + $0x98] sm:$0xff] %vm949_vm0, %v888_v55  ;;  %v1531_v7 = vpop.f32.mrb[42].mxu0  ;;  %1247 = vmatmul.mubr.msk.f32.gmra.mrb[46].mxu1 %vm949_vm0, %v888_v55  ;;  %1255 = vmatmul.mubr.msk.f32.gmra.mrb[54].mxu0 %vm949_vm0, %v888_v55  ;;  %v788_v24 = vadd.f32 %v1530_v23, %v2702_v32 }
 0x14d   :  { %v1532_v25 = vpop.f32.mrb[43].mxu0  ;;  %1062 = vmatprep.mubr.f32.mxu1 %v1821_v56  ;;  %1175 = vmatprep.mubr.f32.mxu0 %v1821_v56 }
 0x14e   :  { %v1533_v26 = vadd.f32 %v1532_v25, %v1531_v7  ;;  %v893_v27 = vadd.f32 %v892_v13, %v788_v24 }
 0x150   :  { %v793_v29 = vadd.f32 %v1533_v26, %v2704_v40  ;;  %1224 = vst.msk [vmem:[%s2923_s4 + $0xc0] sm:$0xff] %vm949_vm0, %v893_v27  ;;  %v1534_v30 = vpop.f32.mrb[44].mxu0  ;;  %1248 = vmatmul.mubr.msk.f32.gmra.mrb[48].mxu1 %vm949_vm0, %v893_v27  ;;  %1256 = vmatmul.mubr.msk.f32.gmra.mrb[56].mxu0 %vm949_vm0, %v893_v27  ;;  %v929_v40 = vlaneseq }
 0x151   :  { %v1535_v14 = vpop.f32.mrb[45].mxu0  ;;  %1068 = vmatprep.mubr.f32.mxu1 %v1821_v56  ;;  %1181 = vmatprep.mubr.f32.mxu0 %v1821_v56 }
 0x152   :  { %v898_v31 = vadd.f32 %v1604_v8, %v793_v29  ;;  %v1536_v32 = vadd.f32 %v1535_v14, %v1534_v30  ;;  %v930_v41 = vshrl.u32 %v929_v40, 7 }
 0x154   :  { %1229 = vst.msk [vmem:[%s2923_s4 + $0xe8] sm:$0xff] %vm949_vm0, %v898_v31  ;;  %v1537_v33 = vpop.f32.mrb[46].mxu0  ;;  %1249 = vmatmul.mubr.msk.f32.gmra.mrb[50].mxu1 %vm949_vm0, %v898_v31  ;;  %1257 = vmatmul.mubr.msk.f32.gmra.mrb[58].mxu0 %vm949_vm0, %v898_v31  ;;  %v798_v34 = vadd.f32 %v1536_v32, %v2706_v49  ;;  %v931_v44 = vsub.s32 0, %v930_v41  ;;  %v939_v45 = vsub.s32 2, %v930_v41  ;;  %v935_v47 = vsub.s32 1, %v930_v41 }
 0x155   :  { %v1538_v36 = vpop.f32.mrb[47].mxu0  ;;  %1074 = vmatprep.mubr.f32.mxu1 %v1821_v56  ;;  %v943_v28 = vsub.s32 3, %v930_v41 }
 0x156   :  { %v1539_v37 = vadd.f32 %v1538_v36, %v1537_v33  ;;  %v903_v38 = vadd.f32 %v902_v19, %v798_v34  ;;  %v2784_v48 = vrot.slane %v927_v46, %v931_v44  ;;  %v2786_v49 = vrot.slane %v927_v46, %v939_v45 }
 0x157   :  { %v2788_v51 = vrot.slane %v927_v46, %v935_v47  ;;  %v2790_v53 = vrot.slane %v927_v46, %v943_v28 }
 0x158   :  { %v803_v21 = vadd.f32 %v1539_v37, %v2708_v60  ;;  %1234 = vst.msk [vmem:[%s2923_s4 + $0x110] sm:$0xff] %vm949_vm0, %v903_v38  ;;  %1250 = vmatmul.mubr.msk.f32.gmra.mrb[52].mxu1 %vm949_vm0, %v903_v38 }
 0x159   :  { %1080 = vmatprep.mubr.f32.mxu1 %v1821_v56 }
 0x15a   :  { %v908_v39 = vadd.f32 %v1607_v18, %v803_v21 }
 0x15c   :  { %1239 = vst.msk [vmem:[%s2923_s4 + $0x138] sm:$0xff] %vm949_vm0, %v908_v39  ;;  %1251 = vmatmul.mubr.msk.f32.gmra.mrb[54].mxu1 %vm949_vm0, %v908_v39 }
 0x15d   :  { %1187 = vmatprep.mubr.f32.mxu1 %v1821_v56 }
 0x160   :  { %1258 = vmatmul.mubr.msk.f32.vlgmr.msra.gmra.mrb[56].mxu1 %vm949_vm0, %v903_v38 }
 0x161   :  { %1193 = vmatprep.mubr.f32.mxu1 %v1821_v56 }
 0x164   :  { %1259 = vmatmul.mubr.msk.f32.gmra.mrb[58].mxu1 %vm949_vm0, %v908_v39 }
 0x213   :  { %v1040_v56 = vpop.f32.mrb[40].mxu1  ;;  %v1153_v54 = vpop.f32.mrb[48].mxu0 }
 0x214   :  { %v1041_v57 = vadd.f32 %v1040_v56, %v2784_v48  ;;  %v1154_v58 = vadd.f32 %v1153_v54, %v2786_v49  ;;  %v1042_v35 = vpop.f32.mrb[41].mxu1  ;;  %v1155_v59 = vpop.f32.mrb[49].mxu0 }
 0x215   :  { %v1043_v60 = vadd.f32 %v1042_v35, %v2788_v51  ;;  %v1156_v61 = vadd.f32 %v1155_v59, %v2790_v53 }
 0x216   :  { %1200 = vst [vmem:[%s2923_s4] sm:$0xff] %v1041_v57  ;;  %1202 = vst [vmem:[%s2923_s4 + $0x10] sm:$0xff] %v1154_v58 }
 0x217   :  { %1201 = vst [vmem:[%s2923_s4 + $0x8] sm:$0xff] %v1043_v60  ;;  %1203 = vst [vmem:[%s2923_s4 + $0x18] sm:$0xff] %v1156_v61  ;;  %v1046_v63 = vpop.f32.mrb[42].mxu1  ;;  %v1159_v1 = vpop.f32.mrb[50].mxu0 }
 0x218   :  { %v1047_v2 = vadd.f32 %v1046_v63, %v2784_v48  ;;  %v1160_v3 = vadd.f32 %v1159_v1, %v2786_v49  ;;  %v1048_v42 = vpop.f32.mrb[43].mxu1  ;;  %v1161_v4 = vpop.f32.mrb[51].mxu0 }
 0x219   :  { %v1049_v5 = vadd.f32 %v1048_v42, %v2788_v51  ;;  %v1162_v6 = vadd.f32 %v1161_v4, %v2790_v53 }
 0x21a   :  { %1205 = vst [vmem:[%s2923_s4 + $0x28] sm:$0xff] %v1047_v2  ;;  %1207 = vst [vmem:[%s2923_s4 + $0x38] sm:$0xff] %v1160_v3 }
 0x21b   :  { %1206 = vst [vmem:[%s2923_s4 + $0x30] sm:$0xff] %v1049_v5  ;;  %1208 = vst [vmem:[%s2923_s4 + $0x40] sm:$0xff] %v1162_v6  ;;  %v1052_v9 = vpop.f32.mrb[44].mxu1  ;;  %v1165_v10 = vpop.f32.mrb[52].mxu0 }
 0x21c   :  { %v1053_v50 = vadd.f32 %v1052_v9, %v2784_v48  ;;  %v1166_v11 = vadd.f32 %v1165_v10, %v2786_v49  ;;  %v1054_v62 = vpop.f32.mrb[45].mxu1  ;;  %v1167_v12 = vpop.f32.mrb[53].mxu0 }
 0x21d   :  { %v1055_v8 = vadd.f32 %v1054_v62, %v2788_v51  ;;  %v1168_v13 = vadd.f32 %v1167_v12, %v2790_v53 }
 0x21e   :  { %1210 = vst [vmem:[%s2923_s4 + $0x50] sm:$0xff] %v1053_v50  ;;  %1212 = vst [vmem:[%s2923_s4 + $0x60] sm:$0xff] %v1166_v11 }
 0x21f   :  { %1211 = vst [vmem:[%s2923_s4 + $0x58] sm:$0xff] %v1055_v8  ;;  %1213 = vst [vmem:[%s2923_s4 + $0x68] sm:$0xff] %v1168_v13  ;;  %v1058_v15 = vpop.f32.mrb[46].mxu1  ;;  %v1171_v43 = vpop.f32.mrb[54].mxu0 }
 0x220   :  { %v1059_v16 = vadd.f32 %v1058_v15, %v2784_v48  ;;  %v1172_v17 = vadd.f32 %v1171_v43, %v2786_v49  ;;  %v1060_v52 = vpop.f32.mrb[47].mxu1  ;;  %v1173_v18 = vpop.f32.mrb[55].mxu0 }
 0x221   :  { %v1061_v19 = vadd.f32 %v1060_v52, %v2788_v51  ;;  %v1174_v20 = vadd.f32 %v1173_v18, %v2790_v53 }
 0x222   :  { %1215 = vst [vmem:[%s2923_s4 + $0x78] sm:$0xff] %v1059_v16  ;;  %1217 = vst [vmem:[%s2923_s4 + $0x88] sm:$0xff] %v1172_v17 }
 0x223   :  { %1216 = vst [vmem:[%s2923_s4 + $0x80] sm:$0xff] %v1061_v19  ;;  %1218 = vst [vmem:[%s2923_s4 + $0x90] sm:$0xff] %v1174_v20  ;;  %v1064_v22 = vpop.f32.mrb[48].mxu1  ;;  %v1177_v0 = vpop.f32.mrb[56].mxu0 }
 0x224   :  { %v1065_v55 = vadd.f32 %v1064_v22, %v2784_v48  ;;  %v1178_v23 = vadd.f32 %v1177_v0, %v2786_v49  ;;  %v1066_v7 = vpop.f32.mrb[49].mxu1  ;;  %v1179_v24 = vpop.f32.mrb[57].mxu0 }
 0x225   :  { %v1067_v25 = vadd.f32 %v1066_v7, %v2788_v51  ;;  %v1180_v26 = vadd.f32 %v1179_v24, %v2790_v53 }
 0x226   :  { %1220 = vst [vmem:[%s2923_s4 + $0xa0] sm:$0xff] %v1065_v55  ;;  %1222 = vst [vmem:[%s2923_s4 + $0xb0] sm:$0xff] %v1178_v23 }
 0x227   :  { %1221 = vst [vmem:[%s2923_s4 + $0xa8] sm:$0xff] %v1067_v25  ;;  %1223 = vst [vmem:[%s2923_s4 + $0xb8] sm:$0xff] %v1180_v26  ;;  %v1070_v27 = vpop.f32.mrb[50].mxu1  ;;  %v1183_v29 = vpop.f32.mrb[58].mxu0 }
 0x228   :  { %v1071_v30 = vadd.f32 %v1070_v27, %v2784_v48  ;;  %v1184_v14 = vadd.f32 %v1183_v29, %v2786_v49  ;;  %v1072_v31 = vpop.f32.mrb[51].mxu1  ;;  %v1185_v32 = vpop.f32.mrb[59].mxu0 }
 0x229   :  { %v1073_v33 = vadd.f32 %v1072_v31, %v2788_v51  ;;  %v1186_v34 = vadd.f32 %v1185_v32, %v2790_v53 }
 0x22a   :  { %1225 = vst [vmem:[%s2923_s4 + $0xc8] sm:$0xff] %v1071_v30  ;;  %1227 = vst [vmem:[%s2923_s4 + $0xd8] sm:$0xff] %v1184_v14 }
 0x22b   :  { %1226 = vst [vmem:[%s2923_s4 + $0xd0] sm:$0xff] %v1073_v33  ;;  %1228 = vst [vmem:[%s2923_s4 + $0xe0] sm:$0xff] %v1186_v34  ;;  %v1076_v36 = vpop.f32.mrb[52].mxu1 }
 0x22c   :  { %v1077_v37 = vadd.f32 %v1076_v36, %v2784_v48  ;;  %v1078_v38 = vpop.f32.mrb[53].mxu1 }
 0x22d   :  { %v1079_v21 = vadd.f32 %v1078_v38, %v2788_v51 }
 0x22e   :  { %1230 = vst [vmem:[%s2923_s4 + $0xf0] sm:$0xff] %v1077_v37 }
 0x22f   :  { %1231 = vst [vmem:[%s2923_s4 + $0xf8] sm:$0xff] %v1079_v21  ;;  %v1082_v39 = vpop.f32.mrb[54].mxu1 }
 0x230   :  { %v1083_v40 = vadd.f32 %v1082_v39, %v2784_v48  ;;  %v1084_v41 = vpop.f32.mrb[55].mxu1 }
 0x231   :  { %v1085_v44 = vadd.f32 %v1084_v41, %v2788_v51 }
 0x232   :  { %1235 = vst [vmem:[%s2923_s4 + $0x118] sm:$0xff] %v1083_v40 }
 0x233   :  { %1236 = vst [vmem:[%s2923_s4 + $0x120] sm:$0xff] %v1085_v44  ;;  %v1189_v45 = vpop.f32.mrb[56].mxu1 }
 0x234   :  { %v1190_v46 = vadd.f32 %v1189_v45, %v2786_v49  ;;  %v1191_v47 = vpop.f32.mrb[57].mxu1 }
 0x235   :  { %v1192_v28 = vadd.f32 %v1191_v47, %v2790_v53 }
 0x236   :  { %1232 = vst [vmem:[%s2923_s4 + $0x100] sm:$0xff] %v1190_v46 }
 0x237   :  { %1233 = vst [vmem:[%s2923_s4 + $0x108] sm:$0xff] %v1192_v28  ;;  %v1195_v48 = vpop.f32.mrb[58].mxu1 }
 0x238   :  { %v1196_v51 = vadd.f32 %v1195_v48, %v2786_v49  ;;  %v1197_v56 = vpop.f32.mrb[59].mxu1 }
 0x239   :  { %v1198_v54 = vadd.f32 %v1197_v56, %v2790_v53 }
 0x23a   :  { %1237 = vst [vmem:[%s2923_s4 + $0x128] sm:$0xff] %v1196_v51 }
 0x23b   :  { %1238 = vst [vmem:[%s2923_s4 + $0x130] sm:$0xff] %v1198_v54 }

// kernel: retain_forward.3
= control target key start
LH: loop header
LB: loop body
LE: loop exit
PB: predicated region body
PF: predicated region fallthrough
CT: control target
= control target key end

     0   :  { %v6420_v0 = vmov 0.0|0.0   ;;  %vm6421_vm0 = vmmov 0   ;;  %v6422_v4 = vmov 0.0   ;;  %v6423_v9 = vmov 0   ;;  %s6424_s13 = smov 64   ;;  %s8431_s4 = inlined_call_operand.vmem [shape: f32[128,128], index: 4, kind: input, shape index: {}]   ;;  %s8432_s3 = inlined_call_operand.vmem [shape: f32[128,512], index: 3, kind: input, shape index: {}]   ;;  %s8433_s1 = inlined_call_operand.vmem [shape: f32[8,8,1], index: 1, kind: input, shape index: {}]   ;;  %s8434_s0 = inlined_call_operand.vmem [shape: f32[8,8,512], index: 0, kind: input, shape index: {}]   ;;  %s8435_s5 = inlined_call_operand.vmem [shape: f32[1,128], index: 5, kind: input, shape index: {}]   ;;  %s8436_s7 = inlined_call_operand.vmem [shape: f32[64,33], index: 7, kind: input, shape index: {}]   ;;  %s8437_s6 = inlined_call_operand.vmem [shape: f32[64,33], index: 6, kind: input, shape index: {}]   ;;  %s8438_s8 = inlined_call_operand.vmem [shape: f32[32,4], index: 8, kind: input, shape index: {}]   ;;  %s8439_s2 = inlined_call_operand.vmem [shape: f32[8,8,32], index: 2, kind: input, shape index: {}]   ;;  %s8440_s9 = inlined_call_operand.vmem [shape: f32[8,4], index: 9, kind: output, shape index: {}]  }
   0x1   :  { %5281 = vmatprep.subr.bf16.mxu0 %v6420_v0  ;;  %v39_v1 = vld [vmem:[%s8431_s4] sm:$0xff]  ;;  %v40_v2 = vld [vmem:[%s8431_s4 + $0x8] sm:$0xff]  ;;  %4718 = vmatprep.mubr.msk.f32.mxu0 %vm6421_vm0, %v6422_v4  ;;  %v41_v12 = vld [vmem:[%s8431_s4 + $0x10] sm:$0xff]  ;;  %vm139_vm1 = vcmask 523264   ;;  %vm4222_vm2 = vcmask 261120   ;;  %vm4296_vm3 = vcmask 31744  }
   0x2   :  { %v145_v3 = vld [vmem:[%s8432_s3 + $0x8] sm:$0xff]  ;;  %v6488_v5 = vpack.c.bf16 %v40_v2, %v39_v1  ;;  %v144_v7 = vld [vmem:[%s8432_s3] sm:$0xff]  ;;  %276 = vmatprep.mubr.f32.mxu1 %v6422_v4  ;;  %6205 = vset.pattern.permute.xlu0 %v6423_v9  ;;  %v42_v13 = vld [vmem:[%s8431_s4 + $0x18] sm:$0xff] }
   0x3   :  { %v149_v6 = vld [vmem:[%s8432_s3 + $0x28] sm:$0xff]  ;;  %v148_v8 = vld [vmem:[%s8432_s3 + $0x20] sm:$0xff]  ;;  %6206 = vset.pattern.permute.xlu1 %v6423_v9  ;;  %v6514_v15 = vpack.c.bf16 %v42_v13, %v41_v12  ;;  %v45_v31 = vld [vmem:[%s8431_s4 + $0x30] sm:$0xff] }
   0x4   :  { %v6500_v10 = vpack.c.bf16 %v149_v6, %v145_v3  ;;  %v6502_v11 = vpack.c.bf16 %v148_v8, %v144_v7  ;;  %v153_v14 = vld [vmem:[%s8432_s3 + $0x48] sm:$0xff]  ;;  %5283 = vmatpush3.bf16.msra.mxu0 %v6488_v5  ;;  %v152_v17 = vld [vmem:[%s8432_s3 + $0x40] sm:$0xff]  ;;  %v46_v32 = vld [vmem:[%s8431_s4 + $0x38] sm:$0xff] }
   0x5   :  { %v157_v16 = vld [vmem:[%s8432_s3 + $0x68] sm:$0xff]  ;;  %v156_v18 = vld [vmem:[%s8432_s3 + $0x60] sm:$0xff]  ;;  %5284 = vmatprep.subr.bf16.mxu0 %v6420_v0  ;;  %v6582_v37 = vpack.c.bf16 %v46_v32, %v45_v31  ;;  %v49_v49 = vld [vmem:[%s8431_s4 + $0x50] sm:$0xff] }
   0x6   :  { %5306 = vmatprep.subr.bf16.mxu1 %v6500_v10  ;;  %v6527_v19 = vpack.c.bf16 %v157_v16, %v153_v14  ;;  %v43_v20 = vld [vmem:[%s8431_s4 + $0x20] sm:$0xff]  ;;  %v44_v21 = vld [vmem:[%s8431_s4 + $0x28] sm:$0xff]  ;;  %v6539_v23 = vpack.c.bf16 %v156_v18, %v152_v17  ;;  %v50_v50 = vld [vmem:[%s8431_s4 + $0x58] sm:$0xff] }
   0x7   :  { %v161_v22 = vld [vmem:[%s8432_s3 + $0x88] sm:$0xff]  ;;  %5308 = vmatpush1.bf16.msra.mxu1 %v6502_v11  ;;  %v160_v26 = vld [vmem:[%s8432_s3 + $0x80] sm:$0xff]  ;;  %v6554_v28 = vpack.c.bf16 %v44_v21, %v43_v20  ;;  %v6638_v55 = vpack.c.bf16 %v50_v50, %v49_v49  ;;  %v53_v6 = vld [vmem:[%s8431_s4 + $0x70] sm:$0xff] }
   0x8   :  { %v165_v24 = vld [vmem:[%s8432_s3 + $0xa8] sm:$0xff]  ;;  %5310 = vmatprep.subr.bf16.mxu1 %v6527_v19  ;;  %v164_v27 = vld [vmem:[%s8432_s3 + $0xa0] sm:$0xff]  ;;  %5286 = vmatpush3.bf16.msra.mxu0 %v6514_v15  ;;  %v54_v7 = vld [vmem:[%s8431_s4 + $0x78] sm:$0xff] }
   0x9   :  { %v6545_v25 = vpack.c.bf16 %v165_v24, %v161_v22  ;;  %v169_v29 = vld [vmem:[%s8432_s3 + $0xc8] sm:$0xff]  ;;  %5287 = vmatprep.subr.bf16.mxu0 %v6420_v0  ;;  %v6570_v33 = vpack.c.bf16 %v164_v27, %v160_v26  ;;  %v168_v35 = vld [vmem:[%s8432_s3 + $0xc0] sm:$0xff]  ;;  %v147_v9 = vld [vmem:[%s8432_s3 + $0x18] sm:$0xff]  ;;  %v6705_v18 = vpack.c.bf16 %v54_v7, %v53_v6 }
   0xa   :  { %v173_v30 = vld [vmem:[%s8432_s3 + $0xe8] sm:$0xff]  ;;  %v172_v36 = vld [vmem:[%s8432_s3 + $0xe0] sm:$0xff]  ;;  %v151_v12 = vld [vmem:[%s8432_s3 + $0x38] sm:$0xff] }
   0xb   :  { %5312 = vmatpush1.bf16.msra.mxu1 %v6539_v23  ;;  %v6573_v34 = vpack.c.bf16 %v173_v30, %v169_v29  ;;  %v177_v38 = vld [vmem:[%s8432_s3 + $0x108] sm:$0xff]  ;;  %v47_v40 = vld [vmem:[%s8431_s4 + $0x40] sm:$0xff]  ;;  %v6598_v42 = vpack.c.bf16 %v172_v36, %v168_v35  ;;  %v6714_v21 = vpack.c.bf16 %v151_v12, %v147_v9  ;;  %v146_v22 = vld [vmem:[%s8432_s3 + $0x10] sm:$0xff] }
   0xc   :  { %5314 = vmatprep.subr.bf16.mxu1 %v6545_v25  ;;  %5289 = vmatpush3.bf16.msra.mxu0 %v6554_v28  ;;  %v181_v39 = vld [vmem:[%s8432_s3 + $0x128] sm:$0xff]  ;;  %v176_v44 = vld [vmem:[%s8432_s3 + $0x100] sm:$0xff]  ;;  %v150_v24 = vld [vmem:[%s8432_s3 + $0x30] sm:$0xff] }
   0xd   :  { %5290 = vmatprep.subr.bf16.mxu0 %v6420_v0  ;;  %v48_v41 = vld [vmem:[%s8431_s4 + $0x48] sm:$0xff]  ;;  %v6601_v43 = vpack.c.bf16 %v181_v39, %v177_v38  ;;  %v180_v45 = vld [vmem:[%s8432_s3 + $0x120] sm:$0xff]  ;;  %v6725_v26 = vld [vmem:[%s8433_s1 + $0x38] sm:$0xff]  ;;  %v6744_v32 = vpack.c.bf16 %v150_v24, %v146_v22 }
   0xe   :  { %v6610_v46 = vpack.c.bf16 %v48_v41, %v47_v40  ;;  %v185_v47 = vld [vmem:[%s8432_s3 + $0x148] sm:$0xff]  ;;  %v6626_v51 = vpack.c.bf16 %v180_v45, %v176_v44  ;;  %v184_v53 = vld [vmem:[%s8432_s3 + $0x140] sm:$0xff]  ;;  %v155_v29 = vld [vmem:[%s8432_s3 + $0x58] sm:$0xff] }
   0xf   :  { %5316 = vmatpush1.bf16.msra.mxu1 %v6570_v33  ;;  %v189_v48 = vld [vmem:[%s8432_s3 + $0x168] sm:$0xff]  ;;  %v188_v54 = vld [vmem:[%s8432_s3 + $0x160] sm:$0xff]  ;;  %v159_v30 = vld [vmem:[%s8432_s3 + $0x78] sm:$0xff] }
  0x10   :  { %5318 = vmatprep.subr.bf16.mxu1 %v6573_v34  ;;  %5292 = vmatpush3.bf16.msra.mxu0 %v6582_v37  ;;  %v6629_v52 = vpack.c.bf16 %v189_v48, %v185_v47  ;;  %v193_v56 = vld [vmem:[%s8432_s3 + $0x188] sm:$0xff]  ;;  %v51_v58 = vld [vmem:[%s8431_s4 + $0x60] sm:$0xff]  ;;  %v6654_v60 = vpack.c.bf16 %v188_v54, %v184_v53  ;;  %v6740_v31 = vld [vmem:[%s8433_s1 + $0x30] sm:$0xff]  ;;  %v6748_v35 = vpack.c.bf16 %v159_v30, %v155_v29 }
  0x11   :  { %5293 = vmatprep.subr.bf16.mxu0 %v6420_v0  ;;  %v197_v57 = vld [vmem:[%s8432_s3 + $0x1a8] sm:$0xff]  ;;  %v192_v62 = vld [vmem:[%s8432_s3 + $0x180] sm:$0xff]  ;;  %v154_v36 = vld [vmem:[%s8432_s3 + $0x50] sm:$0xff] }
  0x12   :  { %v52_v59 = vld [vmem:[%s8431_s4 + $0x68] sm:$0xff]  ;;  %v6657_v61 = vpack.c.bf16 %v197_v57, %v193_v56  ;;  %v196_v63 = vld [vmem:[%s8432_s3 + $0x1a0] sm:$0xff]  ;;  %v158_v38 = vld [vmem:[%s8432_s3 + $0x70] sm:$0xff] }
  0x13   :  { %5320 = vmatpush1.bf16.msra.mxu1 %v6598_v42  ;;  %v6666_v1 = vpack.c.bf16 %v52_v59, %v51_v58  ;;  %v201_v2 = vld [vmem:[%s8432_s3 + $0x1c8] sm:$0xff]  ;;  %v6682_v8 = vpack.c.bf16 %v196_v63, %v192_v62  ;;  %v200_v14 = vld [vmem:[%s8432_s3 + $0x1c0] sm:$0xff]  ;;  %v163_v39 = vld [vmem:[%s8432_s3 + $0x98] sm:$0xff]  ;;  %v6773_v45 = vpack.c.bf16 %v158_v38, %v154_v36 }
  0x14   :  { %5322 = vmatprep.subr.bf16.mxu1 %v6601_v43  ;;  %5295 = vmatpush3.bf16.msra.mxu0 %v6610_v46  ;;  %v205_v3 = vld [vmem:[%s8432_s3 + $0x1e8] sm:$0xff]  ;;  %v204_v16 = vld [vmem:[%s8432_s3 + $0x1e0] sm:$0xff]  ;;  %v167_v40 = vld [vmem:[%s8432_s3 + $0xb8] sm:$0xff] }
  0x15   :  { %5296 = vmatprep.subr.bf16.mxu0 %v6420_v0  ;;  %v6691_v13 = vpack.c.bf16 %v205_v3, %v201_v2  ;;  %v6702_v17 = vld [vmem:[%s8433_s1] sm:$0xff]  ;;  %v6711_v20 = vld [vmem:[%s8433_s1 + $0x8] sm:$0xff]  ;;  %v6729_v27 = vpack.c.bf16 %v204_v16, %v200_v14  ;;  %v4318_v44 = vld [vmem:[%s8433_s1 + $0x10] sm:$0xff]  ;;  %v6778_v47 = vpack.c.bf16 %v167_v40, %v163_v39 }
  0x16   :  { %129 = vperm.xlu0 %6205, %v6702_v17   ;;  %475 = vperm.xlu1 %6206, %v6711_v20   ;;  %v4319_v41 = vld [vmem:[%s8433_s1 + $0x28] sm:$0xff]  ;;  %v162_v48 = vld [vmem:[%s8432_s3 + $0x90] sm:$0xff]  ;;  %v171_v50 = vld [vmem:[%s8432_s3 + $0xd8] sm:$0xff] }
  0x17   :  { %5324 = vmatpush1.bf16.msra.mxu1 %v6626_v51  ;;  %v166_v49 = vld [vmem:[%s8432_s3 + $0xb0] sm:$0xff]  ;;  %v175_v53 = vld [vmem:[%s8432_s3 + $0xf8] sm:$0xff]  ;;  %v4329_v54 = vld [vmem:[%s8433_s1 + $0x20] sm:$0xff] }
  0x18   :  { %5326 = vmatprep.subr.bf16.mxu1 %v6629_v52  ;;  %5298 = vmatpush3.bf16.msra.mxu0 %v6638_v55  ;;  %v4328_v56 = vld [vmem:[%s8433_s1 + $0x18] sm:$0xff]  ;;  %v6802_v57 = vpack.c.bf16 %v166_v49, %v162_v48  ;;  %v6806_v58 = vpack.c.bf16 %v175_v53, %v171_v50  ;;  %v170_v59 = vld [vmem:[%s8432_s3 + $0xd0] sm:$0xff] }
  0x19   :  { %5299 = vmatprep.subr.bf16.mxu0 %v6420_v0  ;;  %v174_v62 = vld [vmem:[%s8432_s3 + $0xf0] sm:$0xff]  ;;  %v179_v63 = vld [vmem:[%s8432_s3 + $0x118] sm:$0xff] }
  0x1a   :  { %136 = vperm.xlu0 %6205, %v6725_v26   ;;  %482 = vperm.xlu1 %6206, %v6740_v31   ;;  %v183_v2 = vld [vmem:[%s8432_s3 + $0x138] sm:$0xff]  ;;  %v6822_v3 = vpack.c.bf16 %v174_v62, %v170_v59  ;;  %v178_v7 = vld [vmem:[%s8432_s3 + $0x110] sm:$0xff] }
  0x1b   :  { %5328 = vmatpush1.bf16.msra.mxu1 %v6654_v60  ;;  %v6826_v6 = vpack.c.bf16 %v183_v2, %v179_v63  ;;  %v182_v9 = vld [vmem:[%s8432_s3 + $0x130] sm:$0xff]  ;;  %v187_v12 = vld [vmem:[%s8432_s3 + $0x158] sm:$0xff]  ;;  %v209_v2 = vld [vmem:[%s8434_s0 + $0x8] sm:$0xff] }
  0x1c   :  { %5330 = vmatprep.subr.bf16.mxu1 %v6657_v61  ;;  %5301 = vmatpush3.bf16.msra.mxu0 %v6666_v1  ;;  %v191_v14 = vld [vmem:[%s8432_s3 + $0x178] sm:$0xff]  ;;  %v6842_v16 = vpack.c.bf16 %v182_v9, %v178_v7  ;;  %v186_v24 = vld [vmem:[%s8432_s3 + $0x150] sm:$0xff] }
  0x1d   :  { %5302 = vmatprep.subr.bf16.mxu0 %v6420_v0  ;;  %v6846_v22 = vpack.c.bf16 %v191_v14, %v187_v12  ;;  %v190_v29 = vld [vmem:[%s8432_s3 + $0x170] sm:$0xff]  ;;  %v195_v30 = vld [vmem:[%s8432_s3 + $0x198] sm:$0xff] }
  0x1e   :  { %829 = vperm.xlu1 %6206, %v4319_v41   ;;  %822 = vperm.xlu0 %6205, %v4318_v44   ;;  %v199_v36 = vld [vmem:[%s8432_s3 + $0x1b8] sm:$0xff]  ;;  %v6862_v38 = vpack.c.bf16 %v190_v29, %v186_v24  ;;  %v194_v40 = vld [vmem:[%s8432_s3 + $0x190] sm:$0xff] }
  0x1f   :  { %5332 = vmatpush1.bf16.msra.mxu1 %v6682_v8  ;;  %v6866_v39 = vpack.c.bf16 %v199_v36, %v195_v30  ;;  %v207_v48 = vld [vmem:[%s8432_s3 + $0x1f8] sm:$0xff]  ;;  %v202_v53 = vld [vmem:[%s8432_s3 + $0x1d0] sm:$0xff] }
  0x20   :  { %5334 = vmatprep.subr.bf16.mxu1 %v6691_v13  ;;  %5304 = vmatpush3.bf16.msra.mxu0 %v6705_v18 }
  0x21   :  { %5338 = vmatprep.subr.bf16.mxu0 %v6714_v21 }
  0x22   :  { %1176 = vperm.xlu1 %6206, %v4329_v54   ;;  %1169 = vperm.xlu0 %6205, %v4328_v56  }
  0x23   :  { %5336 = vmatpush1.bf16.msra.mxu1 %v6729_v27  ;;  %4719 = vmatmul.mubr.f32.vlgmr.msra.gmra.mrb[0].mxu0 %v6422_v4 }
  0x24   :  { %5369 = vmatprep.subr.bf16.mxu1 %v6420_v0  ;;  %5340 = vmatpush1.bf16.msra.mxu0 %v6744_v32 }
  0x25   :  { %347 = vmatprep.mubr.f32.mxu0 %v6422_v4  ;;  %5342 = vmatprep.subr.bf16.mxu0 %v6748_v35 }
  0x26   :  { %277 = vmatmul.mubr.f32.vlgmr.msra.gmra.mrb[0].mxu1 %v6422_v4  ;;  %1521 = vperm.xlu1 %6206, %v4328_v56  }
  0x27   :  { %5371 = vmatpush3.bf16.msra.mxu1 %v6488_v5  ;;  %4753 = vmatprep.mubr.msk.f32.mxu1 %vm6421_vm0, %v6422_v4 }
  0x28   :  { %5344 = vmatpush1.bf16.msra.mxu0 %v6773_v45  ;;  %5372 = vmatprep.subr.bf16.mxu1 %v6420_v0 }
  0x29   :  { %5346 = vmatprep.subr.bf16.mxu0 %v6778_v47  ;;  %1515 = vperm.xlu0 %6205, %v4329_v54  }
  0x2a   :  { %1866 = vperm.xlu1 %6206, %v4318_v44   ;;  %v203_v44 = vld [vmem:[%s8432_s3 + $0x1d8] sm:$0xff] }
  0x2b   :  { %5374 = vmatpush3.bf16.msra.mxu1 %v6514_v15  ;;  %v6888_v50 = vpack.c.bf16 %v207_v48, %v203_v44 }
  0x2c   :  { %5348 = vmatpush1.bf16.msra.mxu0 %v6802_v57  ;;  %5375 = vmatprep.subr.bf16.mxu1 %v6420_v0 }
  0x2d   :  { %5350 = vmatprep.subr.bf16.mxu0 %v6806_v58  ;;  %1860 = vperm.xlu0 %6205, %v4319_v41   ;;  %v198_v41 = vld [vmem:[%s8432_s3 + $0x1b0] sm:$0xff] }
  0x2e   :  { %2211 = vperm.xlu1 %6206, %v6711_v20   ;;  %v6884_v49 = vpack.c.bf16 %v198_v41, %v194_v40  ;;  %v206_v20 = vld [vmem:[%s8432_s3 + $0x1f0] sm:$0xff]  ;;  %v211_v41 = vld [vmem:[%s8434_s0 + $0x18] sm:$0xff] }
  0x2f   :  { %5377 = vmatpush3.bf16.msra.mxu1 %v6554_v28 }
  0x30   :  { %5352 = vmatpush1.bf16.msra.mxu0 %v6822_v3  ;;  %5378 = vmatprep.subr.bf16.mxu1 %v6420_v0 }
  0x31   :  { %5354 = vmatprep.subr.bf16.mxu0 %v6826_v6  ;;  %2205 = vperm.xlu0 %6205, %v6740_v31   ;;  %v6900_v31 = vpack.c.bf16 %v206_v20, %v202_v53 }
  0x32   :  { %2556 = vperm.xlu1 %6206, %v6702_v17  }
  0x33   :  { %5380 = vmatpush3.bf16.msra.mxu1 %v6582_v37 }
  0x34   :  { %5356 = vmatpush1.bf16.msra.mxu0 %v6842_v16  ;;  %5381 = vmatprep.subr.bf16.mxu1 %v6420_v0 }
  0x35   :  { %5358 = vmatprep.subr.bf16.mxu0 %v6846_v22  ;;  %2550 = vperm.xlu0 %6205, %v6725_v26   ;;  %v208_v26 = vld [vmem:[%s8434_s0] sm:$0xff] }
  0x37   :  { %5383 = vmatpush3.bf16.msra.mxu1 %v6610_v46 }
  0x38   :  { %5360 = vmatpush1.bf16.msra.mxu0 %v6862_v38  ;;  %5384 = vmatprep.subr.bf16.mxu1 %v6420_v0 }
  0x39   :  { %5362 = vmatprep.subr.bf16.mxu0 %v6866_v39 }
  0x3b   :  { %5386 = vmatpush3.bf16.msra.mxu1 %v6638_v55 }
  0x3c   :  { %5364 = vmatpush1.bf16.msra.mxu0 %v6884_v49  ;;  %5387 = vmatprep.subr.bf16.mxu1 %v6420_v0 }
  0x3d   :  { %5366 = vmatprep.subr.bf16.mxu0 %v6888_v50 }
  0x3f   :  { %5389 = vmatpush3.bf16.msra.mxu1 %v6666_v1 }
  0x40   :  { %5368 = vmatpush1.bf16.msra.mxu0 %v6900_v31  ;;  %5390 = vmatprep.subr.bf16.mxu1 %v6420_v0 }
  0x41   :  { %5394 = vmatprep.subr.bf16.mxu0 %v6500_v10 }
  0x43   :  { %348 = vmatmul.mubr.f32.vlgmr.msra.gmra.mrb[2].mxu0 %v6422_v4  ;;  %5392 = vmatpush3.bf16.msra.mxu1 %v6705_v18 }
  0x44   :  { %5396 = vmatpush1.bf16.msra.mxu0 %v6502_v11  ;;  %5426 = vmatprep.subr.bf16.mxu1 %v6714_v21 }
  0x45   :  { %5398 = vmatprep.subr.bf16.mxu0 %v6527_v19  ;;  %622 = vmatprep.mubr.f32.mxu0 %v6422_v4 }
  0x48   :  { %5400 = vmatpush1.bf16.msra.mxu0 %v6539_v23 }
  0x49   :  { %5402 = vmatprep.subr.bf16.mxu0 %v6545_v25 }
  0x4c   :  { %5404 = vmatpush1.bf16.msra.mxu0 %v6570_v33 }
  0x4d   :  { %5406 = vmatprep.subr.bf16.mxu0 %v6573_v34 }
  0x50   :  { %5408 = vmatpush1.bf16.msra.mxu0 %v6598_v42 }
  0x51   :  { %5410 = vmatprep.subr.bf16.mxu0 %v6601_v43 }
  0x54   :  { %5412 = vmatpush1.bf16.msra.mxu0 %v6626_v51 }
  0x55   :  { %5414 = vmatprep.subr.bf16.mxu0 %v6629_v52 }
  0x58   :  { %5416 = vmatpush1.bf16.msra.mxu0 %v6654_v60  ;;  %v6934_v60 = vld [vmem:[%s8435_s5] ss:$0 sm:$0xff] }
  0x59   :  { %5418 = vmatprep.subr.bf16.mxu0 %v6657_v61 }
  0x5c   :  { %5420 = vmatpush1.bf16.msra.mxu0 %v6682_v8 }
  0x5d   :  { %5422 = vmatprep.subr.bf16.mxu0 %v6691_v13 }
  0x60   :  { %5424 = vmatpush1.bf16.msra.mxu0 %v6729_v27 }
  0x61   :  { %5457 = vmatprep.subr.bf16.mxu0 %v6420_v0 }
  0x95   :  { %v130_v13 = vpop.permute.xlu0 %129 }
  0x99   :  { %v137_v63 = vpop.permute.xlu0 %136 }
  0x9a   :  { %v140_v9 = vsel %vm139_vm1, %v130_v13, %v137_v63 }
  0xf6   :  { %v121_v17 = vpop.f32.mrb[0].mxu0 }
  0xf7   :  { %v4720_v54 = vpop.f32.mrb[1].mxu0  ;;  %v122_v8 = vadd.f32 %v6934_v60, %v121_v17  ;;  %v210_v17 = vld [vmem:[%s8434_s0 + $0x10] sm:$0xff] }
  0xf9   :  { %v278_v56 = vpop.f32.mrb[0].mxu1 }
  0xfa   :  { %v279_v52 = vadd.f32 %v278_v56, %v208_v26  ;;  %v280_v59 = vpop.f32.mrb[1].mxu1 }
  0xfb   :  { %v281_v12 = vadd.f32 %v280_v59, %v209_v2 }
  0xfc   :  { %v4304_v61 = vmul.f32 -1.442695, %v279_v52 }
  0xfd   :  { %v4305_v29 = vmul.f32 -1.442695, %v281_v12 }
  0xfe   :  { %6209 = vpow2.f32 %v4304_v61 }
  0xff   :  { %6211 = vtanh.f32 %v122_v8 }
 0x108   :  { %v6210_v27 = vpop.eup %6209 }
 0x109   :  { %v366_v62 = vadd.f32 1.0, %v6210_v27  ;;  %v6212_v7 = vpop.eup %6211 }
 0x10a   :  { %v141_v14 = vsub.f32 0.0, %v6212_v7  ;;  %v142_v24 = vmul.f32 %v6212_v7, %v140_v9 }
 0x10b   :  { %6213 = vrcp.f32 %v366_v62 }
 0x10c   :  { %v143_v30 = vadd.f32 %v142_v24, %v141_v14  ;;  %6215 = vpow2.f32 %v4305_v29  ;;  %v4310_v24 = vld [vmem:[%s8434_s0 + $0x20] sm:$0xff] }
 0x115   :  { %v6214_v36 = vpop.eup %6213 }
 0x116   :  { %v378_v40 = vmul.f32 %v6214_v36, %v143_v30  ;;  %v349_v44 = vpop.f32.mrb[2].mxu0  ;;  %v6216_v54 = vpop.eup %6215 }
 0x117   :  { %v351_v48 = vpop.f32.mrb[3].mxu0  ;;  %v350_v26 = vadd.f32 %v349_v44, %v210_v17  ;;  %v367_v52 = vadd.f32 1.0, %v6216_v54  ;;  %v4311_v44 = vld [vmem:[%s8434_s0 + $0x28] sm:$0xff]  ;;  %v4313_v54 = vld [vmem:[%s8434_s0 + $0x38] sm:$0xff] }
 0x118   :  { %v352_v53 = vadd.f32 %v351_v48, %v211_v41 }
 0x119   :  { %v4306_v56 = vmul.f32 -1.442695, %v350_v26 }
 0x11a   :  { %v4307_v20 = vmul.f32 -1.442695, %v352_v53  ;;  %v476_v53 = vpop.permute.xlu1 %475 }
 0x11c   :  { %6217 = vpow2.f32 %v4307_v20 }
 0x11d   :  { %6219 = vpow2.f32 %v4306_v56 }
 0x11e   :  { %6221 = vrcp.f32 %v367_v52  ;;  %v483_v56 = vpop.permute.xlu1 %482 }
 0x126   :  { %v6218_v59 = vpop.eup %6217 }
 0x127   :  { %v369_v61 = vadd.f32 1.0, %v6218_v59  ;;  %v6220_v8 = vpop.eup %6219 }
 0x128   :  { %v6222_v13 = vpop.eup %6221  ;;  %v368_v62 = vadd.f32 1.0, %v6220_v8 }
 0x129   :  { %6223 = vrcp.f32 %v369_v61  ;;  %v485_v61 = vsel %vm139_vm1, %v476_v53, %v483_v56  ;;  %v1192_v53 = vld [vmem:[%s8432_s3 + $0x48] sm:$0xff] }
 0x12a   :  { %6225 = vrcp.f32 %v368_v62 }
 0x133   :  { %v6224_v27 = vpop.eup %6223 }
 0x134   :  { %v379_v63 = vmul.f32 %v6224_v27, %v6222_v13  ;;  %v6226_v7 = vpop.eup %6225 }
 0x136   :  { %v6947_v2 = vadd.f32 %v379_v63, %v378_v40 }
 0x138   :  { %6227 = vtanh.f32 %v6947_v2  ;;  %4754 = vmatmul.mubr.f32.vlgmr.msra.gmra.mrb[2].mxu1 %v6947_v2 }
 0x139   :  { %5428 = vmatpush1.bf16.msra.mxu1 %v6744_v32  ;;  %693 = vmatprep.mubr.f32.mxu1 %v6422_v4 }
 0x13a   :  { %5430 = vmatprep.subr.bf16.mxu1 %v6748_v35 }
 0x13d   :  { %5432 = vmatpush1.bf16.msra.mxu1 %v6773_v45 }
 0x13e   :  { %5434 = vmatprep.subr.bf16.mxu1 %v6778_v47 }
 0x141   :  { %5436 = vmatpush1.bf16.msra.mxu1 %v6802_v57 }
 0x142   :  { %v6228_v9 = vpop.eup %6227  ;;  %5438 = vmatprep.subr.bf16.mxu1 %v6806_v58 }
 0x143   :  { %v6958_v12 = vmul.f32 %v6228_v9, %v6226_v7  ;;  %v4312_v7 = vld [vmem:[%s8434_s0 + $0x30] sm:$0xff] }
 0x145   :  { %5440 = vmatpush1.bf16.msra.mxu1 %v6822_v3  ;;  %623 = vmatmul.mubr.f32.vlgmr.msra.gmra.mrb[4].mxu0 %v6958_v12 }
 0x146   :  { %5442 = vmatprep.subr.bf16.mxu1 %v6826_v6  ;;  %5459 = vmatpush3.bf16.msra.mxu0 %v6488_v5  ;;  %v877_v5 = vld [vmem:[%s8432_s3 + $0x148] sm:$0xff] }
 0x147   :  { %5460 = vmatprep.subr.bf16.mxu0 %v6420_v0  ;;  %4788 = vmatprep.mubr.msk.f32.mxu0 %vm6421_vm0, %v6422_v4 }
 0x149   :  { %5444 = vmatpush1.bf16.msra.mxu1 %v6842_v16 }
 0x14a   :  { %5446 = vmatprep.subr.bf16.mxu1 %v6846_v22  ;;  %5462 = vmatpush3.bf16.msra.mxu0 %v6514_v15  ;;  %v876_v15 = vld [vmem:[%s8432_s3 + $0x140] sm:$0xff] }
 0x14b   :  { %5463 = vmatprep.subr.bf16.mxu0 %v6420_v0 }
 0x14d   :  { %5448 = vmatpush1.bf16.msra.mxu1 %v6862_v38 }
 0x14e   :  { %5450 = vmatprep.subr.bf16.mxu1 %v6866_v39  ;;  %5465 = vmatpush3.bf16.msra.mxu0 %v6554_v28  ;;  %v889_v28 = vld [vmem:[%s8432_s3 + $0x1a8] sm:$0xff] }
 0x14f   :  { %5466 = vmatprep.subr.bf16.mxu0 %v6420_v0 }
 0x151   :  { %5452 = vmatpush1.bf16.msra.mxu1 %v6884_v49 }
 0x152   :  { %5454 = vmatprep.subr.bf16.mxu1 %v6888_v50  ;;  %5468 = vmatpush3.bf16.msra.mxu0 %v6582_v37  ;;  %v888_v37 = vld [vmem:[%s8432_s3 + $0x1a0] sm:$0xff] }
 0x153   :  { %5469 = vmatprep.subr.bf16.mxu0 %v6420_v0 }
 0x155   :  { %5456 = vmatpush1.bf16.msra.mxu1 %v6900_v31 }
 0x156   :  { %5482 = vmatprep.subr.bf16.mxu1 %v6500_v10  ;;  %5471 = vmatpush3.bf16.msra.mxu0 %v6610_v46  ;;  %v881_v10 = vld [vmem:[%s8432_s3 + $0x168] sm:$0xff] }
 0x157   :  { %5472 = vmatprep.subr.bf16.mxu0 %v6420_v0  ;;  %v897_v46 = vld [vmem:[%s8432_s3 + $0x1e8] sm:$0xff] }
 0x158   :  { %694 = vmatmul.mubr.f32.vlgmr.msra.gmra.mrb[4].mxu1 %v6958_v12 }
 0x159   :  { %5484 = vmatpush1.bf16.msra.mxu1 %v6502_v11  ;;  %969 = vmatprep.mubr.f32.mxu1 %v6422_v4  ;;  %v7006_v11 = vpack.c.bf16 %v881_v10, %v877_v5 }
 0x15a   :  { %5486 = vmatprep.subr.bf16.mxu1 %v6527_v19  ;;  %5474 = vmatpush3.bf16.msra.mxu0 %v6638_v55  ;;  %v880_v19 = vld [vmem:[%s8432_s3 + $0x160] sm:$0xff] }
 0x15b   :  { %5475 = vmatprep.subr.bf16.mxu0 %v6420_v0  ;;  %v892_v55 = vld [vmem:[%s8432_s3 + $0x1c0] sm:$0xff] }
 0x15d   :  { %5488 = vmatpush1.bf16.msra.mxu1 %v6539_v23  ;;  %v7014_v23 = vpack.c.bf16 %v880_v19, %v876_v15 }
 0x15e   :  { %5490 = vmatprep.subr.bf16.mxu1 %v6545_v25  ;;  %5477 = vmatpush3.bf16.msra.mxu0 %v6666_v1  ;;  %v885_v25 = vld [vmem:[%s8432_s3 + $0x188] sm:$0xff]  ;;  %v896_v1 = vld [vmem:[%s8432_s3 + $0x1e0] sm:$0xff] }
 0x15f   :  { %5478 = vmatprep.subr.bf16.mxu0 %v6420_v0 }
 0x161   :  { %5492 = vmatpush1.bf16.msra.mxu1 %v6570_v33  ;;  %v7024_v33 = vpack.c.bf16 %v889_v28, %v885_v25 }
 0x162   :  { %5494 = vmatprep.subr.bf16.mxu1 %v6573_v34  ;;  %5480 = vmatpush3.bf16.msra.mxu0 %v6705_v18  ;;  %v884_v34 = vld [vmem:[%s8432_s3 + $0x180] sm:$0xff]  ;;  %v7050_v18 = vpack.c.bf16 %v896_v1, %v892_v55 }
 0x163   :  { %5514 = vmatprep.subr.bf16.mxu0 %v6714_v21 }
 0x165   :  { %5496 = vmatpush1.bf16.msra.mxu1 %v6598_v42  ;;  %v7032_v42 = vpack.c.bf16 %v888_v37, %v884_v34 }
 0x166   :  { %5498 = vmatprep.subr.bf16.mxu1 %v6601_v43  ;;  %v893_v43 = vld [vmem:[%s8432_s3 + $0x1c8] sm:$0xff] }
 0x169   :  { %5500 = vmatpush1.bf16.msra.mxu1 %v6626_v51  ;;  %v7042_v51 = vpack.c.bf16 %v897_v46, %v893_v43 }
 0x16a   :  { %5502 = vmatprep.subr.bf16.mxu1 %v7006_v11 }
 0x16d   :  { %5504 = vmatpush1.bf16.msra.mxu1 %v7014_v23 }
 0x16e   :  { %5506 = vmatprep.subr.bf16.mxu1 %v7024_v33 }
 0x171   :  { %5508 = vmatpush1.bf16.msra.mxu1 %v7032_v42 }
 0x172   :  { %5510 = vmatprep.subr.bf16.mxu1 %v7042_v51 }
 0x175   :  { %5512 = vmatpush1.bf16.msra.mxu1 %v7050_v18 }
 0x176   :  { %5545 = vmatprep.subr.bf16.mxu1 %v6420_v0 }
 0x20b   :  { %v466_v21 = vpop.f32.mrb[2].mxu1 }
 0x20c   :  { %v4755_v14 = vpop.f32.mrb[3].mxu1  ;;  %v467_v41 = vadd.f32 %v6934_v60, %v466_v21 }
 0x218   :  { %v624_v29 = vpop.f32.mrb[4].mxu0 }
 0x219   :  { %v625_v30 = vadd.f32 %v4310_v24, %v624_v29  ;;  %v626_v36 = vpop.f32.mrb[5].mxu0 }
 0x21a   :  { %v627_v48 = vadd.f32 %v4311_v44, %v626_v36  ;;  %v1187_v36 = vld [vmem:[%s8432_s3 + $0x20] sm:$0xff]  ;;  %v1087_v44 = vld [vmem:[%s8431_s4 + $0x48] sm:$0xff] }
 0x21b   :  { %v4314_v40 = vmul.f32 -1.442695, %v625_v30  ;;  %v1183_v30 = vld [vmem:[%s8432_s3] sm:$0xff] }
 0x21c   :  { %v4315_v26 = vmul.f32 -1.442695, %v627_v48 }
 0x21d   :  { %6229 = vpow2.f32 %v4314_v40  ;;  %v7150_v40 = vpack.c.bf16 %v1187_v36, %v1183_v30 }
 0x21e   :  { %6231 = vtanh.f32 %v467_v41  ;;  %v1086_v41 = vld [vmem:[%s8431_s4 + $0x40] sm:$0xff] }
 0x21f   :  { %v7161_v48 = vpack.c.bf16 %v1087_v44, %v1086_v41  ;;  %v4321_v44 = vld [vmem:[%s8434_s0 + $0x48] sm:$0xff] }
 0x227   :  { %v6230_v20 = vpop.eup %6229 }
 0x228   :  { %v712_v17 = vadd.f32 1.0, %v6230_v20  ;;  %v6232_v59 = vpop.eup %6231  ;;  %v1196_v20 = vld [vmem:[%s8432_s3 + $0x68] sm:$0xff] }
 0x229   :  { %v486_v27 = vsub.f32 %v6947_v2, %v6232_v59  ;;  %v487_v62 = vmul.f32 %v6232_v59, %v485_v61  ;;  %v1089_v59 = vld [vmem:[%s8431_s4 + $0x58] sm:$0xff]  ;;  %v1200_v61 = vld [vmem:[%s8432_s3 + $0x88] sm:$0xff] }
 0x22a   :  { %6233 = vrcp.f32 %v712_v17  ;;  %v7169_v17 = vpack.c.bf16 %v1196_v20, %v1192_v53 }
 0x22b   :  { %v695_v52 = vpop.f32.mrb[4].mxu1  ;;  %6235 = vpow2.f32 %v4315_v26  ;;  %v488_v5 = vadd.f32 %v487_v62, %v486_v27  ;;  %v1191_v26 = vld [vmem:[%s8432_s3 + $0x40] sm:$0xff] }
 0x22c   :  { %v697_v8 = vpop.f32.mrb[5].mxu1  ;;  %v696_v9 = vadd.f32 %v4312_v7, %v695_v52  ;;  %v1088_v52 = vld [vmem:[%s8431_s4 + $0x50] sm:$0xff]  ;;  %v1199_v27 = vld [vmem:[%s8432_s3 + $0x80] sm:$0xff] }
 0x22d   :  { %v698_v13 = vadd.f32 %v4313_v54, %v697_v8  ;;  %v1195_v54 = vld [vmem:[%s8432_s3 + $0x60] sm:$0xff]  ;;  %v7192_v8 = vpack.c.bf16 %v1089_v59, %v1088_v52  ;;  %v4323_v52 = vld [vmem:[%s8434_s0 + $0x58] sm:$0xff] }
 0x22e   :  { %v4316_v25 = vmul.f32 -1.442695, %v696_v9  ;;  %v7178_v56 = vpack.c.bf16 %v1195_v54, %v1191_v26  ;;  %v1203_v62 = vld [vmem:[%s8432_s3 + $0xa0] sm:$0xff] }
 0x22f   :  { %v4317_v63 = vmul.f32 -1.442695, %v698_v13  ;;  %v1204_v13 = vld [vmem:[%s8432_s3 + $0xa8] sm:$0xff]  ;;  %v7205_v7 = vpack.c.bf16 %v1203_v62, %v1199_v27  ;;  %v1090_v9 = vld [vmem:[%s8431_s4 + $0x60] sm:$0xff]  ;;  %v830_v27 = vpop.permute.xlu1 %829  ;;  %v823_v62 = vpop.permute.xlu0 %822 }
 0x231   :  { %6237 = vpow2.f32 %v4317_v63  ;;  %v7203_v63 = vpack.c.bf16 %v1204_v13, %v1200_v61 }
 0x232   :  { %6239 = vpow2.f32 %v4316_v25  ;;  %v1207_v25 = vld [vmem:[%s8432_s3 + $0xc0] sm:$0xff] }
 0x234   :  { %v6234_v10 = vpop.eup %6233 }
 0x235   :  { %v724_v15 = vmul.f32 %v6234_v10, %v488_v5  ;;  %v6236_v19 = vpop.eup %6235  ;;  %v1091_v5 = vld [vmem:[%s8431_s4 + $0x68] sm:$0xff] }
 0x236   :  { %v713_v28 = vadd.f32 1.0, %v6236_v19  ;;  %v1208_v10 = vld [vmem:[%s8432_s3 + $0xc8] sm:$0xff] }
 0x237   :  { %v1212_v19 = vld [vmem:[%s8432_s3 + $0xe8] sm:$0xff] }
 0x238   :  { %6241 = vrcp.f32 %v713_v28  ;;  %v1211_v28 = vld [vmem:[%s8432_s3 + $0xe0] sm:$0xff] }
 0x23b   :  { %v6238_v34 = vpop.eup %6237 }
 0x23c   :  { %v715_v37 = vadd.f32 1.0, %v6238_v34  ;;  %v6240_v2 = vpop.eup %6239  ;;  %v7230_v34 = vpack.c.bf16 %v1212_v19, %v1208_v10 }
 0x23d   :  { %v714_v55 = vadd.f32 1.0, %v6240_v2  ;;  %v1093_v2 = vld [vmem:[%s8431_s4 + $0x78] sm:$0xff] }
 0x23e   :  { %6243 = vrcp.f32 %v715_v37  ;;  %v1092_v37 = vld [vmem:[%s8431_s4 + $0x70] sm:$0xff] }
 0x23f   :  { %6245 = vrcp.f32 %v714_v55  ;;  %v1220_v55 = vld [vmem:[%s8432_s3 + $0x128] sm:$0xff] }
 0x242   :  { %v6242_v43 = vpop.eup %6241 }
 0x248   :  { %v6244_v46 = vpop.eup %6243 }
 0x249   :  { %v725_v1 = vmul.f32 %v6244_v46, %v6242_v43  ;;  %v6246_v14 = vpop.eup %6245  ;;  %v1216_v43 = vld [vmem:[%s8432_s3 + $0x108] sm:$0xff]  ;;  %v7242_v46 = vpack.c.bf16 %v1211_v28, %v1207_v25  ;;  %v4322_v28 = vld [vmem:[%s8434_s0 + $0x50] sm:$0xff] }
 0x24b   :  { %v7070_v21 = vadd.f32 %v725_v1, %v724_v15  ;;  %v7217_v15 = vpack.c.bf16 %v1091_v5, %v1090_v9  ;;  %v1215_v1 = vld [vmem:[%s8432_s3 + $0x100] sm:$0xff]  ;;  %v832_v5 = vsel %vm139_vm1, %v823_v62, %v830_v27  ;;  %v1201_v62 = vld [vmem:[%s8432_s3 + $0x90] sm:$0xff] }
 0x24d   :  { %6247 = vtanh.f32 %v7070_v21  ;;  %4789 = vmatmul.mubr.f32.vlgmr.msra.gmra.mrb[6].mxu0 %v7070_v21 }
 0x24e   :  { %5516 = vmatpush1.bf16.msra.mxu0 %v6744_v32  ;;  %1040 = vmatprep.mubr.f32.mxu0 %v6422_v4  ;;  %v1078_v32 = vld [vmem:[%s8431_s4] sm:$0xff] }
 0x24f   :  { %5518 = vmatprep.subr.bf16.mxu0 %v6748_v35  ;;  %v1079_v35 = vld [vmem:[%s8431_s4 + $0x8] sm:$0xff] }
 0x252   :  { %5520 = vmatpush1.bf16.msra.mxu0 %v6773_v45  ;;  %v7103_v45 = vpack.c.bf16 %v1079_v35, %v1078_v32  ;;  %v1186_v32 = vld [vmem:[%s8432_s3 + $0x18] sm:$0xff] }
 0x253   :  { %5522 = vmatprep.subr.bf16.mxu0 %v6778_v47  ;;  %v1080_v47 = vld [vmem:[%s8431_s4 + $0x10] sm:$0xff]  ;;  %v1190_v35 = vld [vmem:[%s8432_s3 + $0x38] sm:$0xff] }
 0x256   :  { %5524 = vmatpush1.bf16.msra.mxu0 %v6802_v57  ;;  %v1081_v57 = vld [vmem:[%s8431_s4 + $0x18] sm:$0xff] }
 0x257   :  { %v6248_v24 = vpop.eup %6247  ;;  %5526 = vmatprep.subr.bf16.mxu0 %v6806_v58  ;;  %v7113_v58 = vpack.c.bf16 %v1081_v57, %v1080_v47  ;;  %v7263_v47 = vpack.c.bf16 %v1093_v2, %v1092_v37  ;;  %v7266_v57 = vpack.c.bf16 %v1190_v35, %v1186_v32 }
 0x258   :  { %v7081_v29 = vmul.f32 %v6248_v24, %v6246_v14  ;;  %v7251_v14 = vpack.c.bf16 %v1220_v55, %v1216_v43  ;;  %v1219_v24 = vld [vmem:[%s8432_s3 + $0x120] sm:$0xff] }
 0x25a   :  { %5528 = vmatpush1.bf16.msra.mxu0 %v6822_v3  ;;  %970 = vmatmul.mubr.f32.vlgmr.msra.gmra.mrb[6].mxu1 %v7081_v29  ;;  %v1082_v3 = vld [vmem:[%s8431_s4 + $0x20] sm:$0xff] }
 0x25b   :  { %5530 = vmatprep.subr.bf16.mxu0 %v6826_v6  ;;  %4823 = vmatprep.mubr.msk.f32.mxu1 %vm6421_vm0, %v6422_v4  ;;  %v1083_v6 = vld [vmem:[%s8431_s4 + $0x28] sm:$0xff] }
 0x25c   :  { %5547 = vmatpush3.bf16.msra.mxu1 %v7103_v45 }
 0x25d   :  { %5548 = vmatprep.subr.bf16.mxu1 %v6420_v0 }
 0x25e   :  { %5532 = vmatpush1.bf16.msra.mxu0 %v6842_v16  ;;  %v7123_v16 = vpack.c.bf16 %v1083_v6, %v1082_v3  ;;  %v7269_v3 = vpack.c.bf16 %v1219_v24, %v1215_v1 }
 0x25f   :  { %5534 = vmatprep.subr.bf16.mxu0 %v6846_v22  ;;  %v1084_v22 = vld [vmem:[%s8431_s4 + $0x30] sm:$0xff] }
 0x260   :  { %5550 = vmatpush3.bf16.msra.mxu1 %v7113_v58 }
 0x261   :  { %5551 = vmatprep.subr.bf16.mxu1 %v6420_v0 }
 0x262   :  { %5536 = vmatpush1.bf16.msra.mxu0 %v6862_v38  ;;  %v1085_v38 = vld [vmem:[%s8431_s4 + $0x38] sm:$0xff] }
 0x263   :  { %5538 = vmatprep.subr.bf16.mxu0 %v6866_v39  ;;  %v7133_v39 = vpack.c.bf16 %v1085_v38, %v1084_v22  ;;  %v4320_v38 = vld [vmem:[%s8434_s0 + $0x40] sm:$0xff] }
 0x264   :  { %5553 = vmatpush3.bf16.msra.mxu1 %v7123_v16 }
 0x265   :  { %5554 = vmatprep.subr.bf16.mxu1 %v6420_v0 }
 0x266   :  { %5540 = vmatpush1.bf16.msra.mxu0 %v6884_v49  ;;  %v1184_v49 = vld [vmem:[%s8432_s3 + $0x8] sm:$0xff] }
 0x267   :  { %5542 = vmatprep.subr.bf16.mxu0 %v6888_v50  ;;  %v1188_v50 = vld [vmem:[%s8432_s3 + $0x28] sm:$0xff] }
 0x268   :  { %5556 = vmatpush3.bf16.msra.mxu1 %v7133_v39 }
 0x269   :  { %5557 = vmatprep.subr.bf16.mxu1 %v6420_v0 }
 0x26a   :  { %5544 = vmatpush1.bf16.msra.mxu0 %v6900_v31  ;;  %v7141_v31 = vpack.c.bf16 %v1188_v50, %v1184_v49 }
 0x26c   :  { %5570 = vmatprep.subr.bf16.mxu0 %v7141_v31  ;;  %5559 = vmatpush3.bf16.msra.mxu1 %v7161_v48 }
 0x26d   :  { %1041 = vmatmul.mubr.f32.vlgmr.msra.gmra.mrb[8].mxu0 %v7081_v29  ;;  %5560 = vmatprep.subr.bf16.mxu1 %v6420_v0 }
 0x26e   :  { %1316 = vmatprep.mubr.f32.mxu0 %v6422_v4  ;;  %5572 = vmatpush1.bf16.msra.mxu0 %v7150_v40 }
 0x26f   :  { %5574 = vmatprep.subr.bf16.mxu0 %v7169_v17 }
 0x270   :  { %5562 = vmatpush3.bf16.msra.mxu1 %v7192_v8 }
 0x271   :  { %5563 = vmatprep.subr.bf16.mxu1 %v6420_v0 }
 0x272   :  { %5576 = vmatpush1.bf16.msra.mxu0 %v7178_v56 }
 0x273   :  { %5578 = vmatprep.subr.bf16.mxu0 %v7203_v63 }
 0x274   :  { %5565 = vmatpush3.bf16.msra.mxu1 %v7217_v15 }
 0x275   :  { %5566 = vmatprep.subr.bf16.mxu1 %v6420_v0 }
 0x276   :  { %5580 = vmatpush1.bf16.msra.mxu0 %v7205_v7 }
 0x277   :  { %5582 = vmatprep.subr.bf16.mxu0 %v7230_v34 }
 0x278   :  { %5568 = vmatpush3.bf16.msra.mxu1 %v7263_v47 }
 0x279   :  { %5602 = vmatprep.subr.bf16.mxu1 %v7266_v57 }
 0x27a   :  { %5584 = vmatpush1.bf16.msra.mxu0 %v7242_v46 }
 0x27b   :  { %5586 = vmatprep.subr.bf16.mxu0 %v7251_v14 }
 0x27e   :  { %5588 = vmatpush1.bf16.msra.mxu0 %v7269_v3 }
 0x27f   :  { %5590 = vmatprep.subr.bf16.mxu0 %v7006_v11 }
 0x282   :  { %5592 = vmatpush1.bf16.msra.mxu0 %v7014_v23 }
 0x283   :  { %5594 = vmatprep.subr.bf16.mxu0 %v7024_v33 }
 0x286   :  { %5596 = vmatpush1.bf16.msra.mxu0 %v7032_v42 }
 0x287   :  { %5598 = vmatprep.subr.bf16.mxu0 %v7042_v51 }
 0x28a   :  { %5600 = vmatpush1.bf16.msra.mxu0 %v7050_v18 }
 0x28b   :  { %5633 = vmatprep.subr.bf16.mxu0 %v6420_v0 }
 0x320   :  { %v813_v6 = vpop.f32.mrb[6].mxu0 }
 0x321   :  { %v4790_v22 = vpop.f32.mrb[7].mxu0  ;;  %v814_v41 = vadd.f32 %v6934_v60, %v813_v6 }
 0x32d   :  { %v971_v49 = vpop.f32.mrb[6].mxu1 }
 0x32e   :  { %v972_v50 = vadd.f32 %v4320_v38, %v971_v49  ;;  %v973_v30 = vpop.f32.mrb[7].mxu1  ;;  %v1185_v38 = vld [vmem:[%s8432_s3 + $0x10] sm:$0xff] }
 0x32f   :  { %v974_v53 = vadd.f32 %v4321_v44, %v973_v30  ;;  %v1189_v49 = vld [vmem:[%s8432_s3 + $0x30] sm:$0xff] }
 0x330   :  { %v4324_v36 = vmul.f32 -1.442695, %v972_v50 }
 0x331   :  { %v4325_v54 = vmul.f32 -1.442695, %v974_v53  ;;  %v7309_v53 = vpack.c.bf16 %v1189_v49, %v1185_v38  ;;  %v1230_v38 = vld [vmem:[%s8432_s3 + $0x178] sm:$0xff] }
 0x332   :  { %6249 = vpow2.f32 %v4324_v36  ;;  %v1194_v36 = vld [vmem:[%s8432_s3 + $0x58] sm:$0xff] }
 0x333   :  { %6251 = vtanh.f32 %v814_v41  ;;  %v1198_v41 = vld [vmem:[%s8432_s3 + $0x78] sm:$0xff] }
 0x33c   :  { %v6250_v20 = vpop.eup %6249 }
 0x33d   :  { %v1059_v26 = vadd.f32 1.0, %v6250_v20  ;;  %v6252_v61 = vpop.eup %6251 }
 0x33e   :  { %v833_v10 = vsub.f32 %v7070_v21, %v6252_v61  ;;  %v834_v19 = vmul.f32 %v6252_v61, %v832_v5  ;;  %v1206_v61 = vld [vmem:[%s8432_s3 + $0xb8] sm:$0xff] }
 0x33f   :  { %6253 = vrcp.f32 %v1059_v26  ;;  %v7313_v26 = vpack.c.bf16 %v1198_v41, %v1194_v36  ;;  %v1210_v5 = vld [vmem:[%s8432_s3 + $0xd8] sm:$0xff]  ;;  %v1229_v36 = vld [vmem:[%s8432_s3 + $0x170] sm:$0xff] }
 0x340   :  { %v1042_v59 = vpop.f32.mrb[8].mxu0  ;;  %6255 = vpow2.f32 %v4325_v54  ;;  %v835_v2 = vadd.f32 %v834_v19, %v833_v10  ;;  %v1193_v54 = vld [vmem:[%s8432_s3 + $0x50] sm:$0xff]  ;;  %v1214_v10 = vld [vmem:[%s8432_s3 + $0xf8] sm:$0xff] }
 0x341   :  { %v1044_v13 = vpop.f32.mrb[9].mxu0  ;;  %v1043_v37 = vadd.f32 %v4322_v28, %v1042_v59  ;;  %v1202_v59 = vld [vmem:[%s8432_s3 + $0x98] sm:$0xff]  ;;  %v1209_v28 = vld [vmem:[%s8432_s3 + $0xd0] sm:$0xff] }
 0x342   :  { %v1045_v9 = vadd.f32 %v4323_v52, %v1044_v13  ;;  %v1197_v52 = vld [vmem:[%s8432_s3 + $0x70] sm:$0xff]  ;;  %v7334_v27 = vpack.c.bf16 %v1206_v61, %v1202_v59  ;;  %v1234_v41 = vld [vmem:[%s8432_s3 + $0x198] sm:$0xff] }
 0x343   :  { %v4326_v24 = vmul.f32 -1.442695, %v1043_v37  ;;  %v7330_v13 = vpack.c.bf16 %v1197_v52, %v1193_v54  ;;  %v1213_v37 = vld [vmem:[%s8432_s3 + $0xf0] sm:$0xff] }
 0x344   :  { %v4327_v25 = vmul.f32 -1.442695, %v1045_v9  ;;  %v1205_v9 = vld [vmem:[%s8432_s3 + $0xb0] sm:$0xff] }
 0x345   :  { %v7349_v19 = vpack.c.bf16 %v1205_v9, %v1201_v62  ;;  %v1233_v59 = vld [vmem:[%s8432_s3 + $0x190] sm:$0xff]  ;;  %v1242_v62 = vld [vmem:[%s8432_s3 + $0x1d8] sm:$0xff] }
 0x346   :  { %6257 = vpow2.f32 %v4327_v25  ;;  %v7352_v25 = vpack.c.bf16 %v1214_v10, %v1210_v5  ;;  %v1237_v61 = vld [vmem:[%s8432_s3 + $0x1b0] sm:$0xff]  ;;  %v1246_v9 = vld [vmem:[%s8432_s3 + $0x1f8] sm:$0xff] }
 0x347   :  { %6259 = vpow2.f32 %v4326_v24  ;;  %v7430_v5 = vpack.c.bf16 %v1237_v61, %v1233_v59  ;;  %v7433_v10 = vpack.c.bf16 %v1246_v9, %v1242_v62  ;;  %v1177_v59 = vpop.permute.xlu1 %1176 }
 0x349   :  { %v6254_v43 = vpop.eup %6253 }
 0x34a   :  { %v1071_v55 = vmul.f32 %v6254_v43, %v835_v2  ;;  %v6256_v1 = vpop.eup %6255  ;;  %v1218_v2 = vld [vmem:[%s8432_s3 + $0x118] sm:$0xff] }
 0x34b   :  { %v1060_v32 = vadd.f32 1.0, %v6256_v1  ;;  %v1222_v43 = vld [vmem:[%s8432_s3 + $0x138] sm:$0xff]  ;;  %v7367_v1 = vpack.c.bf16 %v1213_v37, %v1209_v28  ;;  %v1241_v28 = vld [vmem:[%s8432_s3 + $0x1d0] sm:$0xff] }
 0x34c   :  { %v1245_v37 = vld [vmem:[%s8432_s3 + $0x1f0] sm:$0xff] }
 0x34d   :  { %6261 = vrcp.f32 %v1060_v32  ;;  %v7370_v32 = vpack.c.bf16 %v1222_v43, %v1218_v2  ;;  %v7444_v2 = vpack.c.bf16 %v1245_v37, %v1241_v28 }
 0x350   :  { %v6258_v35 = vpop.eup %6257 }
 0x351   :  { %v1062_v6 = vadd.f32 1.0, %v6258_v35  ;;  %v6260_v21 = vpop.eup %6259  ;;  %v1217_v35 = vld [vmem:[%s8432_s3 + $0x110] sm:$0xff] }
 0x352   :  { %v1061_v30 = vadd.f32 1.0, %v6260_v21 }
 0x353   :  { %6263 = vrcp.f32 %v1062_v6  ;;  %v1221_v6 = vld [vmem:[%s8432_s3 + $0x130] sm:$0xff] }
 0x354   :  { %6265 = vrcp.f32 %v1061_v30  ;;  %v7388_v49 = vpack.c.bf16 %v1221_v6, %v1217_v35  ;;  %v1225_v30 = vld [vmem:[%s8432_s3 + $0x150] sm:$0xff] }
 0x355   :  { %v7410_v54 = vpack.c.bf16 %v1229_v36, %v1225_v30  ;;  %v4333_v30 = vld [vmem:[%s8434_s0 + $0x78] sm:$0xff] }
 0x357   :  { %v6262_v22 = vpop.eup %6261 }
 0x35d   :  { %v6264_v50 = vpop.eup %6263 }
 0x35e   :  { %v1072_v44 = vmul.f32 %v6264_v50, %v6262_v22  ;;  %v1226_v22 = vld [vmem:[%s8432_s3 + $0x158] sm:$0xff] }
 0x35f   :  { %v7391_v50 = vpack.c.bf16 %v1230_v38, %v1226_v22 }
 0x360   :  { %v7311_v20 = vadd.f32 %v1072_v44, %v1071_v55  ;;  %v6266_v55 = vpop.eup %6265  ;;  %v1238_v44 = vld [vmem:[%s8432_s3 + $0x1b8] sm:$0xff] }
 0x361   :  { %v7413_v52 = vpack.c.bf16 %v1238_v44, %v1234_v41 }
 0x362   :  { %6267 = vtanh.f32 %v7311_v20  ;;  %4824 = vmatmul.mubr.f32.vlgmr.msra.gmra.mrb[8].mxu1 %v7311_v20 }
 0x363   :  { %5604 = vmatpush1.bf16.msra.mxu1 %v7309_v53  ;;  %1387 = vmatprep.mubr.f32.mxu1 %v6422_v4 }
 0x364   :  { %5606 = vmatprep.subr.bf16.mxu1 %v7313_v26 }
 0x367   :  { %5608 = vmatpush1.bf16.msra.mxu1 %v7330_v13 }
 0x368   :  { %5610 = vmatprep.subr.bf16.mxu1 %v7334_v27 }
 0x36b   :  { %5612 = vmatpush1.bf16.msra.mxu1 %v7349_v19 }
 0x36c   :  { %v6268_v24 = vpop.eup %6267  ;;  %5614 = vmatprep.subr.bf16.mxu1 %v7352_v25 }
 0x36d   :  { %v7378_v21 = vmul.f32 %v6268_v24, %v6266_v55  ;;  %v4330_v24 = vld [vmem:[%s8434_s0 + $0x60] sm:$0xff] }
 0x36f   :  { %5616 = vmatpush1.bf16.msra.mxu1 %v7367_v1  ;;  %1317 = vmatmul.mubr.f32.vlgmr.msra.gmra.mrb[10].mxu0 %v7378_v21 }
 0x370   :  { %5618 = vmatprep.subr.bf16.mxu1 %v7370_v32  ;;  %5635 = vmatpush3.bf16.msra.mxu0 %v7103_v45 }
 0x371   :  { %5636 = vmatprep.subr.bf16.mxu0 %v6420_v0  ;;  %4858 = vmatprep.mubr.msk.f32.mxu0 %vm6421_vm0, %v6422_v4 }
 0x373   :  { %5620 = vmatpush1.bf16.msra.mxu1 %v7388_v49 }
 0x374   :  { %5622 = vmatprep.subr.bf16.mxu1 %v7391_v50  ;;  %5638 = vmatpush3.bf16.msra.mxu0 %v7113_v58 }
 0x375   :  { %5639 = vmatprep.subr.bf16.mxu0 %v6420_v0 }
 0x377   :  { %5624 = vmatpush1.bf16.msra.mxu1 %v7410_v54 }
 0x378   :  { %5626 = vmatprep.subr.bf16.mxu1 %v7413_v52  ;;  %5641 = vmatpush3.bf16.msra.mxu0 %v7123_v16 }
 0x379   :  { %5642 = vmatprep.subr.bf16.mxu0 %v6420_v0 }
 0x37b   :  { %5628 = vmatpush1.bf16.msra.mxu1 %v7430_v5 }
 0x37c   :  { %5630 = vmatprep.subr.bf16.mxu1 %v7433_v10  ;;  %5644 = vmatpush3.bf16.msra.mxu0 %v7133_v39 }
 0x37d   :  { %5645 = vmatprep.subr.bf16.mxu0 %v6420_v0 }
 0x37f   :  { %5632 = vmatpush1.bf16.msra.mxu1 %v7444_v2 }
 0x380   :  { %5658 = vmatprep.subr.bf16.mxu1 %v7141_v31  ;;  %5647 = vmatpush3.bf16.msra.mxu0 %v7161_v48 }
 0x381   :  { %5648 = vmatprep.subr.bf16.mxu0 %v6420_v0 }
 0x382   :  { %1388 = vmatmul.mubr.f32.vlgmr.msra.gmra.mrb[10].mxu1 %v7378_v21 }
 0x383   :  { %5660 = vmatpush1.bf16.msra.mxu1 %v7150_v40  ;;  %1661 = vmatprep.mubr.f32.mxu1 %v6422_v4 }
 0x384   :  { %5662 = vmatprep.subr.bf16.mxu1 %v7169_v17  ;;  %5650 = vmatpush3.bf16.msra.mxu0 %v7192_v8 }
 0x385   :  { %5651 = vmatprep.subr.bf16.mxu0 %v6420_v0 }
 0x387   :  { %5664 = vmatpush1.bf16.msra.mxu1 %v7178_v56 }
 0x388   :  { %5666 = vmatprep.subr.bf16.mxu1 %v7203_v63  ;;  %5653 = vmatpush3.bf16.msra.mxu0 %v7217_v15 }
 0x389   :  { %5654 = vmatprep.subr.bf16.mxu0 %v6420_v0 }
 0x38b   :  { %5668 = vmatpush1.bf16.msra.mxu1 %v7205_v7 }
 0x38c   :  { %5670 = vmatprep.subr.bf16.mxu1 %v7230_v34  ;;  %5656 = vmatpush3.bf16.msra.mxu0 %v7263_v47 }
 0x38d   :  { %5690 = vmatprep.subr.bf16.mxu0 %v7266_v57 }
 0x38f   :  { %5672 = vmatpush1.bf16.msra.mxu1 %v7242_v46 }
 0x390   :  { %5674 = vmatprep.subr.bf16.mxu1 %v7251_v14 }
 0x393   :  { %5676 = vmatpush1.bf16.msra.mxu1 %v7269_v3 }
 0x394   :  { %5678 = vmatprep.subr.bf16.mxu1 %v7006_v11 }
 0x397   :  { %5680 = vmatpush1.bf16.msra.mxu1 %v7014_v23 }
 0x398   :  { %5682 = vmatprep.subr.bf16.mxu1 %v7024_v33 }
 0x39b   :  { %5684 = vmatpush1.bf16.msra.mxu1 %v7032_v42  ;;  %v4331_v42 = vld [vmem:[%s8434_s0 + $0x68] sm:$0xff] }
 0x39c   :  { %5686 = vmatprep.subr.bf16.mxu1 %v7042_v51 }
 0x39f   :  { %5688 = vmatpush1.bf16.msra.mxu1 %v7050_v18 }
 0x3a0   :  { %5721 = vmatprep.subr.bf16.mxu1 %v6420_v0 }
 0x435   :  { %v1160_v43 = vpop.f32.mrb[8].mxu1 }
 0x436   :  { %v4825_v55 = vpop.f32.mrb[9].mxu1  ;;  %v1161_v33 = vadd.f32 %v6934_v60, %v1160_v43  ;;  %v1170_v60 = vpop.permute.xlu0 %1169  ;;  %v4332_v43 = vld [vmem:[%s8434_s0 + $0x70] sm:$0xff] }
 0x437   :  { %v1179_v62 = vsel %vm139_vm1, %v1170_v60, %v1177_v59 }
 0x442   :  { %v1318_v35 = vpop.f32.mrb[10].mxu0 }
 0x443   :  { %v1319_v11 = vadd.f32 %v4330_v24, %v1318_v35  ;;  %v1320_v6 = vpop.f32.mrb[11].mxu0 }
 0x444   :  { %v1321_v51 = vadd.f32 %v4331_v42, %v1320_v6 }
 0x445   :  { %v4334_v23 = vmul.f32 -1.442695, %v1319_v11 }
 0x446   :  { %v4335_v38 = vmul.f32 -1.442695, %v1321_v51 }
 0x447   :  { %6269 = vpow2.f32 %v4334_v23 }
 0x448   :  { %6271 = vtanh.f32 %v1161_v33 }
 0x451   :  { %v6270_v18 = vpop.eup %6269 }
 0x452   :  { %v1406_v22 = vadd.f32 1.0, %v6270_v18  ;;  %v6272_v41 = vpop.eup %6271 }
 0x453   :  { %v1180_v9 = vsub.f32 %v7311_v20, %v6272_v41  ;;  %v1181_v28 = vmul.f32 %v6272_v41, %v1179_v62 }
 0x454   :  { %6273 = vrcp.f32 %v1406_v22 }
 0x455   :  { %v1389_v36 = vpop.f32.mrb[10].mxu1  ;;  %6275 = vpow2.f32 %v4335_v38  ;;  %v1182_v24 = vadd.f32 %v1181_v28, %v1180_v9 }
 0x456   :  { %v1391_v44 = vpop.f32.mrb[11].mxu1  ;;  %v1390_v55 = vadd.f32 %v4332_v43, %v1389_v36  ;;  %v7606_v43 = vld [vmem:[%s8435_s5] ss:$0 sm:$0xff] }
 0x457   :  { %v1392_v61 = vadd.f32 %v4333_v30, %v1391_v44 }
 0x458   :  { %v4336_v23 = vmul.f32 -1.442695, %v1390_v55 }
 0x459   :  { %v4337_v37 = vmul.f32 -1.442695, %v1392_v61  ;;  %v4340_v61 = vld [vmem:[%s8434_s0 + $0x80] sm:$0xff] }
 0x45b   :  { %6277 = vpow2.f32 %v4337_v37 }
 0x45c   :  { %6279 = vpow2.f32 %v4336_v23 }
 0x45e   :  { %v6274_v35 = vpop.eup %6273 }
 0x45f   :  { %v1418_v11 = vmul.f32 %v6274_v35, %v1182_v24  ;;  %v6276_v6 = vpop.eup %6275  ;;  %v4341_v24 = vld [vmem:[%s8434_s0 + $0x88] sm:$0xff] }
 0x460   :  { %v1407_v33 = vadd.f32 1.0, %v6276_v6 }
 0x462   :  { %6281 = vrcp.f32 %v1407_v33  ;;  %v4343_v33 = vld [vmem:[%s8434_s0 + $0x98] sm:$0xff] }
 0x465   :  { %v6278_v42 = vpop.eup %6277 }
 0x466   :  { %v1409_v51 = vadd.f32 1.0, %v6278_v42  ;;  %v6280_v20 = vpop.eup %6279 }
 0x467   :  { %v1408_v38 = vadd.f32 1.0, %v6280_v20 }
 0x468   :  { %6283 = vrcp.f32 %v1409_v51 }
 0x469   :  { %6285 = vrcp.f32 %v1408_v38 }
 0x46c   :  { %v6282_v18 = vpop.eup %6281 }
 0x472   :  { %v6284_v22 = vpop.eup %6283 }
 0x473   :  { %v1419_v30 = vmul.f32 %v6284_v22, %v6282_v18  ;;  %v6286_v36 = vpop.eup %6285  ;;  %v1522_v18 = vpop.permute.xlu1 %1521 }
 0x474   :  { %v1516_v22 = vpop.permute.xlu0 %1515 }
 0x475   :  { %v7492_v41 = vadd.f32 %v1419_v30, %v1418_v11  ;;  %v1524_v30 = vsel %vm139_vm1, %v1516_v22, %v1522_v18  ;;  %v2230_v18 = vld [vmem:[%s8432_s3 + $0x60] sm:$0xff] }
 0x477   :  { %6287 = vtanh.f32 %v7492_v41  ;;  %4859 = vmatmul.mubr.f32.vlgmr.msra.gmra.mrb[12].mxu0 %v7492_v41 }
 0x478   :  { %5692 = vmatpush1.bf16.msra.mxu0 %v7309_v53  ;;  %1732 = vmatprep.mubr.f32.mxu0 %v6422_v4 }
 0x479   :  { %5694 = vmatprep.subr.bf16.mxu0 %v7313_v26 }
 0x47c   :  { %5696 = vmatpush1.bf16.msra.mxu0 %v7330_v13 }
 0x47d   :  { %5698 = vmatprep.subr.bf16.mxu0 %v7334_v27 }
 0x480   :  { %5700 = vmatpush1.bf16.msra.mxu0 %v7349_v19 }
 0x481   :  { %v6288_v44 = vpop.eup %6287  ;;  %5702 = vmatprep.subr.bf16.mxu0 %v7352_v25 }
 0x482   :  { %v7503_v59 = vmul.f32 %v6288_v44, %v6286_v36 }
 0x484   :  { %5704 = vmatpush1.bf16.msra.mxu0 %v7367_v1  ;;  %1662 = vmatmul.mubr.f32.vlgmr.msra.gmra.mrb[12].mxu1 %v7503_v59 }
 0x485   :  { %5706 = vmatprep.subr.bf16.mxu0 %v7370_v32  ;;  %5723 = vmatpush3.bf16.msra.mxu1 %v7103_v45  ;;  %v1914_v45 = vld [vmem:[%s8432_s3 + $0x148] sm:$0xff] }
 0x486   :  { %5724 = vmatprep.subr.bf16.mxu1 %v6420_v0  ;;  %4893 = vmatprep.mubr.msk.f32.mxu1 %vm6421_vm0, %v6422_v4 }
 0x488   :  { %5708 = vmatpush1.bf16.msra.mxu0 %v7388_v49 }
 0x489   :  { %5710 = vmatprep.subr.bf16.mxu0 %v7391_v50  ;;  %5726 = vmatpush3.bf16.msra.mxu1 %v7113_v58  ;;  %v1918_v58 = vld [vmem:[%s8432_s3 + $0x168] sm:$0xff] }
 0x48a   :  { %5727 = vmatprep.subr.bf16.mxu1 %v6420_v0 }
 0x48c   :  { %5712 = vmatpush1.bf16.msra.mxu0 %v7410_v54 }
 0x48d   :  { %5714 = vmatprep.subr.bf16.mxu0 %v7413_v52  ;;  %5729 = vmatpush3.bf16.msra.mxu1 %v7123_v16  ;;  %v7551_v16 = vpack.c.bf16 %v1918_v58, %v1914_v45  ;;  %v4342_v58 = vld [vmem:[%s8434_s0 + $0x90] sm:$0xff] }
 0x48e   :  { %5730 = vmatprep.subr.bf16.mxu1 %v6420_v0 }
 0x490   :  { %5716 = vmatpush1.bf16.msra.mxu0 %v7430_v5 }
 0x491   :  { %5718 = vmatprep.subr.bf16.mxu0 %v7433_v10  ;;  %5732 = vmatpush3.bf16.msra.mxu1 %v7133_v39  ;;  %v1913_v39 = vld [vmem:[%s8432_s3 + $0x140] sm:$0xff] }
 0x492   :  { %5733 = vmatprep.subr.bf16.mxu1 %v6420_v0 }
 0x494   :  { %5720 = vmatpush1.bf16.msra.mxu0 %v7444_v2 }
 0x495   :  { %5746 = vmatprep.subr.bf16.mxu0 %v7141_v31  ;;  %5735 = vmatpush3.bf16.msra.mxu1 %v7161_v48  ;;  %v1917_v31 = vld [vmem:[%s8432_s3 + $0x160] sm:$0xff]  ;;  %v1922_v48 = vld [vmem:[%s8432_s3 + $0x188] sm:$0xff] }
 0x496   :  { %5736 = vmatprep.subr.bf16.mxu1 %v6420_v0 }
 0x497   :  { %1733 = vmatmul.mubr.f32.vlgmr.msra.gmra.mrb[14].mxu0 %v7503_v59 }
 0x498   :  { %5748 = vmatpush1.bf16.msra.mxu0 %v7150_v40  ;;  %2006 = vmatprep.mubr.f32.mxu0 %v6422_v4  ;;  %v7559_v40 = vpack.c.bf16 %v1917_v31, %v1913_v39 }
 0x499   :  { %5750 = vmatprep.subr.bf16.mxu0 %v7169_v17  ;;  %5738 = vmatpush3.bf16.msra.mxu1 %v7192_v8  ;;  %v1926_v17 = vld [vmem:[%s8432_s3 + $0x1a8] sm:$0xff]  ;;  %v1921_v8 = vld [vmem:[%s8432_s3 + $0x180] sm:$0xff] }
 0x49a   :  { %5739 = vmatprep.subr.bf16.mxu1 %v6420_v0 }
 0x49c   :  { %5752 = vmatpush1.bf16.msra.mxu0 %v7178_v56  ;;  %v7569_v56 = vpack.c.bf16 %v1926_v17, %v1922_v48 }
 0x49d   :  { %5754 = vmatprep.subr.bf16.mxu0 %v7203_v63  ;;  %5741 = vmatpush3.bf16.msra.mxu1 %v7217_v15  ;;  %v1925_v63 = vld [vmem:[%s8432_s3 + $0x1a0] sm:$0xff]  ;;  %v1930_v15 = vld [vmem:[%s8432_s3 + $0x1c8] sm:$0xff] }
 0x49e   :  { %5742 = vmatprep.subr.bf16.mxu1 %v6420_v0 }
 0x4a0   :  { %5756 = vmatpush1.bf16.msra.mxu0 %v7205_v7  ;;  %v7577_v7 = vpack.c.bf16 %v1925_v63, %v1921_v8 }
 0x4a1   :  { %5758 = vmatprep.subr.bf16.mxu0 %v7230_v34  ;;  %5744 = vmatpush3.bf16.msra.mxu1 %v7263_v47  ;;  %v1934_v34 = vld [vmem:[%s8432_s3 + $0x1e8] sm:$0xff]  ;;  %v1933_v47 = vld [vmem:[%s8432_s3 + $0x1e0] sm:$0xff] }
 0x4a2   :  { %5778 = vmatprep.subr.bf16.mxu1 %v7266_v57 }
 0x4a4   :  { %5760 = vmatpush1.bf16.msra.mxu0 %v7242_v46  ;;  %v7587_v46 = vpack.c.bf16 %v1934_v34, %v1930_v15 }
 0x4a5   :  { %5762 = vmatprep.subr.bf16.mxu0 %v7251_v14  ;;  %v1929_v14 = vld [vmem:[%s8432_s3 + $0x1c0] sm:$0xff] }
 0x4a6   :  { %v7595_v57 = vpack.c.bf16 %v1933_v47, %v1929_v14 }
 0x4a8   :  { %5764 = vmatpush1.bf16.msra.mxu0 %v7269_v3 }
 0x4a9   :  { %5766 = vmatprep.subr.bf16.mxu0 %v7551_v16 }
 0x4ac   :  { %5768 = vmatpush1.bf16.msra.mxu0 %v7559_v40 }
 0x4ad   :  { %5770 = vmatprep.subr.bf16.mxu0 %v7569_v56 }
 0x4b0   :  { %5772 = vmatpush1.bf16.msra.mxu0 %v7577_v7 }
 0x4b1   :  { %5774 = vmatprep.subr.bf16.mxu0 %v7587_v46 }
 0x4b4   :  { %5776 = vmatpush1.bf16.msra.mxu0 %v7595_v57 }
 0x4b5   :  { %5809 = vmatprep.subr.bf16.mxu0 %v6420_v0 }
 0x54a   :  { %v1507_v3 = vpop.f32.mrb[12].mxu0 }
 0x54b   :  { %v4860_v60 = vpop.f32.mrb[13].mxu0  ;;  %v1508_v55 = vadd.f32 %v7606_v43, %v1507_v3 }
 0x557   :  { %v1663_v62 = vpop.f32.mrb[12].mxu1 }
 0x558   :  { %v1664_v9 = vadd.f32 %v4340_v61, %v1663_v62  ;;  %v1665_v28 = vpop.f32.mrb[13].mxu1 }
 0x559   :  { %v1666_v35 = vadd.f32 %v4341_v24, %v1665_v28  ;;  %v2222_v24 = vld [vmem:[%s8432_s3 + $0x20] sm:$0xff] }
 0x55a   :  { %v4344_v37 = vmul.f32 -1.442695, %v1664_v9 }
 0x55b   :  { %v4345_v23 = vmul.f32 -1.442695, %v1666_v35 }
 0x55c   :  { %6289 = vpow2.f32 %v4344_v37 }
 0x55d   :  { %6291 = vtanh.f32 %v1508_v55  ;;  %v2218_v55 = vld [vmem:[%s8432_s3] sm:$0xff] }
 0x55e   :  { %v7700_v35 = vpack.c.bf16 %v2222_v24, %v2218_v55  ;;  %v4350_v55 = vld [vmem:[%s8434_s0 + $0xa0] sm:$0xff] }
 0x566   :  { %v6290_v11 = vpop.eup %6289 }
 0x567   :  { %v1751_v6 = vadd.f32 1.0, %v6290_v11  ;;  %v6292_v51 = vpop.eup %6291  ;;  %v2123_v11 = vld [vmem:[%s8431_s4 + $0x40] sm:$0xff] }
 0x568   :  { %v1525_v36 = vsub.f32 %v7492_v41, %v6292_v51  ;;  %v1526_v44 = vmul.f32 %v6292_v51, %v1524_v30  ;;  %v2126_v30 = vld [vmem:[%s8431_s4 + $0x58] sm:$0xff] }
 0x569   :  { %6293 = vrcp.f32 %v1751_v6  ;;  %v2124_v6 = vld [vmem:[%s8431_s4 + $0x48] sm:$0xff] }
 0x56a   :  { %v1734_v42 = vpop.f32.mrb[14].mxu0  ;;  %6295 = vpow2.f32 %v4345_v23  ;;  %v1527_v31 = vadd.f32 %v1526_v44, %v1525_v36  ;;  %v7711_v23 = vpack.c.bf16 %v2124_v6, %v2123_v11  ;;  %v2235_v36 = vld [vmem:[%s8432_s3 + $0x88] sm:$0xff] }
 0x56b   :  { %v1736_v20 = vpop.f32.mrb[15].mxu0  ;;  %v1735_v39 = vadd.f32 %v4342_v58, %v1734_v42  ;;  %v2231_v42 = vld [vmem:[%s8432_s3 + $0x68] sm:$0xff]  ;;  %v2234_v58 = vld [vmem:[%s8432_s3 + $0x80] sm:$0xff] }
 0x56c   :  { %v1737_v38 = vadd.f32 %v4343_v33, %v1736_v20  ;;  %v2227_v33 = vld [vmem:[%s8432_s3 + $0x48] sm:$0xff]  ;;  %v2226_v20 = vld [vmem:[%s8432_s3 + $0x40] sm:$0xff] }
 0x56d   :  { %v4346_v63 = vmul.f32 -1.442695, %v1735_v39  ;;  %v7719_v51 = vpack.c.bf16 %v2231_v42, %v2227_v33  ;;  %v7728_v22 = vpack.c.bf16 %v2230_v18, %v2226_v20  ;;  %v2238_v39 = vld [vmem:[%s8432_s3 + $0xa0] sm:$0xff]  ;;  %v4351_v20 = vld [vmem:[%s8434_s0 + $0xa8] sm:$0xff] }
 0x56e   :  { %v4347_v45 = vmul.f32 -1.442695, %v1737_v38  ;;  %v2125_v38 = vld [vmem:[%s8431_s4 + $0x50] sm:$0xff] }
 0x56f   :  { %v7742_v44 = vpack.c.bf16 %v2126_v30, %v2125_v38 }
 0x570   :  { %6297 = vpow2.f32 %v4347_v45  ;;  %v2239_v45 = vld [vmem:[%s8432_s3 + $0xa8] sm:$0xff] }
 0x571   :  { %6299 = vpow2.f32 %v4346_v63  ;;  %v2243_v63 = vld [vmem:[%s8432_s3 + $0xc8] sm:$0xff] }
 0x573   :  { %v6294_v48 = vpop.eup %6293 }
 0x574   :  { %v1763_v17 = vmul.f32 %v6294_v48, %v1527_v31  ;;  %v6296_v8 = vpop.eup %6295  ;;  %v7753_v31 = vpack.c.bf16 %v2239_v45, %v2235_v36  ;;  %v7755_v48 = vpack.c.bf16 %v2238_v39, %v2234_v58  ;;  %v4353_v45 = vld [vmem:[%s8434_s0 + $0xb8] sm:$0xff] }
 0x575   :  { %v1752_v15 = vadd.f32 1.0, %v6296_v8  ;;  %v2128_v8 = vld [vmem:[%s8431_s4 + $0x68] sm:$0xff] }
 0x577   :  { %6301 = vrcp.f32 %v1752_v15 }
 0x57a   :  { %v6298_v34 = vpop.eup %6297 }
 0x57b   :  { %v1754_v14 = vadd.f32 1.0, %v6298_v34  ;;  %v6300_v41 = vpop.eup %6299  ;;  %v2247_v34 = vld [vmem:[%s8432_s3 + $0xe8] sm:$0xff] }
 0x57c   :  { %v1753_v60 = vadd.f32 1.0, %v6300_v41  ;;  %v2246_v41 = vld [vmem:[%s8432_s3 + $0xe0] sm:$0xff] }
 0x57d   :  { %6303 = vrcp.f32 %v1754_v14  ;;  %v2242_v14 = vld [vmem:[%s8432_s3 + $0xc0] sm:$0xff] }
 0x57e   :  { %6305 = vrcp.f32 %v1753_v60  ;;  %v2130_v60 = vld [vmem:[%s8431_s4 + $0x78] sm:$0xff] }
 0x581   :  { %v6302_v47 = vpop.eup %6301 }
 0x587   :  { %v6304_v3 = vpop.eup %6303 }
 0x588   :  { %v1764_v61 = vmul.f32 %v6304_v3, %v6302_v47  ;;  %v6306_v9 = vpop.eup %6305  ;;  %v7780_v47 = vpack.c.bf16 %v2247_v34, %v2243_v63  ;;  %v2129_v3 = vld [vmem:[%s8431_s4 + $0x70] sm:$0xff]  ;;  %v1861_v63 = vpop.permute.xlu0 %1860 }
 0x58a   :  { %v7620_v62 = vadd.f32 %v1764_v61, %v1763_v17  ;;  %v2127_v17 = vld [vmem:[%s8431_s4 + $0x60] sm:$0xff]  ;;  %v2251_v61 = vld [vmem:[%s8432_s3 + $0x108] sm:$0xff] }
 0x58b   :  { %v7767_v15 = vpack.c.bf16 %v2128_v8, %v2127_v17  ;;  %v1867_v8 = vpop.permute.xlu1 %1866 }
 0x58c   :  { %6307 = vtanh.f32 %v7620_v62  ;;  %4894 = vmatmul.mubr.f32.vlgmr.msra.gmra.mrb[14].mxu1 %v7620_v62 }
 0x58d   :  { %5780 = vmatpush1.bf16.msra.mxu1 %v7309_v53  ;;  %2077 = vmatprep.mubr.f32.mxu1 %v6422_v4  ;;  %v2115_v53 = vld [vmem:[%s8431_s4] sm:$0xff] }
 0x58e   :  { %5782 = vmatprep.subr.bf16.mxu1 %v7313_v26  ;;  %v2116_v26 = vld [vmem:[%s8431_s4 + $0x8] sm:$0xff] }
 0x591   :  { %5784 = vmatpush1.bf16.msra.mxu1 %v7330_v13  ;;  %v7653_v13 = vpack.c.bf16 %v2116_v26, %v2115_v53  ;;  %v2250_v53 = vld [vmem:[%s8432_s3 + $0x100] sm:$0xff] }
 0x592   :  { %5786 = vmatprep.subr.bf16.mxu1 %v7334_v27  ;;  %v2117_v27 = vld [vmem:[%s8431_s4 + $0x10] sm:$0xff] }
 0x595   :  { %5788 = vmatpush1.bf16.msra.mxu1 %v7349_v19  ;;  %v2118_v19 = vld [vmem:[%s8431_s4 + $0x18] sm:$0xff] }
 0x596   :  { %v6308_v28 = vpop.eup %6307  ;;  %5790 = vmatprep.subr.bf16.mxu1 %v7352_v25  ;;  %v7663_v25 = vpack.c.bf16 %v2118_v19, %v2117_v27  ;;  %v2254_v27 = vld [vmem:[%s8432_s3 + $0x120] sm:$0xff]  ;;  %v2221_v19 = vld [vmem:[%s8432_s3 + $0x18] sm:$0xff] }
 0x597   :  { %v7631_v37 = vmul.f32 %v6308_v28, %v6306_v9  ;;  %v7792_v9 = vpack.c.bf16 %v2246_v41, %v2242_v14  ;;  %v2255_v28 = vld [vmem:[%s8432_s3 + $0x128] sm:$0xff]  ;;  %v1869_v14 = vsel %vm139_vm1, %v1861_v63, %v1867_v8  ;;  %v2237_v8 = vld [vmem:[%s8432_s3 + $0x98] sm:$0xff] }
 0x598   :  { %v7801_v26 = vpack.c.bf16 %v2255_v28, %v2251_v61  ;;  %v4352_v61 = vld [vmem:[%s8434_s0 + $0xb0] sm:$0xff]  ;;  %v2241_v63 = vld [vmem:[%s8432_s3 + $0xb8] sm:$0xff] }
 0x599   :  { %5792 = vmatpush1.bf16.msra.mxu1 %v7367_v1  ;;  %2007 = vmatmul.mubr.f32.vlgmr.msra.gmra.mrb[16].mxu0 %v7631_v37  ;;  %v2119_v1 = vld [vmem:[%s8431_s4 + $0x20] sm:$0xff] }
 0x59a   :  { %5794 = vmatprep.subr.bf16.mxu1 %v7370_v32  ;;  %4928 = vmatprep.mubr.msk.f32.mxu0 %vm6421_vm0, %v6422_v4  ;;  %v2120_v32 = vld [vmem:[%s8431_s4 + $0x28] sm:$0xff] }
 0x59b   :  { %5811 = vmatpush3.bf16.msra.mxu0 %v7653_v13 }
 0x59c   :  { %5812 = vmatprep.subr.bf16.mxu0 %v6420_v0 }
 0x59d   :  { %5796 = vmatpush1.bf16.msra.mxu1 %v7388_v49  ;;  %v7673_v49 = vpack.c.bf16 %v2120_v32, %v2119_v1  ;;  %v2225_v1 = vld [vmem:[%s8432_s3 + $0x38] sm:$0xff]  ;;  %v7813_v32 = vpack.c.bf16 %v2130_v60, %v2129_v3 }
 0x59e   :  { %5798 = vmatprep.subr.bf16.mxu1 %v7391_v50  ;;  %v2121_v50 = vld [vmem:[%s8431_s4 + $0x30] sm:$0xff] }
 0x59f   :  { %5814 = vmatpush3.bf16.msra.mxu0 %v7663_v25 }
 0x5a0   :  { %5815 = vmatprep.subr.bf16.mxu0 %v6420_v0 }
 0x5a1   :  { %5800 = vmatpush1.bf16.msra.mxu1 %v7410_v54  ;;  %v2122_v54 = vld [vmem:[%s8431_s4 + $0x38] sm:$0xff] }
 0x5a2   :  { %5802 = vmatprep.subr.bf16.mxu1 %v7413_v52  ;;  %v7683_v52 = vpack.c.bf16 %v2122_v54, %v2121_v50  ;;  %v7816_v50 = vpack.c.bf16 %v2225_v1, %v2221_v19  ;;  %v7819_v54 = vpack.c.bf16 %v2254_v27, %v2250_v53 }
 0x5a3   :  { %5817 = vmatpush3.bf16.msra.mxu0 %v7673_v49 }
 0x5a4   :  { %5818 = vmatprep.subr.bf16.mxu0 %v6420_v0 }
 0x5a5   :  { %5804 = vmatpush1.bf16.msra.mxu1 %v7430_v5  ;;  %v2219_v5 = vld [vmem:[%s8432_s3 + $0x8] sm:$0xff] }
 0x5a6   :  { %5806 = vmatprep.subr.bf16.mxu1 %v7433_v10  ;;  %v2223_v10 = vld [vmem:[%s8432_s3 + $0x28] sm:$0xff] }
 0x5a7   :  { %5820 = vmatpush3.bf16.msra.mxu0 %v7683_v52 }
 0x5a8   :  { %5821 = vmatprep.subr.bf16.mxu0 %v6420_v0 }
 0x5a9   :  { %5808 = vmatpush1.bf16.msra.mxu1 %v7444_v2  ;;  %v7691_v2 = vpack.c.bf16 %v2223_v10, %v2219_v5 }
 0x5ab   :  { %5834 = vmatprep.subr.bf16.mxu1 %v7691_v2  ;;  %5823 = vmatpush3.bf16.msra.mxu0 %v7711_v23 }
 0x5ac   :  { %2078 = vmatmul.mubr.f32.vlgmr.msra.gmra.mrb[16].mxu1 %v7631_v37  ;;  %5824 = vmatprep.subr.bf16.mxu0 %v6420_v0 }
 0x5ad   :  { %2351 = vmatprep.mubr.f32.mxu1 %v6422_v4  ;;  %5836 = vmatpush1.bf16.msra.mxu1 %v7700_v35 }
 0x5ae   :  { %5838 = vmatprep.subr.bf16.mxu1 %v7719_v51 }
 0x5af   :  { %5826 = vmatpush3.bf16.msra.mxu0 %v7742_v44 }
 0x5b0   :  { %5827 = vmatprep.subr.bf16.mxu0 %v6420_v0 }
 0x5b1   :  { %5840 = vmatpush1.bf16.msra.mxu1 %v7728_v22 }
 0x5b2   :  { %5842 = vmatprep.subr.bf16.mxu1 %v7753_v31 }
 0x5b3   :  { %5829 = vmatpush3.bf16.msra.mxu0 %v7767_v15 }
 0x5b4   :  { %5830 = vmatprep.subr.bf16.mxu0 %v6420_v0 }
 0x5b5   :  { %5844 = vmatpush1.bf16.msra.mxu1 %v7755_v48 }
 0x5b6   :  { %5846 = vmatprep.subr.bf16.mxu1 %v7780_v47 }
 0x5b7   :  { %5832 = vmatpush3.bf16.msra.mxu0 %v7813_v32 }
 0x5b8   :  { %5866 = vmatprep.subr.bf16.mxu0 %v7816_v50 }
 0x5b9   :  { %5848 = vmatpush1.bf16.msra.mxu1 %v7792_v9 }
 0x5ba   :  { %5850 = vmatprep.subr.bf16.mxu1 %v7801_v26 }
 0x5bd   :  { %5852 = vmatpush1.bf16.msra.mxu1 %v7819_v54 }
 0x5be   :  { %5854 = vmatprep.subr.bf16.mxu1 %v7551_v16 }
 0x5c1   :  { %5856 = vmatpush1.bf16.msra.mxu1 %v7559_v40 }
 0x5c2   :  { %5858 = vmatprep.subr.bf16.mxu1 %v7569_v56 }
 0x5c5   :  { %5860 = vmatpush1.bf16.msra.mxu1 %v7577_v7 }
 0x5c6   :  { %5862 = vmatprep.subr.bf16.mxu1 %v7587_v46 }
 0x5c9   :  { %5864 = vmatpush1.bf16.msra.mxu1 %v7595_v57 }
 0x5ca   :  { %5897 = vmatprep.subr.bf16.mxu1 %v6420_v0 }
 0x65f   :  { %v1852_v5 = vpop.f32.mrb[14].mxu1 }
 0x660   :  { %v4895_v10 = vpop.f32.mrb[15].mxu1  ;;  %v1853_v42 = vadd.f32 %v7606_v43, %v1852_v5 }
 0x66c   :  { %v2008_v24 = vpop.f32.mrb[16].mxu0 }
 0x66d   :  { %v2009_v11 = vadd.f32 %v4350_v55, %v2008_v24  ;;  %v2010_v6 = vpop.f32.mrb[17].mxu0 }
 0x66e   :  { %v2011_v18 = vadd.f32 %v4351_v20, %v2010_v6  ;;  %v2220_v6 = vld [vmem:[%s8432_s3 + $0x10] sm:$0xff] }
 0x66f   :  { %v4354_v33 = vmul.f32 -1.442695, %v2009_v11 }
 0x670   :  { %v4355_v36 = vmul.f32 -1.442695, %v2011_v18  ;;  %v2229_v18 = vld [vmem:[%s8432_s3 + $0x58] sm:$0xff] }
 0x671   :  { %6309 = vpow2.f32 %v4354_v33  ;;  %v2224_v33 = vld [vmem:[%s8432_s3 + $0x30] sm:$0xff] }
 0x672   :  { %6311 = vtanh.f32 %v1853_v42 }
 0x67b   :  { %v6310_v38 = vpop.eup %6309 }
 0x67c   :  { %v2096_v30 = vadd.f32 1.0, %v6310_v38  ;;  %v6312_v39 = vpop.eup %6311  ;;  %v2233_v38 = vld [vmem:[%s8432_s3 + $0x78] sm:$0xff] }
 0x67d   :  { %v1870_v41 = vsub.f32 %v7620_v62, %v6312_v39  ;;  %v1871_v3 = vmul.f32 %v6312_v39, %v1869_v14  ;;  %v2228_v39 = vld [vmem:[%s8432_s3 + $0x50] sm:$0xff]  ;;  %v7884_v14 = vpack.c.bf16 %v2241_v63, %v2237_v8  ;;  %v2273_v8 = vld [vmem:[%s8432_s3 + $0x1b8] sm:$0xff] }
 0x67e   :  { %6313 = vrcp.f32 %v2096_v30 }
 0x67f   :  { %v2079_v58 = vpop.f32.mrb[16].mxu1  ;;  %6315 = vpow2.f32 %v4355_v36  ;;  %v1872_v53 = vadd.f32 %v1871_v3, %v1870_v41  ;;  %v7859_v36 = vpack.c.bf16 %v2224_v33, %v2220_v6  ;;  %v2236_v41 = vld [vmem:[%s8432_s3 + $0x90] sm:$0xff] }
 0x680   :  { %v2081_v17 = vpop.f32.mrb[17].mxu1  ;;  %v2080_v28 = vadd.f32 %v4352_v61, %v2079_v58  ;;  %v7863_v58 = vpack.c.bf16 %v2233_v38, %v2229_v18  ;;  %v2240_v3 = vld [vmem:[%s8432_s3 + $0xb0] sm:$0xff]  ;;  %v2249_v61 = vld [vmem:[%s8432_s3 + $0xf8] sm:$0xff] }
 0x681   :  { %v2082_v34 = vadd.f32 %v4353_v45, %v2081_v17  ;;  %v2232_v17 = vld [vmem:[%s8432_s3 + $0x70] sm:$0xff] }
 0x682   :  { %v4356_v5 = vmul.f32 -1.442695, %v2080_v28  ;;  %v7899_v28 = vpack.c.bf16 %v2240_v3, %v2236_v41  ;;  %v2256_v6 = vld [vmem:[%s8432_s3 + $0x130] sm:$0xff] }
 0x683   :  { %v4357_v60 = vmul.f32 -1.442695, %v2082_v34  ;;  %v7880_v34 = vpack.c.bf16 %v2232_v17, %v2228_v39  ;;  %v2264_v39 = vld [vmem:[%s8432_s3 + $0x170] sm:$0xff]  ;;  %v2269_v17 = vld [vmem:[%s8432_s3 + $0x198] sm:$0xff] }
 0x684   :  { %v2268_v41 = vld [vmem:[%s8432_s3 + $0x190] sm:$0xff] }
 0x685   :  { %6317 = vpow2.f32 %v4357_v60  ;;  %v2245_v60 = vld [vmem:[%s8432_s3 + $0xd8] sm:$0xff]  ;;  %v2272_v3 = vld [vmem:[%s8432_s3 + $0x1b0] sm:$0xff] }
 0x686   :  { %6319 = vpow2.f32 %v4356_v5  ;;  %v2257_v5 = vld [vmem:[%s8432_s3 + $0x138] sm:$0xff] }
 0x688   :  { %v6314_v27 = vpop.eup %6313 }
 0x689   :  { %v2108_v19 = vmul.f32 %v6314_v27, %v1872_v53  ;;  %v6316_v1 = vpop.eup %6315  ;;  %v7902_v53 = vpack.c.bf16 %v2249_v61, %v2245_v60  ;;  %v2244_v27 = vld [vmem:[%s8432_s3 + $0xd0] sm:$0xff]  ;;  %v2277_v60 = vld [vmem:[%s8432_s3 + $0x1d8] sm:$0xff] }
 0x68a   :  { %v2097_v10 = vadd.f32 1.0, %v6316_v1  ;;  %v2253_v1 = vld [vmem:[%s8432_s3 + $0x118] sm:$0xff] }
 0x68b   :  { %v2281_v61 = vld [vmem:[%s8432_s3 + $0x1f8] sm:$0xff] }
 0x68c   :  { %6321 = vrcp.f32 %v2097_v10 }
 0x68f   :  { %v6318_v55 = vpop.eup %6317 }
 0x690   :  { %v2099_v24 = vadd.f32 1.0, %v6318_v55  ;;  %v6320_v62 = vpop.eup %6319 }
 0x691   :  { %v2098_v20 = vadd.f32 1.0, %v6320_v62  ;;  %v7920_v62 = vpack.c.bf16 %v2257_v5, %v2253_v1  ;;  %v2280_v1 = vld [vmem:[%s8432_s3 + $0x1f0] sm:$0xff] }
 0x692   :  { %6323 = vrcp.f32 %v2099_v24 }
 0x693   :  { %6325 = vrcp.f32 %v2098_v20  ;;  %v2265_v20 = vld [vmem:[%s8432_s3 + $0x178] sm:$0xff] }
 0x696   :  { %v6322_v11 = vpop.eup %6321 }
 0x69c   :  { %v6324_v42 = vpop.eup %6323 }
 0x69d   :  { %v2109_v30 = vmul.f32 %v6324_v42, %v6322_v11  ;;  %v6326_v10 = vpop.eup %6325  ;;  %v2252_v11 = vld [vmem:[%s8432_s3 + $0x110] sm:$0xff]  ;;  %v2261_v42 = vld [vmem:[%s8432_s3 + $0x158] sm:$0xff] }
 0x69e   :  { %v7938_v18 = vpack.c.bf16 %v2256_v6, %v2252_v11  ;;  %v7941_v38 = vpack.c.bf16 %v2265_v20, %v2261_v42 }
 0x69f   :  { %v7861_v45 = vadd.f32 %v2109_v30, %v2108_v19  ;;  %v2248_v19 = vld [vmem:[%s8432_s3 + $0xf0] sm:$0xff] }
 0x6a0   :  { %v7917_v55 = vpack.c.bf16 %v2248_v19, %v2244_v27  ;;  %v2260_v30 = vld [vmem:[%s8432_s3 + $0x150] sm:$0xff]  ;;  %v7980_v27 = vpack.c.bf16 %v2272_v3, %v2268_v41  ;;  %v7983_v19 = vpack.c.bf16 %v2281_v61, %v2277_v60 }
 0x6a1   :  { %6327 = vtanh.f32 %v7861_v45  ;;  %4929 = vmatmul.mubr.f32.vlgmr.msra.gmra.mrb[18].mxu0 %v7861_v45  ;;  %v7960_v63 = vpack.c.bf16 %v2264_v39, %v2260_v30 }
 0x6a2   :  { %5868 = vmatpush1.bf16.msra.mxu0 %v7859_v36  ;;  %2422 = vmatprep.mubr.f32.mxu0 %v6422_v4 }
 0x6a3   :  { %5870 = vmatprep.subr.bf16.mxu0 %v7863_v58 }
 0x6a6   :  { %5872 = vmatpush1.bf16.msra.mxu0 %v7880_v34 }
 0x6a7   :  { %5874 = vmatprep.subr.bf16.mxu0 %v7884_v14 }
 0x6aa   :  { %5876 = vmatpush1.bf16.msra.mxu0 %v7899_v28 }
 0x6ab   :  { %v6328_v24 = vpop.eup %6327  ;;  %5878 = vmatprep.subr.bf16.mxu0 %v7902_v53 }
 0x6ac   :  { %v7928_v33 = vmul.f32 %v6328_v24, %v6326_v10  ;;  %v4362_v24 = vld [vmem:[%s8434_s0 + $0xd0] sm:$0xff] }
 0x6ae   :  { %5880 = vmatpush1.bf16.msra.mxu0 %v7917_v55  ;;  %2352 = vmatmul.mubr.f32.vlgmr.msra.gmra.mrb[18].mxu1 %v7928_v33 }
 0x6af   :  { %5882 = vmatprep.subr.bf16.mxu0 %v7920_v62  ;;  %5899 = vmatpush3.bf16.msra.mxu1 %v7653_v13  ;;  %v7963_v13 = vpack.c.bf16 %v2273_v8, %v2269_v17 }
 0x6b0   :  { %5900 = vmatprep.subr.bf16.mxu1 %v6420_v0  ;;  %4963 = vmatprep.mubr.msk.f32.mxu1 %vm6421_vm0, %v6422_v4 }
 0x6b2   :  { %5884 = vmatpush1.bf16.msra.mxu0 %v7938_v18 }
 0x6b3   :  { %5886 = vmatprep.subr.bf16.mxu0 %v7941_v38  ;;  %5902 = vmatpush3.bf16.msra.mxu1 %v7663_v25  ;;  %v2276_v25 = vld [vmem:[%s8432_s3 + $0x1d0] sm:$0xff] }
 0x6b4   :  { %5903 = vmatprep.subr.bf16.mxu1 %v6420_v0  ;;  %v7994_v5 = vpack.c.bf16 %v2280_v1, %v2276_v25 }
 0x6b6   :  { %5888 = vmatpush1.bf16.msra.mxu0 %v7960_v63 }
 0x6b7   :  { %5890 = vmatprep.subr.bf16.mxu0 %v7963_v13  ;;  %5905 = vmatpush3.bf16.msra.mxu1 %v7673_v49 }
 0x6b8   :  { %5906 = vmatprep.subr.bf16.mxu1 %v6420_v0 }
 0x6ba   :  { %5892 = vmatpush1.bf16.msra.mxu0 %v7980_v27 }
 0x6bb   :  { %5894 = vmatprep.subr.bf16.mxu0 %v7983_v19  ;;  %5908 = vmatpush3.bf16.msra.mxu1 %v7683_v52 }
 0x6bc   :  { %5909 = vmatprep.subr.bf16.mxu1 %v6420_v0 }
 0x6be   :  { %5896 = vmatpush1.bf16.msra.mxu0 %v7994_v5 }
 0x6bf   :  { %5922 = vmatprep.subr.bf16.mxu0 %v7691_v2  ;;  %5911 = vmatpush3.bf16.msra.mxu1 %v7711_v23  ;;  %v4360_v2 = vld [vmem:[%s8434_s0 + $0xc0] sm:$0xff] }
 0x6c0   :  { %5912 = vmatprep.subr.bf16.mxu1 %v6420_v0 }
 0x6c1   :  { %2423 = vmatmul.mubr.f32.vlgmr.msra.gmra.mrb[20].mxu0 %v7928_v33 }
 0x6c2   :  { %5924 = vmatpush1.bf16.msra.mxu0 %v7700_v35  ;;  %2696 = vmatprep.mubr.f32.mxu0 %v6422_v4 }
 0x6c3   :  { %5926 = vmatprep.subr.bf16.mxu0 %v7719_v51  ;;  %5914 = vmatpush3.bf16.msra.mxu1 %v7742_v44  ;;  %v4363_v44 = vld [vmem:[%s8434_s0 + $0xd8] sm:$0xff] }
 0x6c4   :  { %5915 = vmatprep.subr.bf16.mxu1 %v6420_v0 }
 0x6c6   :  { %5928 = vmatpush1.bf16.msra.mxu0 %v7728_v22 }
 0x6c7   :  { %5930 = vmatprep.subr.bf16.mxu0 %v7753_v31  ;;  %5917 = vmatpush3.bf16.msra.mxu1 %v7767_v15 }
 0x6c8   :  { %5918 = vmatprep.subr.bf16.mxu1 %v6420_v0 }
 0x6ca   :  { %5932 = vmatpush1.bf16.msra.mxu0 %v7755_v48 }
 0x6cb   :  { %5934 = vmatprep.subr.bf16.mxu0 %v7780_v47  ;;  %5920 = vmatpush3.bf16.msra.mxu1 %v7813_v32  ;;  %v2212_v47 = vpop.permute.xlu1 %2211 }
 0x6cc   :  { %5954 = vmatprep.subr.bf16.mxu1 %v7816_v50 }
 0x6ce   :  { %5936 = vmatpush1.bf16.msra.mxu0 %v7792_v9  ;;  %v2206_v9 = vpop.permute.xlu0 %2205 }
 0x6cf   :  { %5938 = vmatprep.subr.bf16.mxu0 %v7801_v26  ;;  %v2214_v32 = vsel %vm139_vm1, %v2206_v9, %v2212_v47 }
 0x6d2   :  { %5940 = vmatpush1.bf16.msra.mxu0 %v7819_v54 }
 0x6d3   :  { %5942 = vmatprep.subr.bf16.mxu0 %v7551_v16 }
 0x6d6   :  { %5944 = vmatpush1.bf16.msra.mxu0 %v7559_v40 }
 0x6d7   :  { %5946 = vmatprep.subr.bf16.mxu0 %v7569_v56 }
 0x6da   :  { %5948 = vmatpush1.bf16.msra.mxu0 %v7577_v7  ;;  %v4361_v7 = vld [vmem:[%s8434_s0 + $0xc8] sm:$0xff] }
 0x6db   :  { %5950 = vmatprep.subr.bf16.mxu0 %v7587_v46 }
 0x6de   :  { %5952 = vmatpush1.bf16.msra.mxu0 %v7595_v57 }
 0x6df   :  { %5985 = vmatprep.subr.bf16.mxu0 %v6420_v0 }
 0x774   :  { %v2197_v49 = vpop.f32.mrb[18].mxu0 }
 0x775   :  { %v4930_v52 = vpop.f32.mrb[19].mxu0  ;;  %v2198_v56 = vadd.f32 %v7606_v43, %v2197_v49 }
 0x781   :  { %v2353_v35 = vpop.f32.mrb[18].mxu1 }
 0x782   :  { %v2354_v16 = vadd.f32 %v4360_v2, %v2353_v35  ;;  %v2355_v23 = vpop.f32.mrb[19].mxu1  ;;  %v2815_v2 = vld [vmem:[%s8436_s7] sm:$0xff] }
 0x783   :  { %v2356_v46 = vadd.f32 %v4361_v7, %v2355_v23  ;;  %v2810_v23 = vld [vmem:[%s8437_s6 + $0x18] sm:$0xff]  ;;  %v2811_v7 = vld [vmem:[%s8437_s6 + $0x20] sm:$0xff] }
 0x784   :  { %v4364_v40 = vmul.f32 -1.442695, %v2354_v16  ;;  %v2809_v16 = vld [vmem:[%s8437_s6 + $0x10] sm:$0xff] }
 0x785   :  { %v4365_v22 = vmul.f32 -1.442695, %v2356_v46  ;;  %v2812_v46 = vld [vmem:[%s8437_s6 + $0x28] sm:$0xff] }
 0x786   :  { %6329 = vpow2.f32 %v4364_v40 }
 0x787   :  { %6331 = vtanh.f32 %v2198_v56  ;;  %v8145_v56 = vpack.c.bf16 %v2810_v23, %v2809_v16 }
 0x790   :  { %v6330_v57 = vpop.eup %6329 }
 0x791   :  { %v2441_v51 = vadd.f32 1.0, %v6330_v57  ;;  %v6332_v48 = vpop.eup %6331  ;;  %v8157_v57 = vpack.c.bf16 %v2812_v46, %v2811_v7 }
 0x792   :  { %v2215_v50 = vsub.f32 %v7861_v45, %v6332_v48  ;;  %v2216_v54 = vmul.f32 %v6332_v48, %v2214_v32 }
 0x793   :  { %6333 = vrcp.f32 %v2441_v51  ;;  %v2813_v51 = vld [vmem:[%s8437_s6 + $0x30] sm:$0xff] }
 0x794   :  { %v2424_v31 = vpop.f32.mrb[20].mxu0  ;;  %6335 = vpow2.f32 %v4365_v22  ;;  %v2217_v6 = vadd.f32 %v2216_v54, %v2215_v50  ;;  %v2814_v22 = vld [vmem:[%s8437_s6 + $0x38] sm:$0xff] }
 0x795   :  { %v2426_v15 = vpop.f32.mrb[21].mxu0  ;;  %v2425_v11 = vadd.f32 %v4362_v24, %v2424_v31 }
 0x796   :  { %v2427_v26 = vadd.f32 %v4363_v44, %v2426_v15  ;;  %v8167_v44 = vpack.c.bf16 %v2814_v22, %v2813_v51 }
 0x797   :  { %v4366_v39 = vmul.f32 -1.442695, %v2425_v11  ;;  %v4370_v11 = vld [vmem:[%s8434_s0 + $0xe8] sm:$0xff] }
 0x798   :  { %v4367_v10 = vmul.f32 -1.442695, %v2427_v26  ;;  %v4369_v26 = vld [vmem:[%s8434_s0 + $0xe0] sm:$0xff] }
 0x79a   :  { %6337 = vpow2.f32 %v4367_v10 }
 0x79b   :  { %6339 = vpow2.f32 %v4366_v39  ;;  %v4372_v39 = vld [vmem:[%s8434_s0 + $0xf8] sm:$0xff] }
 0x79d   :  { %v6334_v42 = vpop.eup %6333 }
 0x79e   :  { %v2453_v20 = vmul.f32 %v6334_v42, %v2217_v6  ;;  %v6336_v30 = vpop.eup %6335 }
 0x79f   :  { %v2442_v17 = vadd.f32 1.0, %v6336_v30 }
 0x7a1   :  { %6341 = vrcp.f32 %v2442_v17  ;;  %v2551_v17 = vpop.permute.xlu0 %2550 }
 0x7a4   :  { %v6338_v8 = vpop.eup %6337 }
 0x7a5   :  { %v2444_v41 = vadd.f32 1.0, %v6338_v8  ;;  %v6340_v45 = vpop.eup %6339 }
 0x7a6   :  { %v2443_v61 = vadd.f32 1.0, %v6340_v45 }
 0x7a7   :  { %6343 = vrcp.f32 %v2444_v41 }
 0x7a8   :  { %6345 = vrcp.f32 %v2443_v61 }
 0x7ab   :  { %v6342_v3 = vpop.eup %6341 }
 0x7b1   :  { %v6344_v60 = vpop.eup %6343 }
 0x7b2   :  { %v2454_v25 = vmul.f32 %v6344_v60, %v6342_v3  ;;  %v6346_v49 = vpop.eup %6345 }
 0x7b4   :  { %v8042_v1 = vadd.f32 %v2454_v25, %v2453_v20 }
 0x7b6   :  { %6347 = vtanh.f32 %v8042_v1  ;;  %4964 = vmatmul.mubr.f32.vlgmr.msra.gmra.mrb[20].mxu1 %v8042_v1 }
 0x7b7   :  { %5956 = vmatpush1.bf16.msra.mxu1 %v7859_v36  ;;  %2767 = vmatprep.mubr.f32.mxu1 %v6422_v4  ;;  %v2816_v36 = vld [vmem:[%s8436_s7 + $0x8] sm:$0xff] }
 0x7b8   :  { %5958 = vmatprep.subr.bf16.mxu1 %v7863_v58  ;;  %v8064_v58 = vpack.c.bf16 %v2816_v36, %v2815_v2 }
 0x7bb   :  { %5960 = vmatpush1.bf16.msra.mxu1 %v7880_v34  ;;  %v2817_v34 = vld [vmem:[%s8436_s7 + $0x10] sm:$0xff] }
 0x7bc   :  { %5962 = vmatprep.subr.bf16.mxu1 %v7884_v14  ;;  %v2818_v14 = vld [vmem:[%s8436_s7 + $0x18] sm:$0xff] }
 0x7bf   :  { %5964 = vmatpush1.bf16.msra.mxu1 %v7899_v28  ;;  %v8081_v28 = vpack.c.bf16 %v2818_v14, %v2817_v34 }
 0x7c0   :  { %v6348_v52 = vpop.eup %6347  ;;  %5966 = vmatprep.subr.bf16.mxu1 %v7902_v53  ;;  %v2819_v53 = vld [vmem:[%s8436_s7 + $0x20] sm:$0xff] }
 0x7c1   :  { %v8059_v35 = vmul.f32 %v6348_v52, %v6346_v49  ;;  %v4371_v49 = vld [vmem:[%s8434_s0 + $0xf0] sm:$0xff] }
 0x7c3   :  { %5968 = vmatpush1.bf16.msra.mxu1 %v7917_v55  ;;  %2998 = vrot.lane.b32.xlu1 %v8059_v35, %s6424_s13  ;;  %v2820_v55 = vld [vmem:[%s8436_s7 + $0x28] sm:$0xff] }
 0x7c4   :  { %2697 = vmatmul.mubr.f32.vlgmr.msra.gmra.mrb[22].mxu0 %v8059_v35  ;;  %5970 = vmatprep.subr.bf16.mxu1 %v7920_v62  ;;  %v8095_v62 = vpack.c.bf16 %v2820_v55, %v2819_v53 }
 0x7c5   :  { %5987 = vmatpush3.bf16.msra.mxu0 %v8064_v58  ;;  %4982 = vmatprep.mubr.msk.f32.mxu0 %vm6421_vm0, %v6422_v4 }
 0x7c6   :  { %5988 = vmatprep.subr.bf16.mxu0 %v6420_v0 }
 0x7c7   :  { %5972 = vmatpush1.bf16.msra.mxu1 %v7938_v18  ;;  %3350 = vrot.lane.b32.xlu1 %v7631_v37, %s6424_s13  ;;  %v2821_v18 = vld [vmem:[%s8436_s7 + $0x30] sm:$0xff] }
 0x7c8   :  { %5974 = vmatprep.subr.bf16.mxu1 %v7941_v38  ;;  %v2822_v38 = vld [vmem:[%s8436_s7 + $0x38] sm:$0xff] }
 0x7c9   :  { %5990 = vmatpush3.bf16.msra.mxu0 %v8081_v28 }
 0x7ca   :  { %5991 = vmatprep.subr.bf16.mxu0 %v6420_v0 }
 0x7cb   :  { %5976 = vmatpush1.bf16.msra.mxu1 %v7960_v63  ;;  %3695 = vrot.lane.b32.xlu1 %v7378_v21, %s6424_s13  ;;  %v8109_v63 = vpack.c.bf16 %v2822_v38, %v2821_v18 }
 0x7cc   :  { %5978 = vmatprep.subr.bf16.mxu1 %v7963_v13  ;;  %v2807_v13 = vld [vmem:[%s8437_s6] sm:$0xff] }
 0x7cd   :  { %5993 = vmatpush3.bf16.msra.mxu0 %v8095_v62 }
 0x7ce   :  { %5994 = vmatprep.subr.bf16.mxu0 %v6420_v0 }
 0x7cf   :  { %5980 = vmatpush1.bf16.msra.mxu1 %v7980_v27  ;;  %4039 = vrot.lane.b32.xlu1 %v6958_v12, %s6424_s13  ;;  %v2808_v27 = vld [vmem:[%s8437_s6 + $0x8] sm:$0xff] }
 0x7d0   :  { %5982 = vmatprep.subr.bf16.mxu1 %v7983_v19  ;;  %v8133_v19 = vpop.permute.xlu1 %2556 }
 0x7d1   :  { %5996 = vmatpush3.bf16.msra.mxu0 %v8109_v63  ;;  %v2559_v3 = vsel %vm139_vm1, %v2551_v17, %v8133_v19 }
 0x7d2   :  { %5997 = vmatprep.subr.bf16.mxu0 %v6420_v0 }
 0x7d3   :  { %5984 = vmatpush1.bf16.msra.mxu1 %v7994_v5  ;;  %v8135_v5 = vpack.c.bf16 %v2808_v27, %v2807_v13 }
 0x7d4   :  { %6009 = vmatprep.subr.bf16.mxu1 %v6420_v0 }
 0x7d6   :  { %2768 = vmatmul.mubr.f32.vlgmr.msra.gmra.mrb[22].mxu1 %v8059_v35 }
 0x7d7   :  { %6011 = vmatpush3.bf16.msra.mxu1 %v8064_v58  ;;  %5020 = vmatprep.mubr.msk.f32.mxu1 %vm6421_vm0, %v6422_v4 }
 0x7d8   :  { %6012 = vmatprep.subr.bf16.mxu1 %v6420_v0 }
 0x7db   :  { %6014 = vmatpush3.bf16.msra.mxu1 %v8081_v28 }
 0x7dc   :  { %6015 = vmatprep.subr.bf16.mxu1 %v6420_v0 }
 0x7df   :  { %6017 = vmatpush3.bf16.msra.mxu1 %v8095_v62 }
 0x7e0   :  { %6018 = vmatprep.subr.bf16.mxu1 %v6420_v0 }
 0x7e3   :  { %6020 = vmatpush3.bf16.msra.mxu1 %v8109_v63 }
 0x7e4   :  { %6021 = vmatprep.subr.bf16.mxu1 %v6420_v0 }
 0x835   :  { %v2999_v40 = vpop.permute.xlu1 %2998 }
 0x836   :  { %5021 = vmatmul.mubr.msk.f32.vlgmr.msra.gmra.mrb[24].mxu1 %vm139_vm1, %v2999_v40 }
 0x837   :  { %6023 = vmatpush3.bf16.msra.mxu1 %v8135_v5  ;;  %5039 = vmatprep.mubr.msk.f32.mxu1 %vm6421_vm0, %v6422_v4 }
 0x838   :  { %6024 = vmatprep.subr.bf16.mxu1 %v6420_v0 }
 0x839   :  { %v3351_v31 = vpop.permute.xlu1 %3350 }
 0x83b   :  { %6026 = vmatpush3.bf16.msra.mxu1 %v8145_v56 }
 0x83c   :  { %6027 = vmatprep.subr.bf16.mxu1 %v6420_v0 }
 0x83d   :  { %v3696_v48 = vpop.permute.xlu1 %3695 }
 0x83f   :  { %6029 = vmatpush3.bf16.msra.mxu1 %v8157_v57 }
 0x840   :  { %6030 = vmatprep.subr.bf16.mxu1 %v6420_v0 }
 0x841   :  { %v4040_v9 = vpop.permute.xlu1 %4039 }
 0x843   :  { %6032 = vmatpush3.bf16.msra.mxu1 %v8167_v44 }
 0x844   :  { %6057 = vmatprep.subr.bf16.mxu1 %v6420_v0 }
 0x846   :  { %5040 = vmatmul.mubr.msk.f32.vlgmr.msra.gmra.mrb[24].mxu1 %vm139_vm1, %v7081_v29 }
 0x847   :  { %6059 = vmatpush3.bf16.msra.mxu1 %v8064_v58  ;;  %5096 = vmatprep.mubr.msk.f32.mxu1 %vm6421_vm0, %v6422_v4 }
 0x848   :  { %6060 = vmatprep.subr.bf16.mxu1 %v6420_v0 }
 0x84b   :  { %6062 = vmatpush3.bf16.msra.mxu1 %v8081_v28 }
 0x84c   :  { %6063 = vmatprep.subr.bf16.mxu1 %v6420_v0 }
 0x84f   :  { %6065 = vmatpush3.bf16.msra.mxu1 %v8095_v62 }
 0x850   :  { %6066 = vmatprep.subr.bf16.mxu1 %v6420_v0 }
 0x853   :  { %6068 = vmatpush3.bf16.msra.mxu1 %v8109_v63 }
 0x854   :  { %6069 = vmatprep.subr.bf16.mxu1 %v6420_v0 }
 0x856   :  { %5097 = vmatmul.mubr.msk.f32.vlgmr.msra.gmra.mrb[26].mxu1 %vm139_vm1, %v3351_v31 }
 0x857   :  { %6071 = vmatpush3.bf16.msra.mxu1 %v8135_v5  ;;  %5115 = vmatprep.mubr.msk.f32.mxu1 %vm6421_vm0, %v6422_v4 }
 0x858   :  { %6072 = vmatprep.subr.bf16.mxu1 %v6420_v0 }
 0x85b   :  { %6074 = vmatpush3.bf16.msra.mxu1 %v8145_v56 }
 0x85c   :  { %6075 = vmatprep.subr.bf16.mxu1 %v6420_v0 }
 0x85f   :  { %6077 = vmatpush3.bf16.msra.mxu1 %v8157_v57 }
 0x860   :  { %6078 = vmatprep.subr.bf16.mxu1 %v6420_v0 }
 0x863   :  { %6080 = vmatpush3.bf16.msra.mxu1 %v8167_v44 }
 0x864   :  { %6105 = vmatprep.subr.bf16.mxu1 %v6420_v0 }
 0x866   :  { %5116 = vmatmul.mubr.msk.f32.vlgmr.msra.gmra.mrb[26].mxu1 %vm139_vm1, %v7503_v59 }
 0x867   :  { %6107 = vmatpush3.bf16.msra.mxu1 %v8064_v58  ;;  %5172 = vmatprep.mubr.msk.f32.mxu1 %vm6421_vm0, %v6422_v4 }
 0x868   :  { %6108 = vmatprep.subr.bf16.mxu1 %v6420_v0 }
 0x86b   :  { %6110 = vmatpush3.bf16.msra.mxu1 %v8081_v28 }
 0x86c   :  { %6111 = vmatprep.subr.bf16.mxu1 %v6420_v0 }
 0x86f   :  { %6113 = vmatpush3.bf16.msra.mxu1 %v8095_v62 }
 0x870   :  { %6114 = vmatprep.subr.bf16.mxu1 %v6420_v0 }
 0x873   :  { %6116 = vmatpush3.bf16.msra.mxu1 %v8109_v63 }
 0x874   :  { %6117 = vmatprep.subr.bf16.mxu1 %v6420_v0 }
 0x876   :  { %5173 = vmatmul.mubr.msk.f32.vlgmr.msra.gmra.mrb[28].mxu1 %vm139_vm1, %v3696_v48 }
 0x877   :  { %6119 = vmatpush3.bf16.msra.mxu1 %v8135_v5  ;;  %5191 = vmatprep.mubr.msk.f32.mxu1 %vm6421_vm0, %v6422_v4 }
 0x878   :  { %6120 = vmatprep.subr.bf16.mxu1 %v6420_v0 }
 0x87b   :  { %6122 = vmatpush3.bf16.msra.mxu1 %v8145_v56 }
 0x87c   :  { %6123 = vmatprep.subr.bf16.mxu1 %v6420_v0 }
 0x87f   :  { %6125 = vmatpush3.bf16.msra.mxu1 %v8157_v57 }
 0x880   :  { %6126 = vmatprep.subr.bf16.mxu1 %v6420_v0 }
 0x883   :  { %6128 = vmatpush3.bf16.msra.mxu1 %v8167_v44 }
 0x884   :  { %6153 = vmatprep.subr.bf16.mxu1 %v6420_v0 }
 0x886   :  { %5192 = vmatmul.mubr.msk.f32.vlgmr.msra.gmra.mrb[28].mxu1 %vm139_vm1, %v7928_v33 }
 0x887   :  { %6155 = vmatpush3.bf16.msra.mxu1 %v8064_v58  ;;  %5248 = vmatprep.mubr.msk.f32.mxu1 %vm6421_vm0, %v6422_v4 }
 0x888   :  { %6156 = vmatprep.subr.bf16.mxu1 %v6420_v0 }
 0x889   :  { %v2542_v15 = vpop.f32.mrb[20].mxu1 }
 0x88a   :  { %v4965_v47 = vpop.f32.mrb[21].mxu1  ;;  %v2543_v24 = vadd.f32 %v7606_v43, %v2542_v15 }
 0x88b   :  { %6158 = vmatpush3.bf16.msra.mxu1 %v8081_v28 }
 0x88c   :  { %6159 = vmatprep.subr.bf16.mxu1 %v6420_v0 }
 0x88f   :  { %6161 = vmatpush3.bf16.msra.mxu1 %v8095_v62 }
 0x890   :  { %6162 = vmatprep.subr.bf16.mxu1 %v6420_v0 }
 0x893   :  { %6164 = vmatpush3.bf16.msra.mxu1 %v8109_v63 }
 0x894   :  { %6165 = vmatprep.subr.bf16.mxu1 %v6420_v0 }
 0x896   :  { %5249 = vmatmul.mubr.msk.f32.vlgmr.msra.gmra.mrb[30].mxu1 %vm139_vm1, %v4040_v9 }
 0x897   :  { %v2698_v32 = vpop.f32.mrb[22].mxu0  ;;  %6167 = vmatpush3.bf16.msra.mxu1 %v8135_v5  ;;  %5267 = vmatprep.mubr.msk.f32.mxu1 %vm6421_vm0, %v6422_v4 }
 0x898   :  { %v2699_v50 = vadd.f32 %v4369_v26, %v2698_v32  ;;  %v2700_v54 = vpop.f32.mrb[23].mxu0  ;;  %6168 = vmatprep.subr.bf16.mxu1 %v6420_v0 }
 0x899   :  { %v2701_v6 = vadd.f32 %v4370_v11, %v2700_v54 }
 0x89a   :  { %v4373_v10 = vmul.f32 -1.442695, %v2699_v50 }
 0x89b   :  { %6170 = vmatpush3.bf16.msra.mxu1 %v8145_v56  ;;  %v4374_v20 = vmul.f32 -1.442695, %v2701_v6 }
 0x89c   :  { %6349 = vpow2.f32 %v4373_v10  ;;  %6171 = vmatprep.subr.bf16.mxu1 %v6420_v0 }
 0x89d   :  { %6351 = vtanh.f32 %v2543_v24 }
 0x89f   :  { %6173 = vmatpush3.bf16.msra.mxu1 %v8157_v57 }
 0x8a0   :  { %6174 = vmatprep.subr.bf16.mxu1 %v6420_v0 }
 0x8a3   :  { %6176 = vmatpush3.bf16.msra.mxu1 %v8167_v44 }
 0x8a6   :  { %v6350_v42 = vpop.eup %6349 }
 0x8a7   :  { %v2786_v30 = vadd.f32 1.0, %v6350_v42  ;;  %v6352_v41 = vpop.eup %6351 }
 0x8a8   :  { %v2560_v61 = vsub.f32 %v8042_v1, %v6352_v41  ;;  %v2561_v25 = vmul.f32 %v6352_v41, %v2559_v3 }
 0x8a9   :  { %6353 = vrcp.f32 %v2786_v30  ;;  %v2769_v43 = vpop.f32.mrb[22].mxu1 }
 0x8aa   :  { %6355 = vpow2.f32 %v4374_v20  ;;  %v2771_v8 = vpop.f32.mrb[23].mxu1  ;;  %v2770_v52 = vadd.f32 %v4371_v49, %v2769_v43  ;;  %v2562_v2 = vadd.f32 %v2561_v25, %v2560_v61 }
 0x8ab   :  { %v2772_v45 = vadd.f32 %v4372_v39, %v2771_v8 }
 0x8ac   :  { %v4375_v53 = vmul.f32 -1.442695, %v2770_v52 }
 0x8ad   :  { %v4376_v60 = vmul.f32 -1.442695, %v2772_v45 }
 0x8af   :  { %6357 = vpow2.f32 %v4376_v60 }
 0x8b0   :  { %6359 = vpow2.f32 %v4375_v53 }
 0x8b3   :  { %v6354_v36 = vpop.eup %6353 }
 0x8b4   :  { %v6356_v34 = vpop.eup %6355  ;;  %v2798_v14 = vmul.f32 %v6354_v36, %v2562_v2 }
 0x8b5   :  { %v2787_v55 = vadd.f32 1.0, %v6356_v34 }
 0x8b7   :  { %6361 = vrcp.f32 %v2787_v55 }
 0x8b9   :  { %v6358_v18 = vpop.eup %6357 }
 0x8ba   :  { %v2789_v38 = vadd.f32 1.0, %v6358_v18  ;;  %v6360_v13 = vpop.eup %6359 }
 0x8bb   :  { %v2788_v19 = vadd.f32 1.0, %v6360_v13 }
 0x8bc   :  { %6363 = vrcp.f32 %v2789_v38 }
 0x8bd   :  { %6365 = vrcp.f32 %v2788_v19 }
 0x8c1   :  { %v6362_v1 = vpop.eup %6361 }
 0x8c6   :  { %v6364_v27 = vpop.eup %6363 }
 0x8c7   :  { %v2799_v16 = vmul.f32 %v6364_v27, %v6362_v1  ;;  %v6366_v40 = vpop.eup %6365 }
 0x8c9   :  { %v2800_v23 = vadd.f32 %v2799_v16, %v2798_v14 }
 0x8cb   :  { %6367 = vtanh.f32 %v2800_v23 }
 0x8d5   :  { %v6368_v7 = vpop.eup %6367 }
 0x8d6   :  { %v2802_v46 = vmul.f32 %v6368_v7, %v6366_v40 }
 0x8d8   :  { %2824 = vrot.lane.b32.xlu0 %v2802_v46, %s6424_s13  ;;  %5268 = vmatmul.mubr.msk.f32.vlgmr.msra.gmra.mrb[30].mxu1 %vm139_vm1, %v2802_v46 }
 0x8dc   :  { %3174 = vrot.lane.b32.xlu0 %v7928_v33, %s6424_s13 }
 0x8e0   :  { %3523 = vrot.lane.b32.xlu0 %v7503_v59, %s6424_s13 }
 0x8e4   :  { %3867 = vrot.lane.b32.xlu0 %v7081_v29, %s6424_s13 }
 0x919   :  { %v8264_v51 = vpop.f32.mrb[24].mxu1 }
 0x91a   :  { %v5041_v22 = vpop.f32.mrb[25].mxu1 }
 0x939   :  { %v8266_v31 = vpop.f32.mrb[26].mxu1 }
 0x93a   :  { %v5117_v48 = vpop.f32.mrb[27].mxu1 }
 0x94a   :  { %v2825_v15 = vpop.permute.xlu0 %2824 }
 0x94b   :  { %4983 = vmatmul.mubr.msk.f32.vlgmr.msra.gmra.mrb[24].mxu0 %vm139_vm1, %v2825_v15 }
 0x94c   :  { %5999 = vmatpush3.bf16.msra.mxu0 %v8135_v5  ;;  %5001 = vmatprep.mubr.msk.f32.mxu0 %vm6421_vm0, %v6422_v4 }
 0x94d   :  { %6000 = vmatprep.subr.bf16.mxu0 %v6420_v0 }
 0x950   :  { %6002 = vmatpush3.bf16.msra.mxu0 %v8145_v56 }
 0x951   :  { %6003 = vmatprep.subr.bf16.mxu0 %v6420_v0 }
 0x954   :  { %6005 = vmatpush3.bf16.msra.mxu0 %v8157_v57 }
 0x955   :  { %6006 = vmatprep.subr.bf16.mxu0 %v6420_v0 }
 0x958   :  { %6008 = vmatpush3.bf16.msra.mxu0 %v8167_v44 }
 0x959   :  { %v8278_v29 = vpop.f32.mrb[28].mxu1  ;;  %6033 = vmatprep.subr.bf16.mxu0 %v6420_v0 }
 0x95a   :  { %v5193_v59 = vpop.f32.mrb[29].mxu1 }
 0x95b   :  { %5002 = vmatmul.mubr.msk.f32.vlgmr.msra.gmra.mrb[24].mxu0 %vm139_vm1, %v6958_v12  ;;  %v3175_v12 = vpop.permute.xlu0 %3174 }
 0x95c   :  { %6035 = vmatpush3.bf16.msra.mxu0 %v8064_v58  ;;  %5058 = vmatprep.mubr.msk.f32.mxu0 %vm6421_vm0, %v6422_v4 }
 0x95d   :  { %6036 = vmatprep.subr.bf16.mxu0 %v6420_v0 }
 0x960   :  { %6038 = vmatpush3.bf16.msra.mxu0 %v8081_v28 }
 0x961   :  { %6039 = vmatprep.subr.bf16.mxu0 %v6420_v0 }
 0x964   :  { %6041 = vmatpush3.bf16.msra.mxu0 %v8095_v62 }
 0x965   :  { %6042 = vmatprep.subr.bf16.mxu0 %v6420_v0 }
 0x968   :  { %6044 = vmatpush3.bf16.msra.mxu0 %v8109_v63 }
 0x969   :  { %6045 = vmatprep.subr.bf16.mxu0 %v6420_v0 }
 0x96b   :  { %5059 = vmatmul.mubr.msk.f32.vlgmr.msra.gmra.mrb[26].mxu0 %vm139_vm1, %v3175_v12 }
 0x96c   :  { %6047 = vmatpush3.bf16.msra.mxu0 %v8135_v5  ;;  %5077 = vmatprep.mubr.msk.f32.mxu0 %vm6421_vm0, %v6422_v4 }
 0x96d   :  { %6048 = vmatprep.subr.bf16.mxu0 %v6420_v0 }
 0x970   :  { %6050 = vmatpush3.bf16.msra.mxu0 %v8145_v56 }
 0x971   :  { %6051 = vmatprep.subr.bf16.mxu0 %v6420_v0 }
 0x974   :  { %6053 = vmatpush3.bf16.msra.mxu0 %v8157_v57 }
 0x975   :  { %6054 = vmatprep.subr.bf16.mxu0 %v6420_v0 }
 0x978   :  { %6056 = vmatpush3.bf16.msra.mxu0 %v8167_v44 }
 0x979   :  { %6081 = vmatprep.subr.bf16.mxu0 %v6420_v0 }
 0x97b   :  { %5078 = vmatmul.mubr.msk.f32.vlgmr.msra.gmra.mrb[26].mxu0 %vm139_vm1, %v7378_v21  ;;  %v3524_v21 = vpop.permute.xlu0 %3523 }
 0x97c   :  { %6083 = vmatpush3.bf16.msra.mxu0 %v8064_v58  ;;  %5134 = vmatprep.mubr.msk.f32.mxu0 %vm6421_vm0, %v6422_v4 }
 0x97d   :  { %6084 = vmatprep.subr.bf16.mxu0 %v6420_v0 }
 0x980   :  { %6086 = vmatpush3.bf16.msra.mxu0 %v8081_v28 }
 0x981   :  { %6087 = vmatprep.subr.bf16.mxu0 %v6420_v0 }
 0x984   :  { %6089 = vmatpush3.bf16.msra.mxu0 %v8095_v62 }
 0x985   :  { %6090 = vmatprep.subr.bf16.mxu0 %v6420_v0 }
 0x988   :  { %6092 = vmatpush3.bf16.msra.mxu0 %v8109_v63 }
 0x989   :  { %6093 = vmatprep.subr.bf16.mxu0 %v6420_v0 }
 0x98b   :  { %5135 = vmatmul.mubr.msk.f32.vlgmr.msra.gmra.mrb[28].mxu0 %vm139_vm1, %v3524_v21 }
 0x98c   :  { %6095 = vmatpush3.bf16.msra.mxu0 %v8135_v5  ;;  %5153 = vmatprep.mubr.msk.f32.mxu0 %vm6421_vm0, %v6422_v4 }
 0x98d   :  { %6096 = vmatprep.subr.bf16.mxu0 %v6420_v0 }
 0x990   :  { %6098 = vmatpush3.bf16.msra.mxu0 %v8145_v56 }
 0x991   :  { %6099 = vmatprep.subr.bf16.mxu0 %v6420_v0 }
 0x994   :  { %6101 = vmatpush3.bf16.msra.mxu0 %v8157_v57 }
 0x995   :  { %6102 = vmatprep.subr.bf16.mxu0 %v6420_v0 }
 0x998   :  { %6104 = vmatpush3.bf16.msra.mxu0 %v8167_v44 }
 0x999   :  { %6129 = vmatprep.subr.bf16.mxu0 %v6420_v0 }
 0x99b   :  { %5154 = vmatmul.mubr.msk.f32.vlgmr.msra.gmra.mrb[28].mxu0 %vm139_vm1, %v7631_v37  ;;  %v3868_v37 = vpop.permute.xlu0 %3867 }
 0x99c   :  { %6131 = vmatpush3.bf16.msra.mxu0 %v8064_v58  ;;  %5210 = vmatprep.mubr.msk.f32.mxu0 %vm6421_vm0, %v6422_v4 }
 0x99d   :  { %6132 = vmatprep.subr.bf16.mxu0 %v6420_v0 }
 0x9a0   :  { %6134 = vmatpush3.bf16.msra.mxu0 %v8081_v28  ;;  %v6425_v28 = vmov 32  }
 0x9a1   :  { %6135 = vmatprep.subr.bf16.mxu0 %v6420_v0  ;;  %6208 = vset.pattern.permute.xlu1 %v6425_v28 }
 0x9a2   :  { %6207 = vset.pattern.permute.xlu0 %v6425_v28 }
 0x9a4   :  { %6137 = vmatpush3.bf16.msra.mxu0 %v8095_v62 }
 0x9a5   :  { %6138 = vmatprep.subr.bf16.mxu0 %v6420_v0 }
 0x9a8   :  { %6140 = vmatpush3.bf16.msra.mxu0 %v8109_v63 }
 0x9a9   :  { %6141 = vmatprep.subr.bf16.mxu0 %v6420_v0 }
 0x9ab   :  { %5211 = vmatmul.mubr.msk.f32.vlgmr.msra.gmra.mrb[30].mxu0 %vm139_vm1, %v3868_v37  ;;  %v8340_v33 = vpop.f32.mrb[30].mxu1 }
 0x9ac   :  { %6143 = vmatpush3.bf16.msra.mxu0 %v8135_v5  ;;  %v5269_v58 = vpop.f32.mrb[31].mxu1  ;;  %5229 = vmatprep.mubr.msk.f32.mxu0 %vm6421_vm0, %v6422_v4 }
 0x9ad   :  { %6144 = vmatprep.subr.bf16.mxu0 %v6420_v0 }
 0x9b0   :  { %6146 = vmatpush3.bf16.msra.mxu0 %v8145_v56 }
 0x9b1   :  { %6147 = vmatprep.subr.bf16.mxu0 %v6420_v0 }
 0x9b4   :  { %6149 = vmatpush3.bf16.msra.mxu0 %v8157_v57 }
 0x9b5   :  { %6150 = vmatprep.subr.bf16.mxu0 %v6420_v0 }
 0x9b8   :  { %6152 = vmatpush3.bf16.msra.mxu0 %v8167_v44 }
 0x9b9   :  { %6177 = vmatprep.subr.bf16.mxu0 %v6420_v0 }
 0x9bb   :  { %5230 = vmatmul.mubr.msk.f32.vlgmr.msra.gmra.mrb[30].mxu0 %vm139_vm1, %v8059_v35 }
 0x9bc   :  { %5278 = vmatprep.mubr.msk.f32.mxu0 %vm6421_vm0, %v6422_v4 }
 0xa2e   :  { %v8356_v62 = vpop.f32.mrb[24].mxu0 }
 0xa2f   :  { %v2972_v63 = vsub.f32 -inf, %v8356_v62  ;;  %v2975_v5 = vsub.f32 %v8356_v62, %v8356_v62  ;;  %v3146_v56 = vmax.f32 %v8356_v62, %v8264_v51  ;;  %v5003_v57 = vpop.f32.mrb[25].mxu0 }
 0xa31   :  { %v2973_v44 = vmul.f32 1.442695, %v2972_v63  ;;  %v2976_v47 = vmul.f32 1.442695, %v2975_v5  ;;  %v3147_v35 = vsub.f32 %v8356_v62, %v3146_v56  ;;  %v3150_v4 = vsub.f32 %v8264_v51, %v3146_v56 }
 0xa33   :  { %6369 = vpow2.f32 %v2973_v44  ;;  %v3148_v9 = vmul.f32 1.442695, %v3147_v35  ;;  %v3151_v26 = vmul.f32 1.442695, %v3150_v4 }
 0xa34   :  { %6371 = vpow2.f32 %v2976_v47 }
 0xa35   :  { %6373 = vpow2.f32 %v3148_v9 }
 0xa36   :  { %6375 = vpow2.f32 %v3151_v26 }
 0xa3d   :  { %v6370_v32 = vpop.eup %6369 }
 0xa3e   :  { %v6372_v50 = vpop.eup %6371  ;;  %v2978_v54 = vmul.f32 0.0, %v6370_v32  ;;  %2982 = vperm.xlu1 %6208, %v6370_v32  }
 0xa3f   :  { %2988 = vperm.xlu0 %6207, %v6372_v50   ;;  %v6374_v10 = vpop.eup %6373 }
 0xa40   :  { %v2979_v24 = vadd.f32 %v6372_v50, %v2978_v54  ;;  %v6376_v11 = vpop.eup %6375 }
 0xa42   :  { %v3153_v6 = vmul.f32 %v6374_v10, %v2979_v24  ;;  %3163 = vperm.xlu1 %6208, %v6376_v11  }
 0xa43   :  { %3157 = vperm.xlu0 %6207, %v6374_v10  }
 0xa44   :  { %v3154_v42 = vadd.f32 %v6376_v11, %v3153_v6 }
 0xa4e   :  { %v8365_v20 = vpop.f32.mrb[26].mxu0 }
 0xa4f   :  { %v3322_v30 = vmax.f32 %v3146_v56, %v8365_v20  ;;  %v5079_v39 = vpop.f32.mrb[27].mxu0 }
 0xa51   :  { %v3323_v43 = vsub.f32 %v3146_v56, %v3322_v30  ;;  %v3326_v17 = vsub.f32 %v8365_v20, %v3322_v30  ;;  %v3498_v8 = vmax.f32 %v3322_v30, %v8266_v31 }
 0xa53   :  { %v3324_v41 = vmul.f32 1.442695, %v3323_v43  ;;  %v3327_v45 = vmul.f32 1.442695, %v3326_v17  ;;  %v3499_v3 = vsub.f32 %v3322_v30, %v3498_v8  ;;  %v3502_v60 = vsub.f32 %v8266_v31, %v3498_v8  ;;  %v4218_v43 = vld [vmem:[%s8438_s8] sm:$0xff]  ;;  %v4219_v17 = vld [vmem:[%s8438_s8 + $0x8] sm:$0xff] }
 0xa55   :  { %6377 = vpow2.f32 %v3324_v41  ;;  %v3500_v61 = vmul.f32 1.442695, %v3499_v3  ;;  %v3503_v25 = vmul.f32 1.442695, %v3502_v60  ;;  %v6178_v41 = vpack.c.bf16 %v4219_v17, %v4218_v43  ;;  %v4399_v17 = vld [vmem:[%s8439_s2 + $0x38] sm:$0xff] }
 0xa56   :  { %6379 = vpow2.f32 %v3327_v45  ;;  %v4221_v45 = vld [vmem:[%s8438_s8 + $0x18] sm:$0xff] }
 0xa57   :  { %6381 = vpow2.f32 %v3500_v61  ;;  %6179 = vmatpush3.bf16.msra.mxu0 %v6178_v41 }
 0xa58   :  { %6383 = vpow2.f32 %v3503_v25  ;;  %6180 = vmatprep.subr.bf16.mxu0 %v6420_v0  ;;  %v4381_v0 = vld [vmem:[%s8439_s2 + $0x8] sm:$0xff] }
 0xa5f   :  { %v6378_v49 = vpop.eup %6377 }
 0xa60   :  { %v6380_v52 = vpop.eup %6379  ;;  %v3329_v2 = vmul.f32 %v6378_v49, %v3154_v42  ;;  %3333 = vperm.xlu0 %6207, %v6378_v49   ;;  %v2992_v49 = vld [vmem:[%s8439_s2] sm:$0xff] }
 0xa61   :  { %3339 = vperm.xlu1 %6208, %v6380_v52   ;;  %v6382_v34 = vpop.eup %6381 }
 0xa62   :  { %v3330_v36 = vadd.f32 %v6380_v52, %v3329_v2  ;;  %v6384_v14 = vpop.eup %6383 }
 0xa64   :  { %v3505_v53 = vmul.f32 %v6382_v34, %v3330_v36  ;;  %3509 = vperm.xlu0 %6207, %v6382_v34  }
 0xa65   :  { %3515 = vperm.xlu1 %6208, %v6384_v14  }
 0xa66   :  { %v3506_v55 = vadd.f32 %v6384_v14, %v3505_v53 }
 0xa6e   :  { %v8371_v18 = vpop.f32.mrb[28].mxu0 }
 0xa6f   :  { %v3670_v38 = vmax.f32 %v3498_v8, %v8371_v18  ;;  %v5155_v13 = vpop.f32.mrb[29].mxu0 }
 0xa71   :  { %v3671_v1 = vsub.f32 %v3498_v8, %v3670_v38  ;;  %v3674_v27 = vsub.f32 %v8371_v18, %v3670_v38  ;;  %v3842_v19 = vmax.f32 %v3670_v38, %v8278_v29  ;;  %v4220_v8 = vld [vmem:[%s8438_s8 + $0x10] sm:$0xff] }
 0xa72   :  { %v6181_v3 = vpack.c.bf16 %v4221_v45, %v4220_v8 }
 0xa73   :  { %v3672_v16 = vmul.f32 1.442695, %v3671_v1  ;;  %v3675_v23 = vmul.f32 1.442695, %v3674_v27  ;;  %v3843_v40 = vsub.f32 %v3670_v38, %v3842_v19  ;;  %v3846_v7 = vsub.f32 %v8278_v29, %v3842_v19 }
 0xa74   :  { %6182 = vmatpush3.bf16.msra.mxu0 %v6181_v3 }
 0xa75   :  { %6385 = vpow2.f32 %v3672_v16  ;;  %v3844_v46 = vmul.f32 1.442695, %v3843_v40  ;;  %v3847_v22 = vmul.f32 1.442695, %v3846_v7 }
 0xa76   :  { %6387 = vpow2.f32 %v3675_v23 }
 0xa77   :  { %6389 = vpow2.f32 %v3844_v46 }
 0xa78   :  { %6391 = vpow2.f32 %v3847_v22 }
 0xa7f   :  { %v6386_v48 = vpop.eup %6385 }
 0xa80   :  { %v6388_v15 = vpop.eup %6387  ;;  %v3677_v59 = vmul.f32 %v6386_v48, %v3506_v55  ;;  %3681 = vperm.xlu0 %6207, %v6386_v48   ;;  %v4387_v48 = vld [vmem:[%s8439_s2 + $0x18] sm:$0xff] }
 0xa81   :  { %3687 = vperm.xlu1 %6208, %v6388_v15   ;;  %v6390_v21 = vpop.eup %6389 }
 0xa82   :  { %v3678_v12 = vadd.f32 %v6388_v15, %v3677_v59  ;;  %v6392_v37 = vpop.eup %6391 }
 0xa84   :  { %v3849_v58 = vmul.f32 %v6390_v21, %v3678_v12  ;;  %3853 = vperm.xlu0 %6207, %v6390_v21  }
 0xa85   :  { %3859 = vperm.xlu1 %6208, %v6392_v37  }
 0xa86   :  { %v3850_v28 = vadd.f32 %v6392_v37, %v3849_v58 }
 0xa8e   :  { %v8377_v63 = vpop.f32.mrb[30].mxu0 }
 0xa8f   :  { %v4014_v5 = vmax.f32 %v3842_v19, %v8377_v63  ;;  %v5231_v56 = vpop.f32.mrb[31].mxu0 }
 0xa91   :  { %v4015_v57 = vsub.f32 %v3842_v19, %v4014_v5  ;;  %v4018_v44 = vsub.f32 %v8377_v63, %v4014_v5  ;;  %v4186_v47 = vmax.f32 %v4014_v5, %v8340_v33  ;;  %v4384_v19 = vld [vmem:[%s8439_s2 + $0x10] sm:$0xff] }
 0xa93   :  { %v4016_v35 = vmul.f32 1.442695, %v4015_v57  ;;  %v4019_v4 = vmul.f32 1.442695, %v4018_v44  ;;  %v4187_v9 = vsub.f32 %v4014_v5, %v4186_v47  ;;  %v4190_v26 = vsub.f32 %v8340_v33, %v4186_v47 }
 0xa95   :  { %6393 = vpow2.f32 %v4016_v35  ;;  %v4188_v32 = vmul.f32 1.442695, %v4187_v9  ;;  %v4191_v50 = vmul.f32 1.442695, %v4190_v26 }
 0xa96   :  { %6395 = vpow2.f32 %v4019_v4  ;;  %v4393_v4 = vld [vmem:[%s8439_s2 + $0x28] sm:$0xff] }
 0xa97   :  { %6397 = vpow2.f32 %v4188_v32 }
 0xa98   :  { %6399 = vpow2.f32 %v4191_v50 }
 0xa9f   :  { %v6394_v54 = vpop.eup %6393 }
 0xaa0   :  { %v6396_v10 = vpop.eup %6395  ;;  %v4021_v24 = vmul.f32 %v6394_v54, %v3850_v28  ;;  %4025 = vperm.xlu0 %6207, %v6394_v54   ;;  %v4390_v28 = vld [vmem:[%s8439_s2 + $0x20] sm:$0xff] }
 0xaa1   :  { %4031 = vperm.xlu1 %6208, %v6396_v10   ;;  %v6398_v6 = vpop.eup %6397 }
 0xaa2   :  { %v4022_v11 = vadd.f32 %v6396_v10, %v4021_v24  ;;  %v6400_v42 = vpop.eup %6399  ;;  %v4396_v24 = vld [vmem:[%s8439_s2 + $0x30] sm:$0xff] }
 0xaa4   :  { %v4193_v30 = vmul.f32 %v6398_v6, %v4022_v11  ;;  %4197 = vperm.xlu0 %6207, %v6398_v6  }
 0xaa5   :  { %4203 = vperm.xlu1 %6208, %v6400_v42  }
 0xaa6   :  { %v4194_v39 = vadd.f32 %v6400_v42, %v4193_v30 }
 0xaa8   :  { %6401 = vrcp.f32 %v4194_v39 }
 0xaa9   :  { %6403 = vtanh.f32 %v8356_v62 }
 0xaaa   :  { %6405 = vtanh.f32 %v8264_v51 }
 0xaab   :  { %6407 = vtanh.f32 %v8365_v20 }
 0xaac   :  { %6409 = vtanh.f32 %v8266_v31 }
 0xaad   :  { %6411 = vtanh.f32 %v8371_v18 }
 0xaae   :  { %6413 = vtanh.f32 %v8278_v29 }
 0xaaf   :  { %6415 = vtanh.f32 %v8377_v63 }
 0xab0   :  { %6417 = vtanh.f32 %v8340_v33 }
 0xab2   :  { %v6402_v60 = vpop.eup %6401 }
 0xab3   :  { %4214 = vperm.xlu1 %6208, %v6402_v60   ;;  %v6404_v25 = vpop.eup %6403 }
 0xab4   :  { %v6406_v36 = vpop.eup %6405 }
 0xab5   :  { %v6408_v27 = vpop.eup %6407 }
 0xab6   :  { %v6410_v22 = vpop.eup %6409 }
 0xab7   :  { %v6412_v58 = vpop.eup %6411 }
 0xab8   :  { %v6414_v35 = vpop.eup %6413 }
 0xab9   :  { %v6416_v10 = vpop.eup %6415 }
 0xaba   :  { %v6418_v43 = vpop.eup %6417 }
 0xabd   :  { %v2983_v61 = vpop.permute.xlu1 %2982 }
 0xabe   :  { %v2989_v52 = vpop.permute.xlu0 %2988  ;;  %v2985_v34 = vmul.f32 0.0, %v2983_v61 }
 0xabf   :  { %v2991_v2 = vmul.f32 %v6404_v25, %v2989_v52 }
 0xac1   :  { %v2993_v14 = vmul.f32 %v2992_v49, %v2991_v2  ;;  %v3164_v53 = vpop.permute.xlu1 %3163 }
 0xac2   :  { %v3166_v55 = vmul.f32 %v6406_v36, %v3164_v53  ;;  %v3158_v51 = vpop.permute.xlu0 %3157 }
 0xac3   :  { %v2994_v62 = vadd.f32 %v2993_v14, %v2985_v34 }
 0xac4   :  { %v3169_v38 = vmul.f32 %v4381_v0, %v3166_v55 }
 0xac5   :  { %v3160_v13 = vmul.f32 %v3158_v51, %v2994_v62 }
 0xac7   :  { %v3170_v1 = vadd.f32 %v3169_v38, %v3160_v13 }
 0xadf   :  { %v3334_v23 = vpop.permute.xlu0 %3333 }
 0xae0   :  { %v3340_v16 = vpop.permute.xlu1 %3339  ;;  %v3336_v46 = vmul.f32 %v3334_v23, %v3170_v1 }
 0xae1   :  { %v3342_v40 = vmul.f32 %v6408_v27, %v3340_v16 }
 0xae3   :  { %v3345_v7 = vmul.f32 %v4384_v19, %v3342_v40  ;;  %v3510_v12 = vpop.permute.xlu0 %3509 }
 0xae4   :  { %v3516_v15 = vpop.permute.xlu1 %3515 }
 0xae5   :  { %v3518_v59 = vmul.f32 %v6410_v22, %v3516_v15  ;;  %v3346_v20 = vadd.f32 %v3345_v7, %v3336_v46 }
 0xae7   :  { %v3521_v31 = vmul.f32 %v4387_v48, %v3518_v59  ;;  %v3512_v21 = vmul.f32 %v3510_v12, %v3346_v20 }
 0xae9   :  { %v3522_v37 = vadd.f32 %v3521_v31, %v3512_v21 }
 0xaff   :  { %v3682_v56 = vpop.permute.xlu0 %3681 }
 0xb00   :  { %v3688_v5 = vpop.permute.xlu1 %3687  ;;  %v3684_v47 = vmul.f32 %v3682_v56, %v3522_v37 }
 0xb01   :  { %v3690_v57 = vmul.f32 %v6412_v58, %v3688_v5 }
 0xb03   :  { %v3693_v44 = vmul.f32 %v4390_v28, %v3690_v57  ;;  %v3854_v32 = vpop.permute.xlu0 %3853 }
 0xb04   :  { %v3860_v9 = vpop.permute.xlu1 %3859 }
 0xb05   :  { %v3862_v26 = vmul.f32 %v6414_v35, %v3860_v9  ;;  %v3694_v18 = vadd.f32 %v3693_v44, %v3684_v47 }
 0xb07   :  { %v3865_v29 = vmul.f32 %v4393_v4, %v3862_v26  ;;  %v3856_v50 = vmul.f32 %v3854_v32, %v3694_v18 }
 0xb09   :  { %v3866_v54 = vadd.f32 %v3865_v29, %v3856_v50 }
 0xb1f   :  { %v4026_v6 = vpop.permute.xlu0 %4025 }
 0xb20   :  { %v4032_v11 = vpop.permute.xlu1 %4031  ;;  %v4028_v39 = vmul.f32 %v4026_v6, %v3866_v54 }
 0xb21   :  { %v4034_v42 = vmul.f32 %v6416_v10, %v4032_v11 }
 0xb23   :  { %v4037_v30 = vmul.f32 %v4396_v24, %v4034_v42  ;;  %v4198_v45 = vpop.permute.xlu0 %4197 }
 0xb24   :  { %v4204_v8 = vpop.permute.xlu1 %4203 }
 0xb25   :  { %v4206_v41 = vmul.f32 %v6418_v43, %v4204_v8  ;;  %v4038_v63 = vadd.f32 %v4037_v30, %v4028_v39 }
 0xb27   :  { %v4209_v33 = vmul.f32 %v4399_v17, %v4206_v41  ;;  %v4200_v3 = vmul.f32 %v4198_v45, %v4038_v63 }
 0xb29   :  { %v4210_v60 = vadd.f32 %v4209_v33, %v4200_v3 }
 0xb32   :  { %v4215_v61 = vpop.permute.xlu1 %4214 }
 0xb33   :  { %v4217_v25 = vmul.f32 %v4215_v61, %v4210_v60 }
 0xb35   :  { %5279 = vmatmul.mubr.msk.f32.vlgmr.msra.gmra.mrb[32].mxu0 %vm4222_vm2, %v4217_v25 }
 0xc08   :  { %v4292_v49 = vpop.f32.mrb[32].mxu0 }
 0xc09   :  { %4297 = vst.msk [vmem:[%s8440_s9] sm:$0xff] %vm4296_vm3, %v4292_v49  ;;  %v5280_v52 = vpop.f32.mrb[33].mxu0 }

</bundles_post_ra>
